<compile_context>
chip_gen: v5e
topology: v5e:2x2
jax: 0.10.0
libtpu: 0.0.40
codegen_flags: <defaults>
</compile_context>

<pallas_src>
import numpy as np

import jax
import jax.numpy as jnp
from jax import lax
from jax.experimental import pallas as pl
from jax.experimental.pallas import tpu as pltpu


# ----------------------------------------------------------------------------
# Fused kernel: conv1 -> pool -> conv2 -> pool -> fc1 -> fc2 -> fc3, one image
# per grid step.  Flattened-lane geometry (32x32 input):
#   x_flat     : (1, 1024)  lane j = y*32 + x
#   conv1 z1   : (6, 958)   valid at j = y*32+x, y,x in [0,30)
#   pool1 a1   : (6, 225)   lane m = p*15 + q, p,q in [0,15)
#   conv2 z2   : (16, 193)  valid at m = y*15+x, y,x in [0,13)
#   pool2 a2   : (16, 36)   lane k = p*6 + q  == PyTorch NCHW flatten order per ch.
# ----------------------------------------------------------------------------
def lenet_fused_kernel(x_ref, w1_ref, b1_ref, s1_ref, w2_ref, b2_ref, s2_ref,
                       f1w_ref, f1b_ref, f2w_ref, f2b_ref, f3w_ref, f3b_ref,
                       out_ref, z1_ref, a1_ref, z2_ref):
    f32 = jnp.float32

    # ---- conv1 (1->6, 3x3, VALID): tap (dh,dw) is the lane window at offset
    #      dh*32+dw.  Cin == 1, so each tap is a VPU broadcast-FMA.
    w1 = w1_ref[...]                                            # (6, 9)
    z1 = jnp.zeros((6, 958), f32)
    for t in range(9):
        dh, dw = t // 3, t % 3
        s = dh * 32 + dw
        z1 = z1 + w1[:, t:t + 1] * x_ref[0, :, s:s + 958]       # (6,1)*(1,958)
    z1_ref[...] = z1

    # ---- 2x2 max-pool of conv1 (+ bias, ReLU).  Window max = max over lane offsets
    #      {0, 1, 32, 33}; the 0/1 selection matmul picks j = 64p+2q and emits the
    #      packed (6, 15*15) layout conv2 consumes.  relu(max(z)+b) == pool(relu(z+b)).
    m1 = jnp.maximum(jnp.maximum(z1_ref[:, 0:925], z1_ref[:, 1:926]),
                     jnp.maximum(z1_ref[:, 32:957], z1_ref[:, 33:958]))   # (6, 925)
    a1 = jnp.dot(m1, s1_ref[...], preferred_element_type=f32)             # (6, 225)
    a1_ref[...] = jnp.maximum(a1 + b1_ref[...], 0.0)

    # ---- conv2 (6->16, 3x3): 9 MXU taps contracting over Cin; tap (dh,dw) reads
    #      the lane window of a1 at offset dh*15+dw.
    z2 = jnp.zeros((16, 193), f32)
    for t in range(9):
        dh, dw = t // 3, t % 3
        s = dh * 15 + dw
        z2 = z2 + jnp.dot(w2_ref[:, t * 6:(t + 1) * 6],          # (16, 6)
                          a1_ref[:, s:s + 193],                  # (6, 193)
                          preferred_element_type=f32)
    z2_ref[...] = z2

    # ---- 2x2 max-pool of conv2 (+ bias, ReLU): offsets {0, 1, 15, 16}; selection
    #      matmul picks m = 30p+2q -> (16, 36) in PyTorch flatten order per channel.
    m2 = jnp.maximum(jnp.maximum(z2_ref[:, 0:161], z2_ref[:, 1:162]),
                     jnp.maximum(z2_ref[:, 15:176], z2_ref[:, 16:177]))   # (16, 161)
    a2 = jnp.dot(m2, s2_ref[...], preferred_element_type=f32)             # (16, 36)
    a2 = jnp.maximum(a2 + b2_ref[...], 0.0)

    # ---- fc1 (576->120): contract over (channel, spatial) without materializing a
    #      576-lane flatten: sum of 16 per-channel (1,36)@(36,120) matmuls.  Weight
    #      rows c*36 + (p*6+q) are exactly PyTorch's NCHW flatten order.
    h = jnp.zeros((1, 120), f32)
    for c in range(16):
        h = h + jnp.dot(a2[c:c + 1, :], f1w_ref[c * 36:(c + 1) * 36, :],
                        preferred_element_type=f32)
    h = jnp.maximum(h + f1b_ref[...], 0.0)

    # ---- fc2 / fc3
    h = jnp.maximum(jnp.dot(h, f2w_ref[...], preferred_element_type=f32)
                    + f2b_ref[...], 0.0)
    out_ref[0] = (jnp.dot(h, f3w_ref[...], preferred_element_type=f32)
                  + f3b_ref[...])


def _wspec(shape):
    # Full-array block, constant block index -> fetched once, resident in VMEM.
    return pl.BlockSpec(shape, lambda i: (0, 0))


@jax.jit
def net_forward(x_nchw, prep):
    """x_nchw: (N, 1, 32, 32) f32.  prep: output of prepare_params().  -> (N, 10)."""
    (w1, b1, s1, w2, b2, s2, f1w, f1b, f2w, f2b, f3w, f3b) = prep
    n = x_nchw.shape[0]
    assert x_nchw.shape[1:] == (1, 32, 32), x_nchw.shape
    x = x_nchw.reshape(n, 1, 32 * 32).astype(jnp.float32)      # free row-major reshape

    out = pl.pallas_call(
        lenet_fused_kernel,
        out_shape=jax.ShapeDtypeStruct((n, 1, 10), jnp.float32),
        grid=(n,),
        in_specs=[
            pl.BlockSpec((1, 1, 1024), lambda i: (i, 0, 0)),   # one image per step
            _wspec(w1.shape), _wspec(b1.shape), _wspec(s1.shape),
            _wspec(w2.shape), _wspec(b2.shape), _wspec(s2.shape),
            _wspec(f1w.shape), _wspec(f1b.shape),
            _wspec(f2w.shape), _wspec(f2b.shape),
            _wspec(f3w.shape), _wspec(f3b.shape),
        ],
        out_specs=pl.BlockSpec((1, 1, 10), lambda i: (i, 0, 0)),
        scratch_shapes=[
            pltpu.VMEM((6, 958), jnp.float32),    # conv1 pre-pool
            pltpu.VMEM((6, 225), jnp.float32),    # pool1 output (conv2 input)
            pltpu.VMEM((16, 193), jnp.float32),   # conv2 pre-pool
        ],
        compiler_params=pltpu.CompilerParams(dimension_semantics=("parallel",)),
    )(x, w1, b1, s1, w2, b2, s2, f1w, f1b, f2w, f2b, f3w, f3b)

    return out.reshape(n, 10)


# ----------------------------------------------------------------------------
# One-time parameter preparation (hoisted out of the forward pass).
# ----------------------------------------------------------------------------
def prepare_params(params):
    (c1w, c1b, c2w, c2b, f1w, f1b, f2w, f2b, f3w, f3b) = params
    f32 = jnp.float32
    # conv taps laid out as [Cout, tap*Cin + cin] with tap = dh*3+dw.
    w1 = jnp.asarray(c1w, f32).reshape(9, 6).T                                  # (6, 9)
    b1 = jnp.asarray(c1b, f32).reshape(6, 1)
    w2 = jnp.asarray(c2w, f32).reshape(9, 6, 16).transpose(2, 0, 1).reshape(16, 54)
    b2 = jnp.asarray(c2b, f32).reshape(16, 1)
    # 0/1 selection matrices: pool-window top-left (flattened) position -> packed lane.
    s1 = np.zeros((925, 225), np.float32)
    for p in range(15):
        for q in range(15):
            s1[64 * p + 2 * q, p * 15 + q] = 1.0
    s2 = np.zeros((161, 36), np.float32)
    for p in range(6):
        for q in range(6):
            s2[30 * p + 2 * q, p * 6 + q] = 1.0
    return (w1, b1, jnp.asarray(s1), w2, b2, jnp.asarray(s2),
            jnp.asarray(f1w, f32), jnp.asarray(f1b, f32).reshape(1, 120),
            jnp.asarray(f2w, f32), jnp.asarray(f2b, f32).reshape(1, 84),
            jnp.asarray(f3w, f32), jnp.asarray(f3b, f32).reshape(1, 10))


# ----------------------------------------------------------------------------
# Pure-JAX reference (matches the PyTorch module) for correctness checking.
# ----------------------------------------------------------------------------
def reference_forward(x_nchw, params):
    (c1w, c1b, c2w, c2b, f1w, f1b, f2w, f2b, f3w, f3b) = params
    dn = ("NCHW", "HWIO", "NCHW")
    y = lax.conv_general_dilated(x_nchw, c1w, (1, 1), "VALID", dimension_numbers=dn)
    y = jnp.maximum(y + c1b.reshape(1, 6, 1, 1), 0.0)
    y = lax.reduce_window(y, -jnp.inf, lax.max, (1, 1, 2, 2), (1, 1, 2, 2), "VALID")
    y = lax.conv_general_dilated(y, c2w, (1, 1), "VALID", dimension_numbers=dn)
    y = jnp.maximum(y + c2b.reshape(1, 16, 1, 1), 0.0)
    y = lax.reduce_window(y, -jnp.inf, lax.max, (1, 1, 2, 2), (1, 1, 2, 2), "VALID")
    y = y.reshape(y.shape[0], -1)                 # PyTorch NCHW flatten -> (N, 576)
    y = jnp.maximum(y @ f1w + f1b, 0.0)
    y = jnp.maximum(y @ f2w + f2b, 0.0)
    return y @ f3w + f3b


# ----------------------------------------------------------------------------
# Deterministic parameter init (PyTorch-style uniform(+-1/sqrt(fan_in)))
# ----------------------------------------------------------------------------
def init_params(key):
    ks = jax.random.split(key, 10)

    def u(k, shape, fan_in):
        bound = 1.0 / np.sqrt(fan_in)
        return jax.random.uniform(k, shape, jnp.float32, -bound, bound)

    c1w = u(ks[0], (3, 3, 1, 6), 1 * 3 * 3)     # conv1 (kh, kw, Cin, Cout)
    c1b = u(ks[1], (6,), 1 * 3 * 3)
    c2w = u(ks[2], (3, 3, 6, 16), 6 * 3 * 3)    # conv2
    c2b = u(ks[3], (16,), 6 * 3 * 3)
    f1w = u(ks[4], (576, 120), 576)             # fc weights stored (in, out)
    f1b = u(ks[5], (120,), 576)
    f2w = u(ks[6], (120, 84), 120)
    f2b = u(ks[7], (84,), 120)
    f3w = u(ks[8], (84, 10), 84)
    f3b = u(ks[9], (10,), 84)
    return (c1w, c1b, c2w, c2b, f1w, f1b, f2w, f2b, f3w, f3b)


if __name__ == "__main__":
    key = jax.random.PRNGKey(0)
    pkey, xkey = jax.random.split(key)
    params = init_params(pkey)
    prep = prepare_params(params)               # one-time weight prep (hoisted)
    # The module's fc1 (16*6*6) implies a 32x32 single-channel input.
    x = jax.random.normal(xkey, (2, 1, 32, 32), dtype=jnp.float32)

    out = jax.block_until_ready(net_forward(x, prep))
    assert out.shape == (2, 10), out.shape
    assert bool(jnp.all(jnp.isfinite(out)))

    ref = jax.block_until_ready(reference_forward(x, params))
    np.testing.assert_allclose(np.asarray(out), np.asarray(ref), rtol=1e-4, atol=1e-4)
    print("KERNEL_OK")
</pallas_src>

<mosaic_0001>
module attributes {stable_mosaic.version = 11 : i64} {
  func.func @lenet_fused_kernel(%arg0: i32, %arg1: memref<1x1x1024xf32, #tpu.memory_space<vmem>>, %arg2: memref<6x9xf32, #tpu.memory_space<vmem>>, %arg3: memref<6x1xf32, #tpu.memory_space<vmem>>, %arg4: memref<925x225xf32, #tpu.memory_space<vmem>>, %arg5: memref<16x54xf32, #tpu.memory_space<vmem>>, %arg6: memref<16x1xf32, #tpu.memory_space<vmem>>, %arg7: memref<161x36xf32, #tpu.memory_space<vmem>>, %arg8: memref<576x120xf32, #tpu.memory_space<vmem>>, %arg9: memref<1x120xf32, #tpu.memory_space<vmem>>, %arg10: memref<120x84xf32, #tpu.memory_space<vmem>>, %arg11: memref<1x84xf32, #tpu.memory_space<vmem>>, %arg12: memref<84x10xf32, #tpu.memory_space<vmem>>, %arg13: memref<1x10xf32, #tpu.memory_space<vmem>>, %arg14: memref<1x1x10xf32, #tpu.memory_space<vmem>>, %arg15: memref<6x958xf32, #tpu.memory_space<vmem>>, %arg16: memref<6x225xf32, #tpu.memory_space<vmem>>, %arg17: memref<16x193xf32, #tpu.memory_space<vmem>>) attributes {dimension_semantics = [#tpu.dimension_semantics<parallel>], iteration_bounds = array<i64: 2>, scalar_prefetch = 0 : i64, scratch_operands = 3 : i64, tpu.core_type = #tpu.core_type<tc>, window_params = [{transform_indices = @transform_0, window_bounds = array<i64: 1, 1, 1024>}, {pipeline_mode = #tpu.pipeline_mode<synchronous>, transform_indices = @transform_1, window_bounds = array<i64: 6, 9>}, {pipeline_mode = #tpu.pipeline_mode<synchronous>, transform_indices = @transform_2, window_bounds = array<i64: 6, 1>}, {pipeline_mode = #tpu.pipeline_mode<synchronous>, transform_indices = @transform_3, window_bounds = array<i64: 925, 225>}, {pipeline_mode = #tpu.pipeline_mode<synchronous>, transform_indices = @transform_4, window_bounds = array<i64: 16, 54>}, {pipeline_mode = #tpu.pipeline_mode<synchronous>, transform_indices = @transform_5, window_bounds = array<i64: 16, 1>}, {pipeline_mode = #tpu.pipeline_mode<synchronous>, transform_indices = @transform_6, window_bounds = array<i64: 161, 36>}, {pipeline_mode = #tpu.pipeline_mode<synchronous>, transform_indices = @transform_7, window_bounds = array<i64: 576, 120>}, {pipeline_mode = #tpu.pipeline_mode<synchronous>, transform_indices = @transform_8, window_bounds = array<i64: 1, 120>}, {pipeline_mode = #tpu.pipeline_mode<synchronous>, transform_indices = @transform_9, window_bounds = array<i64: 120, 84>}, {pipeline_mode = #tpu.pipeline_mode<synchronous>, transform_indices = @transform_10, window_bounds = array<i64: 1, 84>}, {pipeline_mode = #tpu.pipeline_mode<synchronous>, transform_indices = @transform_11, window_bounds = array<i64: 84, 10>}, {pipeline_mode = #tpu.pipeline_mode<synchronous>, transform_indices = @transform_12, window_bounds = array<i64: 1, 10>}, {transform_indices = @transform_13, window_bounds = array<i64: 1, 1, 10>}]} {
    %c0 = arith.constant 0 : index
    %c0_0 = arith.constant 0 : index
    %0 = vector.load %arg2[%c0, %c0_0] : memref<6x9xf32, #tpu.memory_space<vmem>>, vector<6x9xf32>
    %cst = arith.constant 0.000000e+00 : f32
    %1 = vector.broadcast %cst : f32 to vector<6x958xf32>
    %2 = vector.extract_strided_slice %0 {offsets = [0, 0], sizes = [6, 1], strides = [1, 1]} : vector<6x9xf32> to vector<6x1xf32>
    %c0_1 = arith.constant 0 : index
    %c0_2 = arith.constant 0 : index
    %c0_3 = arith.constant 0 : index
    %3 = vector.load %arg1[%c0_1, %c0_2, %c0_3] : memref<1x1x1024xf32, #tpu.memory_space<vmem>>, vector<1x1x958xf32>
    %4 = vector.shape_cast %3 : vector<1x1x958xf32> to vector<1x958xf32>
    %5 = vector.broadcast %2 : vector<6x1xf32> to vector<6x958xf32>
    %6 = vector.broadcast %4 : vector<1x958xf32> to vector<6x958xf32>
    %7 = arith.mulf %5, %6 : vector<6x958xf32>
    %8 = arith.addf %1, %7 : vector<6x958xf32>
    %9 = vector.extract_strided_slice %0 {offsets = [0, 1], sizes = [6, 1], strides = [1, 1]} : vector<6x9xf32> to vector<6x1xf32>
    %c0_4 = arith.constant 0 : index
    %c0_5 = arith.constant 0 : index
    %c1 = arith.constant 1 : index
    %10 = vector.load %arg1[%c0_4, %c0_5, %c1] : memref<1x1x1024xf32, #tpu.memory_space<vmem>>, vector<1x1x958xf32>
    %11 = vector.shape_cast %10 : vector<1x1x958xf32> to vector<1x958xf32>
    %12 = vector.broadcast %9 : vector<6x1xf32> to vector<6x958xf32>
    %13 = vector.broadcast %11 : vector<1x958xf32> to vector<6x958xf32>
    %14 = arith.mulf %12, %13 : vector<6x958xf32>
    %15 = arith.addf %8, %14 : vector<6x958xf32>
    %16 = vector.extract_strided_slice %0 {offsets = [0, 2], sizes = [6, 1], strides = [1, 1]} : vector<6x9xf32> to vector<6x1xf32>
    %c0_6 = arith.constant 0 : index
    %c0_7 = arith.constant 0 : index
    %c2 = arith.constant 2 : index
    %17 = vector.load %arg1[%c0_6, %c0_7, %c2] : memref<1x1x1024xf32, #tpu.memory_space<vmem>>, vector<1x1x958xf32>
    %18 = vector.shape_cast %17 : vector<1x1x958xf32> to vector<1x958xf32>
    %19 = vector.broadcast %16 : vector<6x1xf32> to vector<6x958xf32>
    %20 = vector.broadcast %18 : vector<1x958xf32> to vector<6x958xf32>
    %21 = arith.mulf %19, %20 : vector<6x958xf32>
    %22 = arith.addf %15, %21 : vector<6x958xf32>
    %23 = vector.extract_strided_slice %0 {offsets = [0, 3], sizes = [6, 1], strides = [1, 1]} : vector<6x9xf32> to vector<6x1xf32>
    %c0_8 = arith.constant 0 : index
    %c0_9 = arith.constant 0 : index
    %c32 = arith.constant 32 : index
    %24 = vector.load %arg1[%c0_8, %c0_9, %c32] : memref<1x1x1024xf32, #tpu.memory_space<vmem>>, vector<1x1x958xf32>
    %25 = vector.shape_cast %24 : vector<1x1x958xf32> to vector<1x958xf32>
    %26 = vector.broadcast %23 : vector<6x1xf32> to vector<6x958xf32>
    %27 = vector.broadcast %25 : vector<1x958xf32> to vector<6x958xf32>
    %28 = arith.mulf %26, %27 : vector<6x958xf32>
    %29 = arith.addf %22, %28 : vector<6x958xf32>
    %30 = vector.extract_strided_slice %0 {offsets = [0, 4], sizes = [6, 1], strides = [1, 1]} : vector<6x9xf32> to vector<6x1xf32>
    %c0_10 = arith.constant 0 : index
    %c0_11 = arith.constant 0 : index
    %c33 = arith.constant 33 : index
    %31 = vector.load %arg1[%c0_10, %c0_11, %c33] : memref<1x1x1024xf32, #tpu.memory_space<vmem>>, vector<1x1x958xf32>
    %32 = vector.shape_cast %31 : vector<1x1x958xf32> to vector<1x958xf32>
    %33 = vector.broadcast %30 : vector<6x1xf32> to vector<6x958xf32>
    %34 = vector.broadcast %32 : vector<1x958xf32> to vector<6x958xf32>
    %35 = arith.mulf %33, %34 : vector<6x958xf32>
    %36 = arith.addf %29, %35 : vector<6x958xf32>
    %37 = vector.extract_strided_slice %0 {offsets = [0, 5], sizes = [6, 1], strides = [1, 1]} : vector<6x9xf32> to vector<6x1xf32>
    %c0_12 = arith.constant 0 : index
    %c0_13 = arith.constant 0 : index
    %c34 = arith.constant 34 : index
    %38 = vector.load %arg1[%c0_12, %c0_13, %c34] : memref<1x1x1024xf32, #tpu.memory_space<vmem>>, vector<1x1x958xf32>
    %39 = vector.shape_cast %38 : vector<1x1x958xf32> to vector<1x958xf32>
    %40 = vector.broadcast %37 : vector<6x1xf32> to vector<6x958xf32>
    %41 = vector.broadcast %39 : vector<1x958xf32> to vector<6x958xf32>
    %42 = arith.mulf %40, %41 : vector<6x958xf32>
    %43 = arith.addf %36, %42 : vector<6x958xf32>
    %44 = vector.extract_strided_slice %0 {offsets = [0, 6], sizes = [6, 1], strides = [1, 1]} : vector<6x9xf32> to vector<6x1xf32>
    %c0_14 = arith.constant 0 : index
    %c0_15 = arith.constant 0 : index
    %c64 = arith.constant 64 : index
    %45 = vector.load %arg1[%c0_14, %c0_15, %c64] : memref<1x1x1024xf32, #tpu.memory_space<vmem>>, vector<1x1x958xf32>
    %46 = vector.shape_cast %45 : vector<1x1x958xf32> to vector<1x958xf32>
    %47 = vector.broadcast %44 : vector<6x1xf32> to vector<6x958xf32>
    %48 = vector.broadcast %46 : vector<1x958xf32> to vector<6x958xf32>
    %49 = arith.mulf %47, %48 : vector<6x958xf32>
    %50 = arith.addf %43, %49 : vector<6x958xf32>
    %51 = vector.extract_strided_slice %0 {offsets = [0, 7], sizes = [6, 1], strides = [1, 1]} : vector<6x9xf32> to vector<6x1xf32>
    %c0_16 = arith.constant 0 : index
    %c0_17 = arith.constant 0 : index
    %c65 = arith.constant 65 : index
    %52 = vector.load %arg1[%c0_16, %c0_17, %c65] : memref<1x1x1024xf32, #tpu.memory_space<vmem>>, vector<1x1x958xf32>
    %53 = vector.shape_cast %52 : vector<1x1x958xf32> to vector<1x958xf32>
    %54 = vector.broadcast %51 : vector<6x1xf32> to vector<6x958xf32>
    %55 = vector.broadcast %53 : vector<1x958xf32> to vector<6x958xf32>
    %56 = arith.mulf %54, %55 : vector<6x958xf32>
    %57 = arith.addf %50, %56 : vector<6x958xf32>
    %58 = vector.extract_strided_slice %0 {offsets = [0, 8], sizes = [6, 1], strides = [1, 1]} : vector<6x9xf32> to vector<6x1xf32>
    %c0_18 = arith.constant 0 : index
    %c0_19 = arith.constant 0 : index
    %c66 = arith.constant 66 : index
    %59 = vector.load %arg1[%c0_18, %c0_19, %c66] : memref<1x1x1024xf32, #tpu.memory_space<vmem>>, vector<1x1x958xf32>
    %60 = vector.shape_cast %59 : vector<1x1x958xf32> to vector<1x958xf32>
    %61 = vector.broadcast %58 : vector<6x1xf32> to vector<6x958xf32>
    %62 = vector.broadcast %60 : vector<1x958xf32> to vector<6x958xf32>
    %63 = arith.mulf %61, %62 : vector<6x958xf32>
    %64 = arith.addf %57, %63 : vector<6x958xf32>
    %c0_20 = arith.constant 0 : index
    %c0_21 = arith.constant 0 : index
    %65 = vector.load %arg15[%c0_20, %c0_21] : memref<6x958xf32, #tpu.memory_space<vmem>>, vector<6x958xf32>
    tpu.vector_store %arg15[%c0_20, %c0_21], %64 {strides = array<i32>} : memref<6x958xf32, #tpu.memory_space<vmem>>, vector<6x958xf32>,
    %c0_22 = arith.constant 0 : index
    %c0_23 = arith.constant 0 : index
    %66 = vector.load %arg15[%c0_22, %c0_23] : memref<6x958xf32, #tpu.memory_space<vmem>>, vector<6x925xf32>
    %c0_24 = arith.constant 0 : index
    %c1_25 = arith.constant 1 : index
    %67 = vector.load %arg15[%c0_24, %c1_25] : memref<6x958xf32, #tpu.memory_space<vmem>>, vector<6x925xf32>
    %68 = arith.maximumf %66, %67 : vector<6x925xf32>
    %c0_26 = arith.constant 0 : index
    %c32_27 = arith.constant 32 : index
    %69 = vector.load %arg15[%c0_26, %c32_27] : memref<6x958xf32, #tpu.memory_space<vmem>>, vector<6x925xf32>
    %c0_28 = arith.constant 0 : index
    %c33_29 = arith.constant 33 : index
    %70 = vector.load %arg15[%c0_28, %c33_29] : memref<6x958xf32, #tpu.memory_space<vmem>>, vector<6x925xf32>
    %71 = arith.maximumf %69, %70 : vector<6x925xf32>
    %72 = arith.maximumf %68, %71 : vector<6x925xf32>
    %c0_30 = arith.constant 0 : index
    %c0_31 = arith.constant 0 : index
    %73 = vector.load %arg4[%c0_30, %c0_31] : memref<925x225xf32, #tpu.memory_space<vmem>>, vector<925x225xf32>
    %cst_32 = arith.constant dense<0.000000e+00> : vector<6x225xf32>
    %74 = tpu.matmul %72, %73, %cst_32 {dimension_numbers = #tpu.dot_dimension_numbers<[1], [0], [0], [1], [0, 0, 1, 1], [], []>} : vector<6x925xf32>, vector<925x225xf32>, vector<6x225xf32> -> vector<6x225xf32>
    %c0_33 = arith.constant 0 : index
    %c0_34 = arith.constant 0 : index
    %75 = vector.load %arg3[%c0_33, %c0_34] : memref<6x1xf32, #tpu.memory_space<vmem>>, vector<6x1xf32>
    %76 = vector.broadcast %75 : vector<6x1xf32> to vector<6x225xf32>
    %77 = arith.addf %74, %76 : vector<6x225xf32>
    %cst_35 = arith.constant 0.000000e+00 : f32
    %78 = vector.broadcast %cst_35 : f32 to vector<6x225xf32>
    %79 = arith.maximumf %77, %78 : vector<6x225xf32>
    %c0_36 = arith.constant 0 : index
    %c0_37 = arith.constant 0 : index
    %80 = vector.load %arg16[%c0_36, %c0_37] : memref<6x225xf32, #tpu.memory_space<vmem>>, vector<6x225xf32>
    tpu.vector_store %arg16[%c0_36, %c0_37], %79 {strides = array<i32>} : memref<6x225xf32, #tpu.memory_space<vmem>>, vector<6x225xf32>,
    %cst_38 = arith.constant 0.000000e+00 : f32
    %81 = vector.broadcast %cst_38 : f32 to vector<16x193xf32>
    %c0_39 = arith.constant 0 : index
    %c0_40 = arith.constant 0 : index
    %82 = vector.load %arg5[%c0_39, %c0_40] : memref<16x54xf32, #tpu.memory_space<vmem>>, vector<16x6xf32>
    %c0_41 = arith.constant 0 : index
    %c0_42 = arith.constant 0 : index
    %83 = vector.load %arg16[%c0_41, %c0_42] : memref<6x225xf32, #tpu.memory_space<vmem>>, vector<6x193xf32>
    %cst_43 = arith.constant dense<0.000000e+00> : vector<16x193xf32>
    %84 = tpu.matmul %82, %83, %cst_43 {dimension_numbers = #tpu.dot_dimension_numbers<[1], [0], [0], [1], [0, 0, 1, 1], [], []>} : vector<16x6xf32>, vector<6x193xf32>, vector<16x193xf32> -> vector<16x193xf32>
    %85 = arith.addf %81, %84 : vector<16x193xf32>
    %c0_44 = arith.constant 0 : index
    %c6 = arith.constant 6 : index
    %86 = vector.load %arg5[%c0_44, %c6] : memref<16x54xf32, #tpu.memory_space<vmem>>, vector<16x6xf32>
    %c0_45 = arith.constant 0 : index
    %c1_46 = arith.constant 1 : index
    %87 = vector.load %arg16[%c0_45, %c1_46] : memref<6x225xf32, #tpu.memory_space<vmem>>, vector<6x193xf32>
    %cst_47 = arith.constant dense<0.000000e+00> : vector<16x193xf32>
    %88 = tpu.matmul %86, %87, %cst_47 {dimension_numbers = #tpu.dot_dimension_numbers<[1], [0], [0], [1], [0, 0, 1, 1], [], []>} : vector<16x6xf32>, vector<6x193xf32>, vector<16x193xf32> -> vector<16x193xf32>
    %89 = arith.addf %85, %88 : vector<16x193xf32>
    %c0_48 = arith.constant 0 : index
    %c12 = arith.constant 12 : index
    %90 = vector.load %arg5[%c0_48, %c12] : memref<16x54xf32, #tpu.memory_space<vmem>>, vector<16x6xf32>
    %c0_49 = arith.constant 0 : index
    %c2_50 = arith.constant 2 : index
    %91 = vector.load %arg16[%c0_49, %c2_50] : memref<6x225xf32, #tpu.memory_space<vmem>>, vector<6x193xf32>
    %cst_51 = arith.constant dense<0.000000e+00> : vector<16x193xf32>
    %92 = tpu.matmul %90, %91, %cst_51 {dimension_numbers = #tpu.dot_dimension_numbers<[1], [0], [0], [1], [0, 0, 1, 1], [], []>} : vector<16x6xf32>, vector<6x193xf32>, vector<16x193xf32> -> vector<16x193xf32>
    %93 = arith.addf %89, %92 : vector<16x193xf32>
    %c0_52 = arith.constant 0 : index
    %c18 = arith.constant 18 : index
    %94 = vector.load %arg5[%c0_52, %c18] : memref<16x54xf32, #tpu.memory_space<vmem>>, vector<16x6xf32>
    %c0_53 = arith.constant 0 : index
    %c15 = arith.constant 15 : index
    %95 = vector.load %arg16[%c0_53, %c15] : memref<6x225xf32, #tpu.memory_space<vmem>>, vector<6x193xf32>
    %cst_54 = arith.constant dense<0.000000e+00> : vector<16x193xf32>
    %96 = tpu.matmul %94, %95, %cst_54 {dimension_numbers = #tpu.dot_dimension_numbers<[1], [0], [0], [1], [0, 0, 1, 1], [], []>} : vector<16x6xf32>, vector<6x193xf32>, vector<16x193xf32> -> vector<16x193xf32>
    %97 = arith.addf %93, %96 : vector<16x193xf32>
    %c0_55 = arith.constant 0 : index
    %c24 = arith.constant 24 : index
    %98 = vector.load %arg5[%c0_55, %c24] : memref<16x54xf32, #tpu.memory_space<vmem>>, vector<16x6xf32>
    %c0_56 = arith.constant 0 : index
    %c16 = arith.constant 16 : index
    %99 = vector.load %arg16[%c0_56, %c16] : memref<6x225xf32, #tpu.memory_space<vmem>>, vector<6x193xf32>
    %cst_57 = arith.constant dense<0.000000e+00> : vector<16x193xf32>
    %100 = tpu.matmul %98, %99, %cst_57 {dimension_numbers = #tpu.dot_dimension_numbers<[1], [0], [0], [1], [0, 0, 1, 1], [], []>} : vector<16x6xf32>, vector<6x193xf32>, vector<16x193xf32> -> vector<16x193xf32>
    %101 = arith.addf %97, %100 : vector<16x193xf32>
    %c0_58 = arith.constant 0 : index
    %c30 = arith.constant 30 : index
    %102 = vector.load %arg5[%c0_58, %c30] : memref<16x54xf32, #tpu.memory_space<vmem>>, vector<16x6xf32>
    %c0_59 = arith.constant 0 : index
    %c17 = arith.constant 17 : index
    %103 = vector.load %arg16[%c0_59, %c17] : memref<6x225xf32, #tpu.memory_space<vmem>>, vector<6x193xf32>
    %cst_60 = arith.constant dense<0.000000e+00> : vector<16x193xf32>
    %104 = tpu.matmul %102, %103, %cst_60 {dimension_numbers = #tpu.dot_dimension_numbers<[1], [0], [0], [1], [0, 0, 1, 1], [], []>} : vector<16x6xf32>, vector<6x193xf32>, vector<16x193xf32> -> vector<16x193xf32>
    %105 = arith.addf %101, %104 : vector<16x193xf32>
    %c0_61 = arith.constant 0 : index
    %c36 = arith.constant 36 : index
    %106 = vector.load %arg5[%c0_61, %c36] : memref<16x54xf32, #tpu.memory_space<vmem>>, vector<16x6xf32>
    %c0_62 = arith.constant 0 : index
    %c30_63 = arith.constant 30 : index
    %107 = vector.load %arg16[%c0_62, %c30_63] : memref<6x225xf32, #tpu.memory_space<vmem>>, vector<6x193xf32>
    %cst_64 = arith.constant dense<0.000000e+00> : vector<16x193xf32>
    %108 = tpu.matmul %106, %107, %cst_64 {dimension_numbers = #tpu.dot_dimension_numbers<[1], [0], [0], [1], [0, 0, 1, 1], [], []>} : vector<16x6xf32>, vector<6x193xf32>, vector<16x193xf32> -> vector<16x193xf32>
    %109 = arith.addf %105, %108 : vector<16x193xf32>
    %c0_65 = arith.constant 0 : index
    %c42 = arith.constant 42 : index
    %110 = vector.load %arg5[%c0_65, %c42] : memref<16x54xf32, #tpu.memory_space<vmem>>, vector<16x6xf32>
    %c0_66 = arith.constant 0 : index
    %c31 = arith.constant 31 : index
    %111 = vector.load %arg16[%c0_66, %c31] : memref<6x225xf32, #tpu.memory_space<vmem>>, vector<6x193xf32>
    %cst_67 = arith.constant dense<0.000000e+00> : vector<16x193xf32>
    %112 = tpu.matmul %110, %111, %cst_67 {dimension_numbers = #tpu.dot_dimension_numbers<[1], [0], [0], [1], [0, 0, 1, 1], [], []>} : vector<16x6xf32>, vector<6x193xf32>, vector<16x193xf32> -> vector<16x193xf32>
    %113 = arith.addf %109, %112 : vector<16x193xf32>
    %c0_68 = arith.constant 0 : index
    %c48 = arith.constant 48 : index
    %114 = vector.load %arg5[%c0_68, %c48] : memref<16x54xf32, #tpu.memory_space<vmem>>, vector<16x6xf32>
    %c0_69 = arith.constant 0 : index
    %c32_70 = arith.constant 32 : index
    %115 = vector.load %arg16[%c0_69, %c32_70] : memref<6x225xf32, #tpu.memory_space<vmem>>, vector<6x193xf32>
    %cst_71 = arith.constant dense<0.000000e+00> : vector<16x193xf32>
    %116 = tpu.matmul %114, %115, %cst_71 {dimension_numbers = #tpu.dot_dimension_numbers<[1], [0], [0], [1], [0, 0, 1, 1], [], []>} : vector<16x6xf32>, vector<6x193xf32>, vector<16x193xf32> -> vector<16x193xf32>
    %117 = arith.addf %113, %116 : vector<16x193xf32>
    %c0_72 = arith.constant 0 : index
    %c0_73 = arith.constant 0 : index
    %118 = vector.load %arg17[%c0_72, %c0_73] : memref<16x193xf32, #tpu.memory_space<vmem>>, vector<16x193xf32>
    tpu.vector_store %arg17[%c0_72, %c0_73], %117 {strides = array<i32>} : memref<16x193xf32, #tpu.memory_space<vmem>>, vector<16x193xf32>,
    %c0_74 = arith.constant 0 : index
    %c0_75 = arith.constant 0 : index
    %119 = vector.load %arg17[%c0_74, %c0_75] : memref<16x193xf32, #tpu.memory_space<vmem>>, vector<16x161xf32>
    %c0_76 = arith.constant 0 : index
    %c1_77 = arith.constant 1 : index
    %120 = vector.load %arg17[%c0_76, %c1_77] : memref<16x193xf32, #tpu.memory_space<vmem>>, vector<16x161xf32>
    %121 = arith.maximumf %119, %120 : vector<16x161xf32>
    %c0_78 = arith.constant 0 : index
    %c15_79 = arith.constant 15 : index
    %122 = vector.load %arg17[%c0_78, %c15_79] : memref<16x193xf32, #tpu.memory_space<vmem>>, vector<16x161xf32>
    %c0_80 = arith.constant 0 : index
    %c16_81 = arith.constant 16 : index
    %123 = vector.load %arg17[%c0_80, %c16_81] : memref<16x193xf32, #tpu.memory_space<vmem>>, vector<16x161xf32>
    %124 = arith.maximumf %122, %123 : vector<16x161xf32>
    %125 = arith.maximumf %121, %124 : vector<16x161xf32>
    %c0_82 = arith.constant 0 : index
    %c0_83 = arith.constant 0 : index
    %126 = vector.load %arg7[%c0_82, %c0_83] : memref<161x36xf32, #tpu.memory_space<vmem>>, vector<161x36xf32>
    %cst_84 = arith.constant dense<0.000000e+00> : vector<16x36xf32>
    %127 = tpu.matmul %125, %126, %cst_84 {dimension_numbers = #tpu.dot_dimension_numbers<[1], [0], [0], [1], [0, 0, 1, 1], [], []>} : vector<16x161xf32>, vector<161x36xf32>, vector<16x36xf32> -> vector<16x36xf32>
    %c0_85 = arith.constant 0 : index
    %c0_86 = arith.constant 0 : index
    %128 = vector.load %arg6[%c0_85, %c0_86] : memref<16x1xf32, #tpu.memory_space<vmem>>, vector<16x1xf32>
    %129 = vector.broadcast %128 : vector<16x1xf32> to vector<16x36xf32>
    %130 = arith.addf %127, %129 : vector<16x36xf32>
    %cst_87 = arith.constant 0.000000e+00 : f32
    %131 = vector.broadcast %cst_87 : f32 to vector<16x36xf32>
    %132 = arith.maximumf %130, %131 : vector<16x36xf32>
    %cst_88 = arith.constant 0.000000e+00 : f32
    %133 = vector.broadcast %cst_88 : f32 to vector<1x120xf32>
    %134 = vector.extract_strided_slice %132 {offsets = [0, 0], sizes = [1, 36], strides = [1, 1]} : vector<16x36xf32> to vector<1x36xf32>
    %c0_89 = arith.constant 0 : index
    %c0_90 = arith.constant 0 : index
    %135 = vector.load %arg8[%c0_89, %c0_90] : memref<576x120xf32, #tpu.memory_space<vmem>>, vector<36x120xf32>
    %cst_91 = arith.constant dense<0.000000e+00> : vector<1x120xf32>
    %136 = tpu.matmul %134, %135, %cst_91 {dimension_numbers = #tpu.dot_dimension_numbers<[1], [0], [0], [1], [0, 0, 1, 1], [], []>} : vector<1x36xf32>, vector<36x120xf32>, vector<1x120xf32> -> vector<1x120xf32>
    %137 = arith.addf %133, %136 : vector<1x120xf32>
    %138 = vector.extract_strided_slice %132 {offsets = [1, 0], sizes = [1, 36], strides = [1, 1]} : vector<16x36xf32> to vector<1x36xf32>
    %c36_92 = arith.constant 36 : index
    %c0_93 = arith.constant 0 : index
    %139 = vector.load %arg8[%c36_92, %c0_93] : memref<576x120xf32, #tpu.memory_space<vmem>>, vector<36x120xf32>
    %cst_94 = arith.constant dense<0.000000e+00> : vector<1x120xf32>
    %140 = tpu.matmul %138, %139, %cst_94 {dimension_numbers = #tpu.dot_dimension_numbers<[1], [0], [0], [1], [0, 0, 1, 1], [], []>} : vector<1x36xf32>, vector<36x120xf32>, vector<1x120xf32> -> vector<1x120xf32>
    %141 = arith.addf %137, %140 : vector<1x120xf32>
    %142 = vector.extract_strided_slice %132 {offsets = [2, 0], sizes = [1, 36], strides = [1, 1]} : vector<16x36xf32> to vector<1x36xf32>
    %c72 = arith.constant 72 : index
    %c0_95 = arith.constant 0 : index
    %143 = vector.load %arg8[%c72, %c0_95] : memref<576x120xf32, #tpu.memory_space<vmem>>, vector<36x120xf32>
    %cst_96 = arith.constant dense<0.000000e+00> : vector<1x120xf32>
    %144 = tpu.matmul %142, %143, %cst_96 {dimension_numbers = #tpu.dot_dimension_numbers<[1], [0], [0], [1], [0, 0, 1, 1], [], []>} : vector<1x36xf32>, vector<36x120xf32>, vector<1x120xf32> -> vector<1x120xf32>
    %145 = arith.addf %141, %144 : vector<1x120xf32>
    %146 = vector.extract_strided_slice %132 {offsets = [3, 0], sizes = [1, 36], strides = [1, 1]} : vector<16x36xf32> to vector<1x36xf32>
    %c108 = arith.constant 108 : index
    %c0_97 = arith.constant 0 : index
    %147 = vector.load %arg8[%c108, %c0_97] : memref<576x120xf32, #tpu.memory_space<vmem>>, vector<36x120xf32>
    %cst_98 = arith.constant dense<0.000000e+00> : vector<1x120xf32>
    %148 = tpu.matmul %146, %147, %cst_98 {dimension_numbers = #tpu.dot_dimension_numbers<[1], [0], [0], [1], [0, 0, 1, 1], [], []>} : vector<1x36xf32>, vector<36x120xf32>, vector<1x120xf32> -> vector<1x120xf32>
    %149 = arith.addf %145, %148 : vector<1x120xf32>
    %150 = vector.extract_strided_slice %132 {offsets = [4, 0], sizes = [1, 36], strides = [1, 1]} : vector<16x36xf32> to vector<1x36xf32>
    %c144 = arith.constant 144 : index
    %c0_99 = arith.constant 0 : index
    %151 = vector.load %arg8[%c144, %c0_99] : memref<576x120xf32, #tpu.memory_space<vmem>>, vector<36x120xf32>
    %cst_100 = arith.constant dense<0.000000e+00> : vector<1x120xf32>
    %152 = tpu.matmul %150, %151, %cst_100 {dimension_numbers = #tpu.dot_dimension_numbers<[1], [0], [0], [1], [0, 0, 1, 1], [], []>} : vector<1x36xf32>, vector<36x120xf32>, vector<1x120xf32> -> vector<1x120xf32>
    %153 = arith.addf %149, %152 : vector<1x120xf32>
    %154 = vector.extract_strided_slice %132 {offsets = [5, 0], sizes = [1, 36], strides = [1, 1]} : vector<16x36xf32> to vector<1x36xf32>
    %c180 = arith.constant 180 : index
    %c0_101 = arith.constant 0 : index
    %155 = vector.load %arg8[%c180, %c0_101] : memref<576x120xf32, #tpu.memory_space<vmem>>, vector<36x120xf32>
    %cst_102 = arith.constant dense<0.000000e+00> : vector<1x120xf32>
    %156 = tpu.matmul %154, %155, %cst_102 {dimension_numbers = #tpu.dot_dimension_numbers<[1], [0], [0], [1], [0, 0, 1, 1], [], []>} : vector<1x36xf32>, vector<36x120xf32>, vector<1x120xf32> -> vector<1x120xf32>
    %157 = arith.addf %153, %156 : vector<1x120xf32>
    %158 = vector.extract_strided_slice %132 {offsets = [6, 0], sizes = [1, 36], strides = [1, 1]} : vector<16x36xf32> to vector<1x36xf32>
    %c216 = arith.constant 216 : index
    %c0_103 = arith.constant 0 : index
    %159 = vector.load %arg8[%c216, %c0_103] : memref<576x120xf32, #tpu.memory_space<vmem>>, vector<36x120xf32>
    %cst_104 = arith.constant dense<0.000000e+00> : vector<1x120xf32>
    %160 = tpu.matmul %158, %159, %cst_104 {dimension_numbers = #tpu.dot_dimension_numbers<[1], [0], [0], [1], [0, 0, 1, 1], [], []>} : vector<1x36xf32>, vector<36x120xf32>, vector<1x120xf32> -> vector<1x120xf32>
    %161 = arith.addf %157, %160 : vector<1x120xf32>
    %162 = vector.extract_strided_slice %132 {offsets = [7, 0], sizes = [1, 36], strides = [1, 1]} : vector<16x36xf32> to vector<1x36xf32>
    %c252 = arith.constant 252 : index
    %c0_105 = arith.constant 0 : index
    %163 = vector.load %arg8[%c252, %c0_105] : memref<576x120xf32, #tpu.memory_space<vmem>>, vector<36x120xf32>
    %cst_106 = arith.constant dense<0.000000e+00> : vector<1x120xf32>
    %164 = tpu.matmul %162, %163, %cst_106 {dimension_numbers = #tpu.dot_dimension_numbers<[1], [0], [0], [1], [0, 0, 1, 1], [], []>} : vector<1x36xf32>, vector<36x120xf32>, vector<1x120xf32> -> vector<1x120xf32>
    %165 = arith.addf %161, %164 : vector<1x120xf32>
    %166 = vector.extract_strided_slice %132 {offsets = [8, 0], sizes = [1, 36], strides = [1, 1]} : vector<16x36xf32> to vector<1x36xf32>
    %c288 = arith.constant 288 : index
    %c0_107 = arith.constant 0 : index
    %167 = vector.load %arg8[%c288, %c0_107] : memref<576x120xf32, #tpu.memory_space<vmem>>, vector<36x120xf32>
    %cst_108 = arith.constant dense<0.000000e+00> : vector<1x120xf32>
    %168 = tpu.matmul %166, %167, %cst_108 {dimension_numbers = #tpu.dot_dimension_numbers<[1], [0], [0], [1], [0, 0, 1, 1], [], []>} : vector<1x36xf32>, vector<36x120xf32>, vector<1x120xf32> -> vector<1x120xf32>
    %169 = arith.addf %165, %168 : vector<1x120xf32>
    %170 = vector.extract_strided_slice %132 {offsets = [9, 0], sizes = [1, 36], strides = [1, 1]} : vector<16x36xf32> to vector<1x36xf32>
    %c324 = arith.constant 324 : index
    %c0_109 = arith.constant 0 : index
    %171 = vector.load %arg8[%c324, %c0_109] : memref<576x120xf32, #tpu.memory_space<vmem>>, vector<36x120xf32>
    %cst_110 = arith.constant dense<0.000000e+00> : vector<1x120xf32>
    %172 = tpu.matmul %170, %171, %cst_110 {dimension_numbers = #tpu.dot_dimension_numbers<[1], [0], [0], [1], [0, 0, 1, 1], [], []>} : vector<1x36xf32>, vector<36x120xf32>, vector<1x120xf32> -> vector<1x120xf32>
    %173 = arith.addf %169, %172 : vector<1x120xf32>
    %174 = vector.extract_strided_slice %132 {offsets = [10, 0], sizes = [1, 36], strides = [1, 1]} : vector<16x36xf32> to vector<1x36xf32>
    %c360 = arith.constant 360 : index
    %c0_111 = arith.constant 0 : index
    %175 = vector.load %arg8[%c360, %c0_111] : memref<576x120xf32, #tpu.memory_space<vmem>>, vector<36x120xf32>
    %cst_112 = arith.constant dense<0.000000e+00> : vector<1x120xf32>
    %176 = tpu.matmul %174, %175, %cst_112 {dimension_numbers = #tpu.dot_dimension_numbers<[1], [0], [0], [1], [0, 0, 1, 1], [], []>} : vector<1x36xf32>, vector<36x120xf32>, vector<1x120xf32> -> vector<1x120xf32>
    %177 = arith.addf %173, %176 : vector<1x120xf32>
    %178 = vector.extract_strided_slice %132 {offsets = [11, 0], sizes = [1, 36], strides = [1, 1]} : vector<16x36xf32> to vector<1x36xf32>
    %c396 = arith.constant 396 : index
    %c0_113 = arith.constant 0 : index
    %179 = vector.load %arg8[%c396, %c0_113] : memref<576x120xf32, #tpu.memory_space<vmem>>, vector<36x120xf32>
    %cst_114 = arith.constant dense<0.000000e+00> : vector<1x120xf32>
    %180 = tpu.matmul %178, %179, %cst_114 {dimension_numbers = #tpu.dot_dimension_numbers<[1], [0], [0], [1], [0, 0, 1, 1], [], []>} : vector<1x36xf32>, vector<36x120xf32>, vector<1x120xf32> -> vector<1x120xf32>
    %181 = arith.addf %177, %180 : vector<1x120xf32>
    %182 = vector.extract_strided_slice %132 {offsets = [12, 0], sizes = [1, 36], strides = [1, 1]} : vector<16x36xf32> to vector<1x36xf32>
    %c432 = arith.constant 432 : index
    %c0_115 = arith.constant 0 : index
    %183 = vector.load %arg8[%c432, %c0_115] : memref<576x120xf32, #tpu.memory_space<vmem>>, vector<36x120xf32>
    %cst_116 = arith.constant dense<0.000000e+00> : vector<1x120xf32>
    %184 = tpu.matmul %182, %183, %cst_116 {dimension_numbers = #tpu.dot_dimension_numbers<[1], [0], [0], [1], [0, 0, 1, 1], [], []>} : vector<1x36xf32>, vector<36x120xf32>, vector<1x120xf32> -> vector<1x120xf32>
    %185 = arith.addf %181, %184 : vector<1x120xf32>
    %186 = vector.extract_strided_slice %132 {offsets = [13, 0], sizes = [1, 36], strides = [1, 1]} : vector<16x36xf32> to vector<1x36xf32>
    %c468 = arith.constant 468 : index
    %c0_117 = arith.constant 0 : index
    %187 = vector.load %arg8[%c468, %c0_117] : memref<576x120xf32, #tpu.memory_space<vmem>>, vector<36x120xf32>
    %cst_118 = arith.constant dense<0.000000e+00> : vector<1x120xf32>
    %188 = tpu.matmul %186, %187, %cst_118 {dimension_numbers = #tpu.dot_dimension_numbers<[1], [0], [0], [1], [0, 0, 1, 1], [], []>} : vector<1x36xf32>, vector<36x120xf32>, vector<1x120xf32> -> vector<1x120xf32>
    %189 = arith.addf %185, %188 : vector<1x120xf32>
    %190 = vector.extract_strided_slice %132 {offsets = [14, 0], sizes = [1, 36], strides = [1, 1]} : vector<16x36xf32> to vector<1x36xf32>
    %c504 = arith.constant 504 : index
    %c0_119 = arith.constant 0 : index
    %191 = vector.load %arg8[%c504, %c0_119] : memref<576x120xf32, #tpu.memory_space<vmem>>, vector<36x120xf32>
    %cst_120 = arith.constant dense<0.000000e+00> : vector<1x120xf32>
    %192 = tpu.matmul %190, %191, %cst_120 {dimension_numbers = #tpu.dot_dimension_numbers<[1], [0], [0], [1], [0, 0, 1, 1], [], []>} : vector<1x36xf32>, vector<36x120xf32>, vector<1x120xf32> -> vector<1x120xf32>
    %193 = arith.addf %189, %192 : vector<1x120xf32>
    %194 = vector.extract_strided_slice %132 {offsets = [15, 0], sizes = [1, 36], strides = [1, 1]} : vector<16x36xf32> to vector<1x36xf32>
    %c540 = arith.constant 540 : index
    %c0_121 = arith.constant 0 : index
    %195 = vector.load %arg8[%c540, %c0_121] : memref<576x120xf32, #tpu.memory_space<vmem>>, vector<36x120xf32>
    %cst_122 = arith.constant dense<0.000000e+00> : vector<1x120xf32>
    %196 = tpu.matmul %194, %195, %cst_122 {dimension_numbers = #tpu.dot_dimension_numbers<[1], [0], [0], [1], [0, 0, 1, 1], [], []>} : vector<1x36xf32>, vector<36x120xf32>, vector<1x120xf32> -> vector<1x120xf32>
    %197 = arith.addf %193, %196 : vector<1x120xf32>
    %c0_123 = arith.constant 0 : index
    %c0_124 = arith.constant 0 : index
    %198 = vector.load %arg9[%c0_123, %c0_124] : memref<1x120xf32, #tpu.memory_space<vmem>>, vector<1x120xf32>
    %199 = arith.addf %197, %198 : vector<1x120xf32>
    %cst_125 = arith.constant 0.000000e+00 : f32
    %200 = vector.broadcast %cst_125 : f32 to vector<1x120xf32>
    %201 = arith.maximumf %199, %200 : vector<1x120xf32>
    %c0_126 = arith.constant 0 : index
    %c0_127 = arith.constant 0 : index
    %202 = vector.load %arg10[%c0_126, %c0_127] : memref<120x84xf32, #tpu.memory_space<vmem>>, vector<120x84xf32>
    %cst_128 = arith.constant dense<0.000000e+00> : vector<1x84xf32>
    %203 = tpu.matmul %201, %202, %cst_128 {dimension_numbers = #tpu.dot_dimension_numbers<[1], [0], [0], [1], [0, 0, 1, 1], [], []>} : vector<1x120xf32>, vector<120x84xf32>, vector<1x84xf32> -> vector<1x84xf32>
    %c0_129 = arith.constant 0 : index
    %c0_130 = arith.constant 0 : index
    %204 = vector.load %arg11[%c0_129, %c0_130] : memref<1x84xf32, #tpu.memory_space<vmem>>, vector<1x84xf32>
    %205 = arith.addf %203, %204 : vector<1x84xf32>
    %cst_131 = arith.constant 0.000000e+00 : f32
    %206 = vector.broadcast %cst_131 : f32 to vector<1x84xf32>
    %207 = arith.maximumf %205, %206 : vector<1x84xf32>
    %c0_132 = arith.constant 0 : index
    %c0_133 = arith.constant 0 : index
    %208 = vector.load %arg12[%c0_132, %c0_133] : memref<84x10xf32, #tpu.memory_space<vmem>>, vector<84x10xf32>
    %cst_134 = arith.constant dense<0.000000e+00> : vector<1x10xf32>
    %209 = tpu.matmul %207, %208, %cst_134 {dimension_numbers = #tpu.dot_dimension_numbers<[1], [0], [0], [1], [0, 0, 1, 1], [], []>} : vector<1x84xf32>, vector<84x10xf32>, vector<1x10xf32> -> vector<1x10xf32>
    %c0_135 = arith.constant 0 : index
    %c0_136 = arith.constant 0 : index
    %210 = vector.load %arg13[%c0_135, %c0_136] : memref<1x10xf32, #tpu.memory_space<vmem>>, vector<1x10xf32>
    %211 = arith.addf %209, %210 : vector<1x10xf32>
    %c0_137 = arith.constant 0 : index
    %c0_138 = arith.constant 0 : index
    %c0_139 = arith.constant 0 : index
    %212 = vector.load %arg14[%c0_137, %c0_138, %c0_139] : memref<1x1x10xf32, #tpu.memory_space<vmem>>, vector<1x1x10xf32>
    %213 = vector.shape_cast %212 : vector<1x1x10xf32> to vector<1x10xf32>
    %214 = vector.shape_cast %211 : vector<1x10xf32> to vector<1x1x10xf32>
    tpu.vector_store %arg14[%c0_137, %c0_138, %c0_139], %214 {strides = array<i32>} : memref<1x1x10xf32, #tpu.memory_space<vmem>>, vector<1x1x10xf32>,
    return
  }
  func.func @transform_0(%arg0: i32) -> (i32, i32, i32) {
    %c0_i32 = arith.constant 0 : i32
    %c0_i32_0 = arith.constant 0 : i32
    %c0_i32_1 = arith.constant 0 : i32
    return %arg0, %c0_i32, %c0_i32_0 : i32, i32, i32
  }
  func.func @transform_1(%arg0: i32) -> (i32, i32) {
    %c0_i32 = arith.constant 0 : i32
    %c0_i32_0 = arith.constant 0 : i32
    %c0_i32_1 = arith.constant 0 : i32
    return %c0_i32, %c0_i32_0 : i32, i32
  }
  func.func @transform_2(%arg0: i32) -> (i32, i32) {
    %c0_i32 = arith.constant 0 : i32
    %c0_i32_0 = arith.constant 0 : i32
    %c0_i32_1 = arith.constant 0 : i32
    return %c0_i32, %c0_i32_0 : i32, i32
  }
  func.func @transform_3(%arg0: i32) -> (i32, i32) {
    %c0_i32 = arith.constant 0 : i32
    %c0_i32_0 = arith.constant 0 : i32
    %c0_i32_1 = arith.constant 0 : i32
    return %c0_i32, %c0_i32_0 : i32, i32
  }
  func.func @transform_4(%arg0: i32) -> (i32, i32) {
    %c0_i32 = arith.constant 0 : i32
    %c0_i32_0 = arith.constant 0 : i32
    %c0_i32_1 = arith.constant 0 : i32
    return %c0_i32, %c0_i32_0 : i32, i32
  }
  func.func @transform_5(%arg0: i32) -> (i32, i32) {
    %c0_i32 = arith.constant 0 : i32
    %c0_i32_0 = arith.constant 0 : i32
    %c0_i32_1 = arith.constant 0 : i32
    return %c0_i32, %c0_i32_0 : i32, i32
  }
  func.func @transform_6(%arg0: i32) -> (i32, i32) {
    %c0_i32 = arith.constant 0 : i32
    %c0_i32_0 = arith.constant 0 : i32
    %c0_i32_1 = arith.constant 0 : i32
    return %c0_i32, %c0_i32_0 : i32, i32
  }
  func.func @transform_7(%arg0: i32) -> (i32, i32) {
    %c0_i32 = arith.constant 0 : i32
    %c0_i32_0 = arith.constant 0 : i32
    %c0_i32_1 = arith.constant 0 : i32
    return %c0_i32, %c0_i32_0 : i32, i32
  }
  func.func @transform_8(%arg0: i32) -> (i32, i32) {
    %c0_i32 = arith.constant 0 : i32
    %c0_i32_0 = arith.constant 0 : i32
    %c0_i32_1 = arith.constant 0 : i32
    return %c0_i32, %c0_i32_0 : i32, i32
  }
  func.func @transform_9(%arg0: i32) -> (i32, i32) {
    %c0_i32 = arith.constant 0 : i32
    %c0_i32_0 = arith.constant 0 : i32
    %c0_i32_1 = arith.constant 0 : i32
    return %c0_i32, %c0_i32_0 : i32, i32
  }
  func.func @transform_10(%arg0: i32) -> (i32, i32) {
    %c0_i32 = arith.constant 0 : i32
    %c0_i32_0 = arith.constant 0 : i32
    %c0_i32_1 = arith.constant 0 : i32
    return %c0_i32, %c0_i32_0 : i32, i32
  }
  func.func @transform_11(%arg0: i32) -> (i32, i32) {
    %c0_i32 = arith.constant 0 : i32
    %c0_i32_0 = arith.constant 0 : i32
    %c0_i32_1 = arith.constant 0 : i32
    return %c0_i32, %c0_i32_0 : i32, i32
  }
  func.func @transform_12(%arg0: i32) -> (i32, i32) {
    %c0_i32 = arith.constant 0 : i32
    %c0_i32_0 = arith.constant 0 : i32
    %c0_i32_1 = arith.constant 0 : i32
    return %c0_i32, %c0_i32_0 : i32, i32
  }
  func.func @transform_13(%arg0: i32) -> (i32, i32, i32) {
    %c0_i32 = arith.constant 0 : i32
    %c0_i32_0 = arith.constant 0 : i32
    %c0_i32_1 = arith.constant 0 : i32
    return %arg0, %c0_i32, %c0_i32_0 : i32, i32, i32
  }
}

</mosaic_0001>

<bundles_post_ra>
// kernel: net_forward.1
= control target key start
LH: loop header
LB: loop body
LE: loop exit
PB: predicated region body
PF: predicated region fallthrough
CT: control target
= control target key end

     0   :  { %s4567_s0 = inlined_call_operand.vmem [shape: f32[2,1,1024], index: 0, kind: input, shape index: {}]   ;;  %s4568_s1 = inlined_call_operand.vmem [shape: f32[6,9], index: 1, kind: input, shape index: {}]   ;;  %s4569_s2 = inlined_call_operand.vmem [shape: f32[6,1], index: 2, kind: input, shape index: {}]   ;;  %s4570_s3 = inlined_call_operand.hbm [shape: f32[925,225], index: 3, kind: input, shape index: {}]   ;;  %s4571_s4 = inlined_call_operand.vmem [shape: f32[16,54], index: 4, kind: input, shape index: {}]   ;;  %s4572_s5 = inlined_call_operand.vmem [shape: f32[16,1], index: 5, kind: input, shape index: {}]   ;;  %s4573_s6 = inlined_call_operand.vmem [shape: f32[161,36], index: 6, kind: input, shape index: {}]   ;;  %s4574_s7 = inlined_call_operand.hbm [shape: f32[576,120], index: 7, kind: input, shape index: {}]   ;;  %s4575_s8 = inlined_call_operand.vmem [shape: f32[1,120], index: 8, kind: input, shape index: {}]   ;;  %s4576_s9 = inlined_call_operand.vmem [shape: f32[120,84], index: 9, kind: input, shape index: {}]   ;;  %s4577_s10 = inlined_call_operand.vmem [shape: f32[1,84], index: 10, kind: input, shape index: {}]   ;;  %s4578_s11 = inlined_call_operand.vmem [shape: f32[84,10], index: 11, kind: input, shape index: {}]   ;;  %s4579_s12 = inlined_call_operand.vmem [shape: f32[1,10], index: 12, kind: input, shape index: {}]   ;;  %s4580_s13 = inlined_call_operand.hbm [shape: f32[2,1,10], index: 13, kind: output, shape index: {}]  }
   0x1   :  { %4585 = sst [smem:[#allocation18_spill]] %s4570_s3 }
   0x2   :  { %18 = vsyncpa [#allocation6], 0 }
   0x3   :  { %19 = vsyncpa [#allocation9], 0 }
   0x4   :  { %20 = vsyncpa [#allocation7], 0 }
   0x5   :  { %22 = vsyncpa [#allocation7 + $0x1], 0  ;;  %s3584_s25 = smov 0   ;;  %s3586_s26 = smov 0  }
   0x6   :  { %s3588_s27 = smov 0   ;;  %s3590_s28 = smov 0  }
   0x7 LB: > { %4586 = sst [smem:[#allocation14_spill]] %s3473_s27  ;;  %s3605_s29 = sadd.s32 4294967295, %s3477_s28   ;;  %s3477_s28 = sphi %s3590_s28, %s4595_s28   ;;  %s3473_s27 = sphi %s3588_s27, %s4597_s27   ;;  %s3469_s26 = sphi %s3586_s26, %s4599_s26   ;;  %s3465_s25 = sphi %s3584_s25, %s4598_s25  }
   0x8   : > { %s3107_s30 = sadd.s32 4294967294, %s3477_s28   ;;  %s3609_s14 = sadd.s32 1, %s3477_s28  }
   0x9   : > { %4587 = sst [smem:[#allocation15_spill]] %s3609_s14  ;;  %s313_s15 = sadd.s32 1, %s3473_s27 }
   0xa   : > { %s310_s16 = ssub.s32 %s3477_s28, %s3609_s14  ;;  %p323_p0 = scmp.ne.s32.totalorder %s3473_s27, %s3469_s26 }
   0xb   : > { %p311_p1 = scmp.eq.s32.totalorder %s310_s16, 0  ;;  %p324_p2 = scmp.eq.s32.totalorder %s3605_s29, 1 }
   0xc   : > { %p329_p3 = scmp.ne.s32.totalorder %s3469_s26, %s3465_s25  ;;  %p330_p4 = scmp.eq.s32.totalorder %s3107_s30, 1 }
   0xd   : > { %s3620_s17 = scalar_select %p311_p1, %s3473_s27, %s313_s15  }
   0xe   : > { %p3622_p5 = por %p324_p2, %p323_p0  ;;  %p3626_p6 = por %p330_p4, %p329_p3 }
   0xf   : > { %4588 = sst [smem:[#allocation16_spill]] %s3620_s17  ;;  %p3108_p7 = scmp.ge.s32.totalorder %s3477_s28, 1 }
  0x10   : > { %s4590_s19 = scalar_select %p3626_p6, 1, 0 }
  0x11   : > { %p337_p8 = scmp.lt.s32.totalorder %s3477_s28, 3  ;;  %p3235_p9 = scmp.eq.s32.totalorder %s3605_s29, 0 }
  0x12   : > { %4591 = sst [smem:[#allocation17_spill]] %s4590_s19  ;;  %s3479_s24 = smov [#allocation5]  }
  0x13   : > { %p3633_p10 = pnand %p3108_p7, %p337_p8  ;;  %s4593_s3 = sld [smem:[#allocation18_spill]] }
  0x14   : > { %s356_s30 = sshll.u32 %s3479_s24, 4  ;;  %s377_s17 = sshll.u32 %s4574_s7, 4  ;;  %s357_s30 = int_to_ptr.vmem [resolvable:$true] %s356_s30  ;;  %s378_s17 = int_to_ptr.hbm [resolvable:$true] %s377_s17 }
  0x15   : > { %p3224_p11 = pneg %p3633_p10  ;;  %s3480_s27 = smov 256  }
  0x16   : > { %s3481_s14 = smov 16   ;;  %s3482_s19 = smov [#allocation8]  }
  0x17   : > { %p3225_p12 = pnand %p3235_p9, %p3224_p11  ;;  %s379_s21 = sshll.u32 %s3482_s19, 4  ;;  %s380_s21 = int_to_ptr.vmem [resolvable:$true] %s379_s21 }
  0x18   : > { %s3483_s22 = smov 128   ;;  %417 = sbr.rel (%p3633_p10) target bundleno = 2016 (0x7e0), region = 72 }
  0x19   : > { %s354_s23 = sshll.u32 %s4593_s3, 4  ;;  %s3484_s3 = smov 8   ;;  %s355_s23 = int_to_ptr.hbm [resolvable:$true] %s354_s23 }
  0x1a   : > { %3227 = dma.hbm_to_vmem [thread:$0]  (!%p3225_p12), %s355_s23, 29696, %s357_s30, [#allocation6], %s3480_s27, %s3480_s27, %s3481_s14  }
  0x1b   : > { %3230 = dma.hbm_to_vmem [thread:$0]  (!%p3225_p12), %s378_s17, 9216, %s380_s21, [#allocation9], %s3483_s22, %s3483_s22, %s3484_s3  }
  0x1d   : > { %3452 = dma.done.wait (%p3235_p9), [#allocation6], 29696  }
  0x1e   : > { %3454 = vsyncadd (%p3235_p9), [#allocation6], 4294937600 }
  0x1f   : > { %3456 = dma.done.wait (%p3235_p9), [#allocation9], 9216  }
  0x20   : > { %3458 = vsyncadd (%p3235_p9), [#allocation9], 4294958080  ;;  %v3485_v0 = vmov 1   ;;  %v3486_v1 = vmov 3   ;;  %v3487_v2 = vmov 5   ;;  %v3488_v4 = vmov 2  }
  0x21   : > { %3307 = vset.pattern.permute.xlu0 %v3485_v0  ;;  %3309 = vset.pattern.permute.xlu1 %v3486_v1  ;;  %v469_v3 = vld [vmem:[%s4568_s1] sm:$0x3f]  ;;  %v3489_v5 = vmov 4   ;;  %v3490_v6 = vmov 6   ;;  %v3491_v7 = vmov 7   ;;  %v3492_v8 = vmov 8  }
  0x22   : > { %3311 = vset.pattern.permute.xlu2 %v3487_v2  ;;  %510 = vperm.xlu0 %3307, %v469_v3   ;;  %v3493_v9 = vmov 0   ;;  %p465_p13 = scmp.lt.s32.totalorder %s3605_s29, 1  ;;  %s3494_s24 = smov 127   ;;  %vm545_vm0 = vcmask 1039360   ;;  %vm605_vm1 = vcmask 1031168   ;;  %vm665_vm2 = vcmask 785408  }
  0x23   : > { %630 = vperm.xlu1 %3309, %v469_v3   ;;  %750 = vperm.xlu2 %3311, %v469_v3   ;;  %s3495_s30 = smov 126   ;;  %s3496_s15 = smov 96   ;;  %vm725_vm3 = vcmask 777216   ;;  %vm785_vm4 = vcmask 769024   ;;  %vm845_vm5 = vcmask 523264   ;;  %vm905_vm6 = vcmask 515072  }
  0x24   : > { %s466_s14 = scalar_select %p465_p13, %s3605_s29, 1  ;;  %vm965_vm7 = vcmask 506880   ;;  %vm996_vm8 = vcmask 504832   ;;  %vm1342_vm9 = vcmask 1044480   ;;  %vm1338_vm10 = vcmask 236544  }
  0x25   : > { %s3497_s16 = smov 95   ;;  %s3498_s21 = smov 94   ;;  %vm1672_vm11 = vcmask 791552   ;;  %vm1696_vm12 = vcmask 1045504   ;;  %vm1691_vm13 = vcmask 48128   ;;  %vm1944_vm14 = vcmask 916480  }
  0x26   : > { %s3115_s17 = sshll.u32 %s466_s14, 3  ;;  %s3499_s22 = smov 64   ;;  %vm1876_vm15 = vcmask 924672  }
  0x27   : > { %s468_s23 = scalar_lea.vmem %s4567_s0, %s3115_s17  ;;  %s3500_s3 = smov 63  }
  0x28   : > { %v3665_v10 = vld [vmem:[%s468_s23] sm:$0xff]  ;;  %s3501_s27 = smov 62   ;;  %s3502_s23 = smov 122  }
  0x29   : > { %v3668_v11 = vperm.slane %v3665_v10, 4  ;;  %v3671_v12 = vperm.slane %v3665_v10, 3  ;;  %v3682_v16 = vperm.slane %v3665_v10, 6  ;;  %v3685_v17 = vperm.slane %v3665_v10, 5  ;;  %s3506_s14 = smov 113   ;;  %s3507_s17 = smov 98  }
  0x2a   : > { %3308 = vset.pattern.permute.xlu0 %v3488_v4  ;;  %v3721_v30 = vperm.slane %v3665_v10, 2  ;;  %v3742_v37 = vperm.slane %v3665_v10, 1  ;;  %v3745_v38 = vperm.slane %v3665_v10, 0  ;;  %v3788_v53 = vperm.slane %v3665_v10, 7  ;;  %s3508_s19 = smov 104   ;;  %s3509_s20 = smov 110  }
  0x2b   : > { %3310 = vset.pattern.permute.xlu1 %v3489_v5  ;;  %570 = vperm.xlu0 %3308, %v469_v3  }
  0x2c   : > { %690 = vperm.xlu1 %3310, %v469_v3   ;;  %3312 = vset.pattern.permute.xlu2 %v3490_v6 }
  0x2d   : > { %810 = vperm.xlu2 %3312, %v469_v3  }
  0x33   : > { %3315 = vset.pattern.permute.xlu0 %v3493_v9 }
  0x34   : > { %3313 = vset.pattern.permute.xlu1 %v3491_v7  ;;  %473 = vperm.xlu0 %3315, %v469_v3  }
  0x35   : > { %870 = vperm.xlu1 %3313, %v469_v3   ;;  %3314 = vset.pattern.permute.xlu2 %v3492_v8 }
  0x36   : > { %930 = vperm.xlu2 %3314, %v469_v3  }
  0x3d   : > { %3346 = vset.pattern.permute.xlu1 %v3493_v9 }
  0x7d   : > { %v3756_v42 = vpop.permute.xlu2 %750 }
  0x7e   : > { %v757_v43 = vmul.f32 %v3756_v42, %v3668_v11  ;;  %v756_v44 = vmul.f32 %v3756_v42, %v3671_v12  ;;  %v758_v45 = vmul.f32 %v3756_v42, %v3685_v17  ;;  %v759_v46 = vmul.f32 %v3756_v42, %v3682_v16 }
  0x7f   : > { %v755_v10 = vmul.f32 %v3756_v42, %v3721_v30 }
  0x87   : > { %v3776_v49 = vpop.permute.xlu2 %810 }
  0x88   : > { %v816_v50 = vmul.f32 %v3776_v49, %v3671_v12  ;;  %v817_v51 = vmul.f32 %v3776_v49, %v3668_v11  ;;  %v818_v54 = vmul.f32 %v3776_v49, %v3685_v17  ;;  %v819_v55 = vmul.f32 %v3776_v49, %v3682_v16 }
  0x90   : > { %v3798_v57 = vpop.permute.xlu2 %930 }
  0x91   : > { %v936_v7 = vmul.f32 %v3798_v57, %v3671_v12 }
  0x94   : > { %v3673_v13 = vpop.permute.xlu0 %510 }
  0x95   : > { %v517_v14 = vmul.f32 %v3673_v13, %v3668_v11  ;;  %v516_v15 = vmul.f32 %v3673_v13, %v3671_v12  ;;  %v519_v19 = vmul.f32 %v3673_v13, %v3682_v16  ;;  %v518_v20 = vmul.f32 %v3673_v13, %v3685_v17  ;;  %v3706_v25 = vpop.permute.xlu1 %630 }
  0x96   : > { %v637_v26 = vmul.f32 %v3706_v25, %v3668_v11  ;;  %v636_v27 = vmul.f32 %v3706_v25, %v3671_v12  ;;  %v638_v28 = vmul.f32 %v3706_v25, %v3685_v17  ;;  %v515_v32 = vmul.f32 %v3673_v13, %v3721_v30 }
  0x97   : > { %537 = vrot.lane.b32.xlu2 %v517_v14, %s3494_s24  ;;  %535 = vrot.lane.b32.xlu1 %v516_v15, %s3494_s24  ;;  %v639_v33 = vmul.f32 %v3706_v25, %v3682_v16  ;;  %v514_v39 = vmul.f32 %v3673_v13, %v3742_v37  ;;  %v513_v40 = vmul.f32 %v3673_v13, %v3745_v38 }
  0x98   : > { %v635_v52 = vmul.f32 %v3706_v25, %v3721_v30  ;;  %v520_v56 = vmul.f32 %v3673_v13, %v3788_v53  ;;  %v633_v58 = vmul.f32 %v3706_v25, %v3745_v38  ;;  %v634_v59 = vmul.f32 %v3706_v25, %v3742_v37 }
  0x9d   : > { %v3687_v18 = vpop.permute.xlu0 %570 }
  0x9e   : > { %v576_v21 = vmul.f32 %v3687_v18, %v3671_v12  ;;  %v578_v22 = vmul.f32 %v3687_v18, %v3685_v17  ;;  %v577_v23 = vmul.f32 %v3687_v18, %v3668_v11  ;;  %v579_v24 = vmul.f32 %v3687_v18, %v3682_v16  ;;  %v3718_v29 = vpop.permute.xlu1 %690 }
  0x9f   : > { %541 = vrot.lane.b32.xlu2 %v519_v19, %s3494_s24  ;;  %539 = vrot.lane.b32.xlu1 %v518_v20, %s3494_s24  ;;  %v696_v31 = vmul.f32 %v3718_v29, %v3671_v12  ;;  %v698_v34 = vmul.f32 %v3718_v29, %v3685_v17  ;;  %v697_v35 = vmul.f32 %v3718_v29, %v3668_v11 }
  0xa0   : > { %595 = vrot.lane.b32.xlu0 %v576_v21, %s3495_s30  ;;  %v699_v36 = vmul.f32 %v3718_v29, %v3682_v16  ;;  %v575_v41 = vmul.f32 %v3687_v18, %v3721_v30  ;;  %v573_v47 = vmul.f32 %v3687_v18, %v3745_v38  ;;  %v574_v48 = vmul.f32 %v3687_v18, %v3742_v37 }
  0xa1   : > { %v695_v60 = vmul.f32 %v3718_v29, %v3721_v30  ;;  %v580_v4 = vmul.f32 %v3687_v18, %v3788_v53  ;;  %v693_v5 = vmul.f32 %v3718_v29, %v3745_v38  ;;  %v694_v9 = vmul.f32 %v3718_v29, %v3742_v37 }
  0xa2   : > { %v937_v20 = vmul.f32 %v3798_v57, %v3668_v11  ;;  %v938_v21 = vmul.f32 %v3798_v57, %v3685_v17 }
  0xa6   : > { %v3834_v8 = vpop.permute.xlu0 %473 }
  0xa7   : > { %599 = vrot.lane.b32.xlu2 %v578_v22, %s3495_s30  ;;  %597 = vrot.lane.b32.xlu1 %v577_v23, %s3495_s30  ;;  %v3810_v61 = vpop.permute.xlu1 %870  ;;  %v496_v13 = vmul.f32 %v3671_v12, %v3834_v8  ;;  %v939_v22 = vmul.f32 %v3798_v57, %v3682_v16  ;;  %v497_v23 = vmul.f32 %v3668_v11, %v3834_v8 }
  0xa8   : > { %601 = vrot.lane.b32.xlu0 %v579_v24, %s3495_s30  ;;  %v876_v63 = vmul.f32 %v3810_v61, %v3671_v12  ;;  %v877_v0 = vmul.f32 %v3810_v61, %v3668_v11  ;;  %v878_v1 = vmul.f32 %v3810_v61, %v3685_v17  ;;  %v879_v3 = vmul.f32 %v3810_v61, %v3682_v16 }
  0xa9   : > { %v498_v24 = vmul.f32 %v3685_v17, %v3834_v8  ;;  %v640_v11 = vmul.f32 %v3706_v25, %v3788_v53  ;;  %v753_v17 = vmul.f32 %v3756_v42, %v3745_v38 }
  0xaf   : > { %657 = vrot.lane.b32.xlu2 %v637_v26, %s3496_s15  ;;  %655 = vrot.lane.b32.xlu1 %v636_v27, %s3496_s15  ;;  %v495_v27 = vmul.f32 %v3721_v30, %v3834_v8 }
  0xb0   : > { %659 = vrot.lane.b32.xlu0 %v638_v28, %s3496_s15 }
  0xb7   : > { %533 = vrot.lane.b32.xlu2 %v515_v32, %s3494_s24  ;;  %661 = vrot.lane.b32.xlu1 %v639_v33, %s3496_s15 }
  0xb8   : > { %715 = vrot.lane.b32.xlu0 %v696_v31, %s3497_s16 }
  0xbf   : > { %719 = vrot.lane.b32.xlu2 %v698_v34, %s3497_s16  ;;  %717 = vrot.lane.b32.xlu1 %v697_v35, %s3497_s16 }
  0xc0   : > { %721 = vrot.lane.b32.xlu0 %v699_v36, %s3497_s16 }
  0xc7   : > { %531 = vrot.lane.b32.xlu2 %v514_v39, %s3494_s24  ;;  %529 = vrot.lane.b32.xlu1 %v513_v40, %s3494_s24  ;;  %v754_v39 = vmul.f32 %v3756_v42, %v3742_v37 }
  0xc8   : > { %593 = vrot.lane.b32.xlu0 %v575_v41, %s3495_s30 }
  0xcf   : > { %777 = vrot.lane.b32.xlu2 %v757_v43, %s3498_s21  ;;  %775 = vrot.lane.b32.xlu1 %v756_v44, %s3498_s21 }
  0xd0   : > { %779 = vrot.lane.b32.xlu0 %v758_v45, %s3498_s21 }
  0xd7   : > { %781 = vrot.lane.b32.xlu1 %v759_v46, %s3498_s21  ;;  %589 = vrot.lane.b32.xlu2 %v573_v47, %s3495_s30 }
  0xd8   : > { %591 = vrot.lane.b32.xlu0 %v574_v48, %s3495_s30 }
  0xdf   : > { %653 = vrot.lane.b32.xlu1 %v635_v52, %s3496_s15  ;;  %835 = vrot.lane.b32.xlu2 %v816_v50, %s3499_s22  ;;  %v815_v50 = vmul.f32 %v3776_v49, %v3721_v30  ;;  %v813_v52 = vmul.f32 %v3776_v49, %v3745_v38 }
  0xe0   : > { %837 = vrot.lane.b32.xlu0 %v817_v51, %s3499_s22  ;;  %v700_v51 = vmul.f32 %v3718_v29, %v3788_v53 }
  0xe7   : > { %839 = vrot.lane.b32.xlu1 %v818_v54, %s3499_s22  ;;  %841 = vrot.lane.b32.xlu2 %v819_v55, %s3499_s22  ;;  %v494_v55 = vmul.f32 %v3742_v37, %v3834_v8 }
  0xe8   : > { %543 = vrot.lane.b32.xlu0 %v520_v56, %s3494_s24 }
  0xef   : > { %649 = vrot.lane.b32.xlu1 %v633_v58, %s3496_s15  ;;  %651 = vrot.lane.b32.xlu2 %v634_v59, %s3496_s15 }
  0xf0   : > { %713 = vrot.lane.b32.xlu0 %v695_v60, %s3497_s16 }
  0xf1   : > { %v538_v62 = vpop.permute.xlu2 %537 }
  0xf7   : > { %895 = vrot.lane.b32.xlu1 %v876_v63, %s3500_s3  ;;  %897 = vrot.lane.b32.xlu2 %v877_v0, %s3500_s3 }
  0xf8   : > { %899 = vrot.lane.b32.xlu0 %v878_v1, %s3500_s3  ;;  %v814_v1 = vmul.f32 %v3776_v49, %v3742_v37 }
  0xf9   : > { %v3821_v2 = vpop.permute.xlu2 %541 }
  0xff   : > { %901 = vrot.lane.b32.xlu1 %v879_v3, %s3500_s3  ;;  %603 = vrot.lane.b32.xlu2 %v580_v4, %s3495_s30  ;;  %v875_v3 = vmul.f32 %v3810_v61, %v3721_v30  ;;  %v760_v4 = vmul.f32 %v3756_v42, %v3788_v53  ;;  %v874_v42 = vmul.f32 %v3810_v61, %v3742_v37 }
 0x100   : > { %709 = vrot.lane.b32.xlu0 %v693_v5, %s3497_s16 }
 0x101   : > { %v600_v6 = vpop.permute.xlu2 %599 }
 0x107   : > { %711 = vrot.lane.b32.xlu1 %v694_v9, %s3497_s16  ;;  %773 = vrot.lane.b32.xlu2 %v755_v10, %s3498_s21 }
 0x108   : > { %955 = vrot.lane.b32.xlu0 %v936_v7, %s3501_s27 }
 0x109   : > { %v536_v14 = vpop.permute.xlu1 %535  ;;  %v658_v15 = vpop.permute.xlu2 %657 }
 0x10a   : > { %v549_v18 = vsel %vm545_vm0, %v536_v14, %v538_v62 }
 0x10b   : > { %v564_v19 = vadd.f32 %v549_v18, %v496_v13  ;;  %v873_v13 = vmul.f32 %v3810_v61, %v3745_v38 }
 0x10f   : > { %957 = vrot.lane.b32.xlu1 %v937_v20, %s3501_s27  ;;  %959 = vrot.lane.b32.xlu2 %v938_v21, %s3501_s27 }
 0x110   : > { %961 = vrot.lane.b32.xlu0 %v939_v22, %s3501_s27 }
 0x111   : > { %v540_v12 = vpop.permute.xlu1 %539  ;;  %v534_v26 = vpop.permute.xlu2 %533 }
 0x112   : > { %v550_v28 = vsel %vm545_vm0, %v538_v62, %v540_v12  ;;  %v551_v31 = vsel %vm545_vm0, %v540_v12, %v3821_v2  ;;  %v548_v32 = vsel %vm545_vm0, %v534_v26, %v536_v14  ;;  %v3865_v33 = vpop.permute.xlu0 %595  ;;  %v935_v14 = vmul.f32 %v3798_v57, %v3721_v30 }
 0x113   : > { %v565_v34 = vadd.f32 %v550_v28, %v497_v23  ;;  %v566_v35 = vadd.f32 %v551_v31, %v498_v24  ;;  %v3867_v36 = vadd.f32 %v548_v32, %v495_v27  ;;  %v820_v24 = vmul.f32 %v3776_v49, %v3788_v53 }
 0x114   : > { %v934_v27 = vmul.f32 %v3798_v57, %v3742_v37  ;;  %v493_v31 = vmul.f32 %v3745_v38, %v3834_v8 }
 0x117   : > { %663 = vrot.lane.b32.xlu1 %v640_v11, %s3496_s15  ;;  %769 = vrot.lane.b32.xlu2 %v753_v17, %s3498_s21  ;;  %v880_v17 = vmul.f32 %v3810_v61, %v3788_v53 }
 0x118   : > { %771 = vrot.lane.b32.xlu0 %v754_v39, %s3498_s21  ;;  %v940_v39 = vmul.f32 %v3798_v57, %v3788_v53 }
 0x119   : > { %v720_v40 = vpop.permute.xlu2 %719  ;;  %v598_v41 = vpop.permute.xlu1 %597 }
 0x11a   : > { %v609_v43 = vsel %vm605_vm1, %v3865_v33, %v598_v41  ;;  %v610_v25 = vsel %vm605_vm1, %v598_v41, %v600_v6  ;;  %v3881_v44 = vpop.permute.xlu0 %601 }
 0x11b   : > { %v624_v45 = vadd.f32 %v609_v43, %v564_v19  ;;  %v625_v46 = vadd.f32 %v610_v25, %v565_v34  ;;  %v611_v47 = vsel %vm605_vm1, %v600_v6, %v3881_v44 }
 0x11c   : > { %v626_v48 = vadd.f32 %v611_v47, %v566_v35 }
 0x11f   : > { %833 = vrot.lane.b32.xlu1 %v815_v50, %s3499_s22  ;;  %723 = vrot.lane.b32.xlu2 %v700_v51, %s3497_s16  ;;  %s3503_s16 = smov 112  }
 0x120   : > { %829 = vrot.lane.b32.xlu0 %v813_v52, %s3499_s22 }
 0x121   : > { %v532_v54 = vpop.permute.xlu2 %531  ;;  %v3896_v56 = vpop.permute.xlu1 %655 }
 0x122   : > { %v547_v58 = vsel %vm545_vm0, %v532_v54, %v534_v26  ;;  %v669_v29 = vsel %vm665_vm2, %v3896_v56, %v658_v15  ;;  %v660_v59 = vpop.permute.xlu0 %659  ;;  %v933_v26 = vmul.f32 %v3798_v57, %v3745_v38 }
 0x123   : > { %v562_v60 = vadd.f32 %v547_v58, %v494_v55  ;;  %v684_v62 = vadd.f32 %v669_v29, %v624_v45  ;;  %v670_v63 = vsel %vm665_vm2, %v658_v15, %v660_v59  ;;  %v500_v29 = vmul.f32 %v3788_v53, %v3834_v8 }
 0x124   : > { %v685_v0 = vadd.f32 %v670_v63, %v625_v46 }
 0x127   : > { %831 = vrot.lane.b32.xlu1 %v814_v1, %s3499_s22  ;;  %893 = vrot.lane.b32.xlu2 %v875_v3, %s3500_s3 }
 0x128   : > { %783 = vrot.lane.b32.xlu0 %v760_v4, %s3498_s21  ;;  %s3513_s21 = smov 80  }
 0x129   : > { %v3911_v5 = vpop.permute.xlu2 %777  ;;  %v3913_v6 = vpop.permute.xlu1 %661 }
 0x12a   : > { %v671_v7 = vsel %vm665_vm2, %v660_v59, %v3913_v6  ;;  %v3917_v9 = vpop.permute.xlu0 %715  ;;  %v499_v59 = vmul.f32 %v3682_v16, %v3834_v8 }
 0x12b   : > { %v686_v10 = vadd.f32 %v671_v7, %v626_v48 }
 0x12f   : > { %889 = vrot.lane.b32.xlu1 %v873_v13, %s3500_s3  ;;  %891 = vrot.lane.b32.xlu2 %v874_v42, %s3500_s3 }
 0x130   : > { %953 = vrot.lane.b32.xlu0 %v935_v14, %s3501_s27 }
 0x131   : > { %v718_v15 = vpop.permute.xlu1 %717  ;;  %v590_v18 = vpop.permute.xlu2 %589 }
 0x132   : > { %v729_v19 = vsel %vm725_vm3, %v3917_v9, %v718_v15  ;;  %v730_v20 = vsel %vm725_vm3, %v718_v15, %v720_v40  ;;  %v3931_v21 = vpop.permute.xlu0 %721 }
 0x133   : > { %v3933_v22 = vadd.f32 %v729_v19, %v684_v62  ;;  %v3935_v12 = vadd.f32 %v730_v20, %v685_v0  ;;  %v731_v30 = vsel %vm725_vm3, %v720_v40, %v3931_v21 }
 0x134   : > { %v3939_v23 = vadd.f32 %v731_v30, %v686_v10 }
 0x137   : > { %843 = vrot.lane.b32.xlu1 %v820_v24, %s3499_s22  ;;  %949 = vrot.lane.b32.xlu2 %v933_v26, %s3501_s27  ;;  %s463_s22 = sand.u32 1, %s3469_s26  }
 0x138   : > { %951 = vrot.lane.b32.xlu0 %v934_v27, %s3501_s27 }
 0x139   : > { %v530_v28 = vpop.permute.xlu1 %529  ;;  %v3952_v32 = vpop.permute.xlu2 %835 }
 0x13a   : > { %v546_v49 = vsel %vm545_vm0, %v530_v28, %v532_v54  ;;  %v594_v34 = vpop.permute.xlu0 %593 }
 0x13b   : > { %v561_v35 = vadd.f32 %v546_v49, %v493_v31  ;;  %v608_v11 = vsel %vm605_vm1, %v594_v34, %v3865_v33 }
 0x13c   : > { %v623_v37 = vadd.f32 %v608_v11, %v3867_v36 }
 0x13f   : > { %903 = vrot.lane.b32.xlu1 %v880_v17, %s3500_s3  ;;  %963 = vrot.lane.b32.xlu2 %v940_v39, %s3501_s27  ;;  %s3504_s3 = smov 116   ;;  %s3505_s27 = smov 111  }
 0x141   : > { %v776_v38 = vpop.permute.xlu1 %775  ;;  %v3964_v40 = vpop.permute.xlu2 %841 }
 0x142   : > { %v780_v41 = vpop.permute.xlu0 %779 }
 0x149   : > { %v3966_v43 = vpop.permute.xlu1 %781  ;;  %v3968_v25 = vpop.permute.xlu2 %651 }
 0x14a   : > { %v592_v33 = vpop.permute.xlu0 %591  ;;  %v791_v30 = vsel %vm785_vm4, %v780_v41, %v3966_v43 }
 0x14b   : > { %v606_v36 = vsel %vm605_vm1, %v590_v18, %v592_v33  ;;  %v607_v61 = vsel %vm605_vm1, %v592_v33, %v594_v34  ;;  %v789_v18 = vsel %vm785_vm4, %v776_v38, %v3911_v5  ;;  %v806_v49 = vadd.f32 %v791_v30, %v3939_v23 }
 0x14c   : > { %v3972_v45 = vadd.f32 %v606_v36, %v561_v35  ;;  %v622_v57 = vadd.f32 %v607_v61, %v562_v60  ;;  %v804_v28 = vadd.f32 %v789_v18, %v3933_v22 }
 0x151   : > { %v654_v46 = vpop.permute.xlu1 %653  ;;  %v898_v47 = vpop.permute.xlu2 %897 }
 0x152   : > { %v667_v48 = vsel %vm665_vm2, %v3968_v25, %v654_v46  ;;  %v668_v50 = vsel %vm665_vm2, %v654_v46, %v3896_v56  ;;  %v838_v51 = vpop.permute.xlu0 %837 }
 0x153   : > { %v682_v52 = vadd.f32 %v667_v48, %v622_v57  ;;  %v683_v54 = vadd.f32 %v668_v50, %v623_v37  ;;  %v849_v26 = vsel %vm845_vm5, %v3952_v32, %v838_v51 }
 0x154   : > { %v864_v11 = vadd.f32 %v849_v26, %v804_v28 }
 0x159   : > { %v840_v55 = vpop.permute.xlu1 %839  ;;  %v3978_v58 = vpop.permute.xlu2 %603 }
 0x15a   : > { %v544_v60 = vpop.permute.xlu0 %543  ;;  %v612_v56 = vsel %vm605_vm1, %v3881_v44, %v3978_v58  ;;  %v850_v27 = vsel %vm845_vm5, %v838_v51, %v840_v55 }
 0x15b   : > { %v552_v62 = vsel %vm545_vm0, %v3821_v2, %v544_v60  ;;  %v3986_v63 = vadd.f32 %v544_v60, %v500_v29 }
 0x15c   : > { %v567_v0 = vadd.f32 %v552_v62, %v499_v59 }
 0x15e   : > { %v3991_v1 = vadd.f32 %v612_v56, %v567_v0 }
 0x161   : > { %v3993_v3 = vpop.permute.xlu1 %649  ;;  %v3995_v4 = vpop.permute.xlu2 %773 }
 0x162   : > { %v714_v53 = vpop.permute.xlu0 %713  ;;  %v788_v2 = vsel %vm785_vm4, %v3995_v4, %v776_v38 }
 0x163   : > { %v728_v16 = vsel %vm725_vm3, %v714_v53, %v3917_v9  ;;  %v790_v9 = vsel %vm785_vm4, %v3911_v5, %v780_v41  ;;  %v851_v5 = vsel %vm845_vm5, %v840_v55, %v3964_v40 }
 0x164   : > { %v743_v8 = vadd.f32 %v728_v16, %v683_v54  ;;  %v805_v31 = vadd.f32 %v790_v9, %v3935_v12  ;;  %v866_v38 = vadd.f32 %v851_v5, %v806_v49 }
 0x166   : > { %v803_v7 = vadd.f32 %v788_v2, %v743_v8  ;;  %v865_v37 = vadd.f32 %v850_v27, %v805_v31  ;;  %v666_v2 = vsel %vm665_vm2, %v3993_v3, %v3968_v25 }
 0x169   : > { %v896_v10 = vpop.permute.xlu1 %895  ;;  %v960_v14 = vpop.permute.xlu2 %959 }
 0x16a   : > { %v900_v13 = vpop.permute.xlu0 %899  ;;  %v909_v34 = vsel %vm905_vm6, %v896_v10, %v898_v47 }
 0x16b   : > { %v910_v35 = vsel %vm905_vm6, %v898_v47, %v900_v13  ;;  %v924_v22 = vadd.f32 %v909_v34, %v864_v11 }
 0x16c   : > { %v925_v41 = vadd.f32 %v910_v35, %v865_v37 }
 0x171   : > { %v4001_v42 = vpop.permute.xlu1 %901  ;;  %v770_v39 = vpop.permute.xlu2 %769 }
 0x172   : > { %v710_v44 = vpop.permute.xlu0 %709  ;;  %v911_v17 = vsel %vm905_vm6, %v900_v13, %v4001_v42 }
 0x173   : > { %v926_v33 = vadd.f32 %v911_v17, %v866_v38 }
 0x179   : > { %v712_v15 = vpop.permute.xlu1 %711  ;;  %v724_v50 = vpop.permute.xlu2 %723 }
 0x17a   : > { %v727_v19 = vsel %vm725_vm3, %v712_v15, %v714_v53  ;;  %v956_v20 = vpop.permute.xlu0 %955  ;;  %v726_v13 = vsel %vm725_vm3, %v710_v44, %v712_v15 }
 0x17b   : > { %v742_v24 = vadd.f32 %v727_v19, %v682_v52  ;;  %v681_v19 = vadd.f32 %v666_v2, %v3972_v45  ;;  %v1128_v2 = vld [vmem:[#allocation5 + $0xe0] sm:$0xff] }
 0x17d   : > { %v741_v28 = vadd.f32 %v726_v13, %v681_v19  ;;  %v1160_v13 = vld [vmem:[#allocation5 + $0x1e0] sm:$0xff] }
 0x181   : > { %v958_v12 = vpop.permute.xlu1 %957  ;;  %v894_v62 = vpop.permute.xlu2 %893 }
 0x182   : > { %v969_v36 = vsel %vm965_vm7, %v956_v20, %v958_v12  ;;  %v970_v23 = vsel %vm965_vm7, %v958_v12, %v960_v14  ;;  %v4024_v61 = vpop.permute.xlu0 %961 }
 0x183   : > { %v984_v57 = vadd.f32 %v969_v36, %v924_v22  ;;  %v985_v46 = vadd.f32 %v970_v23, %v925_v41  ;;  %v971_v47 = vsel %vm965_vm7, %v960_v14, %v4024_v61  ;;  %v908_v14 = vsel %vm905_vm6, %v894_v62, %v896_v10 }
 0x184   : > { %v986_v48 = vadd.f32 %v971_v47, %v926_v33  ;;  %v628_v10 = vadd.f32 %v3978_v58, %v3986_v63  ;;  %v732_v58 = vsel %vm725_vm3, %v3931_v21, %v724_v50  ;;  %vm2012_vm3 = vcmask 908288  }
 0x185   : > { %992 = vst [vmem:[#allocation2 + $0x18] sm:$0x3f] %v984_v57 }
 0x186   : > { %993 = vst [vmem:[#allocation2 + $0x20] sm:$0x3f] %v985_v46 }
 0x187   : > { %994 = vst [vmem:[#allocation2 + $0x28] sm:$0x3f] %v986_v48 }
 0x189   : > { %v664_v51 = vpop.permute.xlu1 %663  ;;  %v892_v16 = vpop.permute.xlu2 %891 }
 0x18a   : > { %v772_v52 = vpop.permute.xlu0 %771  ;;  %v688_v49 = vadd.f32 %v664_v51, %v628_v10 }
 0x18b   : > { %v787_v18 = vsel %vm785_vm4, %v772_v52, %v3995_v4  ;;  %v672_v4 = vsel %vm665_vm2, %v3913_v6, %v664_v51 }
 0x18c   : > { %v4028_v54 = vld [vmem:[#allocation2 + $0x18] sm:$0x3f]  ;;  %v802_v25 = vadd.f32 %v787_v18, %v742_v24  ;;  %v907_v24 = vsel %vm905_vm6, %v892_v16, %v894_v62  ;;  %v1224_v18 = vld [vmem:[#allocation5 + $0x3e0] sm:$0xff] }
 0x18d   : > { %v4030_v55 = vld [vmem:[#allocation2 + $0x20] sm:$0x3f] }
 0x18e   : > { %v3316_v29 = vpack.i.bf16 %v4030_v55, %v4028_v54  ;;  %v4064_v33 = vld [vmem:[#allocation2 + $0x28] sm:$0x3f] }
 0x190   : > { %3317 = vrot.lane.b32.xlu0 %v3316_v29, %s3494_s24 }
 0x191   : > { %v834_v59 = vpop.permute.xlu1 %833  ;;  %v950_v31 = vpop.permute.xlu2 %949 }
 0x192   : > { %v830_v60 = vpop.permute.xlu0 %829  ;;  %v848_v53 = vsel %vm845_vm5, %v834_v59, %v3952_v32  ;;  %v786_v32 = vsel %vm785_vm4, %v770_v39, %v772_v52  ;;  %v748_v39 = vadd.f32 %v724_v50, %v688_v49  ;;  %v1218_v49 = vld [vmem:[#allocation5 + $0x3b0] sm:$0xff] }
 0x193   : > { %v863_v8 = vadd.f32 %v848_v53, %v803_v7  ;;  %v801_v45 = vadd.f32 %v786_v32, %v741_v28  ;;  %v1162_v53 = vld [vmem:[#allocation5 + $0x1f0] sm:$0xff]  ;;  %v1156_v28 = vld [vmem:[#allocation5 + $0x1c0] sm:$0xff] }
 0x194   : > { %1369 = vmatpush.msra.mxu1 %v1162_v53  ;;  %v1190_v32 = vld [vmem:[#allocation5 + $0x2d0] sm:$0xff] }
 0x195   : > { %v923_v30 = vadd.f32 %v908_v14, %v863_v8  ;;  %v1226_v8 = vld [vmem:[#allocation5 + $0x3f0] sm:$0xff]  ;;  %v1192_v14 = vld [vmem:[#allocation5 + $0x2e0] sm:$0xff] }
 0x196   : > { %1409 = vmatpush.msra.mxu3 %v1226_v8  ;;  %1370 = vmatpush.msra.mxu1 %v1160_v13  ;;  %v1142_v53 = vld [vmem:[#allocation5 + $0x150] sm:$0xff]  ;;  %v1140_v13 = vld [vmem:[#allocation5 + $0x140] sm:$0xff] }
 0x197   : > { %v1206_v8 = vld [vmem:[#allocation5 + $0x350] sm:$0xff] }
 0x198   : > { %1410 = vmatpush.msra.mxu3 %v1224_v18  ;;  %v1204_v18 = vld [vmem:[#allocation5 + $0x340] sm:$0xff] }
 0x199   : > { %v832_v0 = vpop.permute.xlu1 %831 }
 0x19a   : > { %v784_v56 = vpop.permute.xlu0 %783  ;;  %v847_v7 = vsel %vm845_vm5, %v832_v0, %v834_v59  ;;  %v846_v44 = vsel %vm845_vm5, %v830_v60, %v832_v0 }
 0x19b   : > { %v862_v15 = vadd.f32 %v847_v7, %v802_v25  ;;  %v861_v34 = vadd.f32 %v846_v44, %v801_v45  ;;  %v792_v38 = vsel %vm785_vm4, %v3966_v43, %v784_v56  ;;  %v808_v36 = vadd.f32 %v784_v56, %v748_v39  ;;  %v964_v43 = vpop.permute.xlu2 %963  ;;  %v1222_v7 = vld [vmem:[#allocation5 + $0x3d0] sm:$0xff]  ;;  %v1188_v25 = vld [vmem:[#allocation5 + $0x2c0] sm:$0xff] }
 0x19c   : > { %1411 = vmatpush.msra.mxu3 %v1222_v7  ;;  %v1214_v39 = vld [vmem:[#allocation5 + $0x390] sm:$0xff]  ;;  %vm2148_vm4 = vcmask 793600  }
 0x19d   : > { %v922_v37 = vadd.f32 %v907_v24, %v862_v15  ;;  %v1122_v15 = vld [vmem:[#allocation5 + $0xb0] sm:$0xff]  ;;  %v1184_v24 = vld [vmem:[#allocation5 + $0x2a0] sm:$0xff] }
 0x1a1   : > { %v890_v9 = vpop.permute.xlu1 %889 }
 0x1a2   : > { %v954_v26 = vpop.permute.xlu0 %953  ;;  %v906_v5 = vsel %vm905_vm6, %v890_v9, %v892_v16  ;;  %v1194_v16 = vld [vmem:[#allocation5 + $0x2f0] sm:$0xff] }
 0x1a3   : > { %v968_v27 = vsel %vm965_vm7, %v954_v26, %v956_v20  ;;  %v687_v20 = vadd.f32 %v672_v4, %v3991_v1  ;;  %v921_v11 = vadd.f32 %v906_v5, %v861_v34  ;;  %1389 = vmatpush.msra.mxu2 %v1194_v16  ;;  %v1126_v9 = vld [vmem:[#allocation5 + $0xd0] sm:$0xff]  ;;  %v1120_v34 = vld [vmem:[#allocation5 + $0xa0] sm:$0xff] }
 0x1a4   : > { %v983_v3 = vadd.f32 %v968_v27, %v923_v30  ;;  %v1124_v27 = vld [vmem:[#allocation5 + $0xc0] sm:$0xff]  ;;  %v1186_v5 = vld [vmem:[#allocation5 + $0x2b0] sm:$0xff] }
 0x1a5   : > { %v747_v1 = vadd.f32 %v732_v58, %v687_v20  ;;  %1390 = vmatpush.msra.mxu2 %v1192_v14  ;;  %v1152_v20 = vld [vmem:[#allocation5 + $0x1a0] sm:$0xff]  ;;  %v1150_v58 = vld [vmem:[#allocation5 + $0x190] sm:$0xff] }
 0x1a6   : > { %991 = vst [vmem:[#allocation2 + $0x10] sm:$0x3f] %v983_v3  ;;  %v1220_v3 = vld [vmem:[#allocation5 + $0x3c0] sm:$0xff]  ;;  %v1174_v16 = vld [vmem:[#allocation5 + $0x250] sm:$0xff] }
 0x1a7   : > { %v807_v57 = vadd.f32 %v792_v38, %v747_v1  ;;  %1391 = vmatpush.msra.mxu2 %v1190_v32  ;;  %1412 = vmatpush.msra.mxu3 %v1220_v3  ;;  %v1148_v1 = vld [vmem:[#allocation5 + $0x180] sm:$0xff]  ;;  %v1202_v32 = vld [vmem:[#allocation5 + $0x330] sm:$0xff] }
 0x1a8   : > { %v1172_v14 = vld [vmem:[#allocation5 + $0x240] sm:$0xff] }
 0x1a9   : > { %v844_v35 = vpop.permute.xlu1 %843  ;;  %1392 = vmatpush.msra.mxu2 %v1188_v25  ;;  %1413 = vmatpush.msra.mxu3 %v1218_v49  ;;  %v1136_v25 = vld [vmem:[#allocation5 + $0x120] sm:$0xff] }
 0x1aa   : > { %v952_v17 = vpop.permute.xlu0 %951  ;;  %v852_v23 = vsel %vm845_vm5, %v3964_v40, %v844_v35  ;;  %v868_v46 = vadd.f32 %v844_v35, %v808_v36  ;;  %v972_v40 = vsel %vm965_vm7, %v4024_v61, %v964_v43  ;;  %v1130_v61 = vld [vmem:[#allocation5 + $0xf0] sm:$0xff]  ;;  %v1216_v35 = vld [vmem:[#allocation5 + $0x3a0] sm:$0xff]  ;;  %vm2368_vm5 = vcmask 1040384  }
 0x1ab   : > { %v966_v6 = vsel %vm965_vm7, %v950_v31, %v952_v17  ;;  %v967_v63 = vsel %vm965_vm7, %v952_v17, %v954_v26  ;;  %v867_v47 = vadd.f32 %v852_v23, %v807_v57  ;;  %1349 = vmatpush.msra.mxu0 %v1130_v61  ;;  %v1158_v26 = vld [vmem:[#allocation5 + $0x1d0] sm:$0xff]  ;;  %1393 = vmatpush.msra.mxu2 %v1186_v5  ;;  %v1212_v57 = vld [vmem:[#allocation5 + $0x380] sm:$0xff]  ;;  %vm2432_vm7 = vcmask 293888  }
 0x1ac   : > { %v981_v22 = vadd.f32 %v966_v6, %v921_v11  ;;  %v982_v41 = vadd.f32 %v967_v63, %v922_v37  ;;  %1371 = vmatpush.msra.mxu1 %v1158_v26  ;;  %v1154_v31 = vld [vmem:[#allocation5 + $0x1b0] sm:$0xff]  ;;  %1414 = vmatpush.msra.mxu3 %v1216_v35 }
 0x1ad   : > { %v4062_v12 = vld [vmem:[#allocation2 + $0x10] sm:$0x3f]  ;;  %1350 = vmatpush.msra.mxu0 %v1128_v2  ;;  %v1118_v17 = vld [vmem:[#allocation5 + $0x90] sm:$0xff]  ;;  %1394 = vmatpush.msra.mxu2 %v1184_v24 }
 0x1ae   : > { %989 = vst [vmem:[#allocation2] sm:$0x3f] %v981_v22  ;;  %v3321_v21 = vpack.i.bf16 %v4062_v12, %v4064_v33  ;;  %1372 = vmatpush.msra.mxu1 %v1156_v28  ;;  %v1182_v63 = vld [vmem:[#allocation5 + $0x290] sm:$0xff]  ;;  %1415 = vmatpush.msra.mxu3 %v1214_v39  ;;  %v1108_v2 = vld [vmem:[#allocation5 + $0x40] sm:$0xff] }
 0x1af   : > { %990 = vst [vmem:[#allocation2 + $0x8] sm:$0x3f] %v982_v41  ;;  %1351 = vmatpush.msra.mxu0 %v1126_v9  ;;  %v1116_v41 = vld [vmem:[#allocation5 + $0x80] sm:$0xff]  ;;  %1395 = vmatpush.msra.mxu2 %v1182_v63  ;;  %v1110_v61 = vld [vmem:[#allocation5 + $0x50] sm:$0xff] }
 0x1b0   : > { %3322 = vrot.lane.b32.xlu1 %v3321_v21, %s3494_s24  ;;  %1373 = vmatpush.msra.mxu1 %v1154_v31  ;;  %v1180_v21 = vld [vmem:[#allocation5 + $0x280] sm:$0xff]  ;;  %v1106_v9 = vld [vmem:[#allocation5 + $0x30] sm:$0xff] }
 0x1b1   : > { %v904_v48 = vpop.permute.xlu1 %903  ;;  %1352 = vmatpush.msra.mxu0 %v1124_v27  ;;  %1396 = vmatpush.msra.mxu2 %v1180_v21  ;;  %v1104_v28 = vld [vmem:[#allocation5 + $0x20] sm:$0xff]  ;;  %v1134_v31 = vld [vmem:[#allocation5 + $0x110] sm:$0xff] }
 0x1b2   : > { %v912_v50 = vsel %vm905_vm6, %v4001_v42, %v904_v48  ;;  %v928_v51 = vadd.f32 %v904_v48, %v868_v46  ;;  %1374 = vmatpush.msra.mxu1 %v1152_v20  ;;  %v1114_v48 = vld [vmem:[#allocation5 + $0x70] sm:$0xff]  ;;  %1416 = vmatpush.msra.mxu3 %v1212_v57  ;;  %v1164_v20 = vld [vmem:[#allocation5 + $0x200] sm:$0xff]  ;;  %vm2435_vm6 = vcmask 1043456  }
 0x1b3   : > { %v927_v52 = vadd.f32 %v912_v50, %v867_v47  ;;  %1353 = vmatpush.msra.mxu0 %v1122_v15  ;;  %v1102_v15 = vld [vmem:[#allocation5 + $0x10] sm:$0xff]  ;;  %v1196_v24 = vld [vmem:[#allocation5 + $0x300] sm:$0xff] }
 0x1b4   : > { %v988_v29 = vadd.f32 %v964_v43, %v928_v51  ;;  %1375 = vmatpush.msra.mxu1 %v1150_v58  ;;  %v1166_v5 = vld [vmem:[#allocation5 + $0x210] sm:$0xff]  ;;  %v1256_v58 = vld [vmem:[#allocation5 + $0x4e0] sm:$0xff] }
 0x1b5   : > { %v987_v59 = vadd.f32 %v972_v40, %v927_v52  ;;  %v4075_v60 = vld [vmem:[#allocation2] sm:$0x3f]  ;;  %1354 = vmatpush.msra.mxu0 %v1120_v34  ;;  %v1320_v63 = vld [vmem:[#allocation5 + $0x6e0] sm:$0xff] }
 0x1b6   : > { %997 = vst.msk [vmem:[#allocation2 + $0x38] sm:$0x3f] %vm996_vm8, %v988_v29  ;;  %v4077_v62 = vld [vmem:[#allocation2 + $0x8] sm:$0x3f]  ;;  %1376 = vmatpush.msra.mxu1 %v1148_v1  ;;  %v1146_v52 = vld [vmem:[#allocation5 + $0x170] sm:$0xff]  ;;  %v1328_v39 = vld [vmem:[#allocation5 + $0x720] sm:$0xff] }
 0x1b7   : > { %995 = vst [vmem:[#allocation2 + $0x30] sm:$0x3f] %v987_v59  ;;  %v3326_v0 = vpack.i.bf16 %v4077_v62, %v4075_v60  ;;  %1355 = vmatpush.msra.mxu0 %v1118_v17  ;;  %v1178_v40 = vld [vmem:[#allocation5 + $0x270] sm:$0xff]  ;;  %v1252_v21 = vld [vmem:[#allocation5 + $0x4c0] sm:$0xff]  ;;  %vm2951_vm8 = vcmask 982016  }
 0x1b8   : > { %1377 = vmatpush.msra.mxu1 %v1146_v52  ;;  %1397 = vmatpush.msra.mxu2 %v1178_v40  ;;  %v1198_v34 = vld [vmem:[#allocation5 + $0x310] sm:$0xff]  ;;  %v1284_v57 = vld [vmem:[#allocation5 + $0x5c0] sm:$0xff] }
 0x1b9   : > { %3327 = vrot.lane.b32.xlu2 %v3326_v0, %s3494_s24  ;;  %1356 = vmatpush.msra.mxu0 %v1116_v41  ;;  %v1208_v0 = vld [vmem:[#allocation5 + $0x360] sm:$0xff]  ;;  %v1258_v35 = vld [vmem:[#allocation5 + $0x4f0] sm:$0xff] }
 0x1ba   : > { %v1330_v17 = vld [vmem:[#allocation5 + $0x730] sm:$0x1f]  ;;  %v1248_v40 = vld [vmem:[#allocation5 + $0x4a0] sm:$0xff] }
 0x1bb   : > { %1357 = vmatpush.msra.mxu0 %v1114_v48  ;;  %v1318_v41 = vld [vmem:[#allocation5 + $0x6d0] sm:$0xff] }
 0x1bc   : > { %v1326_v1 = vld [vmem:[#allocation5 + $0x710] sm:$0xff] }
 0x1bd   : > { %v4082_v42 = vld [vmem:[#allocation2 + $0x38] sm:$0x3f]  ;;  %v1282_v48 = vld [vmem:[#allocation5 + $0x5b0] sm:$0xff] }
 0x1be   : > { %1028 = vrot.lane.b32.xlu0 %v4082_v42, %s3494_s24  ;;  %v4086_v56 = vld [vmem:[#allocation2 + $0x30] sm:$0x3f]  ;;  %v1314_v52 = vld [vmem:[#allocation5 + $0x6b0] sm:$0xff] }
 0x1bf   : > { %1026 = vrot.lane.b32.xlu1 %v4086_v56, %s3494_s24 }
 0x202   : > { %v3318_v19 = vpop.permute.xlu0 %3317 }
 0x203   : > { %v3320_v44 = vunpack.i.h.bf16 %v3318_v19  ;;  %v3319_v10 = vunpack.i.l.bf16 %v3318_v19  ;;  %v1138_v19 = vld [vmem:[#allocation5 + $0x130] sm:$0xff] }
 0x205   : > { %v1033_v11 = vsel %vm545_vm0, %v3319_v10, %v3320_v44 }
 0x206   : > { %v4097_v36 = vmax.f32 %v4028_v54, %v1033_v11  ;;  %v1290_v11 = vld [vmem:[#allocation5 + $0x5f0] sm:$0xff] }
 0x213   : > { %v3328_v30 = vpop.permute.xlu2 %3327 }
 0x214   : > { %v3330_v4 = vunpack.i.h.bf16 %v3328_v30  ;;  %v3329_v45 = vunpack.i.l.bf16 %v3328_v30  ;;  %v1170_v30 = vld [vmem:[#allocation5 + $0x230] sm:$0xff] }
 0x216   : > { %v1030_v37 = vsel %vm545_vm0, %v3329_v45, %v3330_v4 }
 0x217   : > { %v4100_v23 = vmax.f32 %v4075_v60, %v1030_v37  ;;  %v1112_v60 = vld [vmem:[#allocation5 + $0x60] sm:$0xff]  ;;  %v1322_v37 = vld [vmem:[#allocation5 + $0x6f0] sm:$0xff] }
 0x218   : > { %1358 = vmatpush.msra.mxu0 %v1112_v60  ;;  %v1278_v60 = vld [vmem:[#allocation5 + $0x590] sm:$0xff] }
 0x21a   : > { %1359 = vmatpush.msra.mxu0 %v1110_v61  ;;  %v1308_v61 = vld [vmem:[#allocation5 + $0x680] sm:$0xff] }
 0x21c   : > { %1360 = vmatpush.msra.mxu0 %v1108_v2  ;;  %v1240_v2 = vld [vmem:[#allocation5 + $0x460] sm:$0xff] }
 0x21e   : > { %1361 = vmatpush.msra.mxu0 %v1106_v9  ;;  %v1270_v9 = vld [vmem:[#allocation5 + $0x550] sm:$0xff] }
 0x220   : > { %1362 = vmatpush.msra.mxu0 %v1104_v28  ;;  %v1266_v28 = vld [vmem:[#allocation5 + $0x530] sm:$0xff] }
 0x222   : > { %v4092_v6 = vpop.permute.xlu1 %3322  ;;  %1363 = vmatpush.msra.mxu0 %v1102_v15  ;;  %v1262_v15 = vld [vmem:[#allocation5 + $0x510] sm:$0xff] }
 0x223   : > { %v3325_v38 = vunpack.i.h.bf16 %v4092_v6  ;;  %v3324_v22 = vunpack.i.l.bf16 %v4092_v6  ;;  %v1288_v6 = vld [vmem:[#allocation5 + $0x5e0] sm:$0xff] }
 0x225   : > { %v1032_v46 = vsel %vm545_vm0, %v3325_v38, %v3319_v10  ;;  %v1034_v43 = vsel %vm545_vm0, %v3320_v44, %v3324_v22  ;;  %v1031_v47 = vsel %vm545_vm0, %v3330_v4, %v3325_v38  ;;  %v1168_v10 = vld [vmem:[#allocation5 + $0x220] sm:$0xff]  ;;  %v1254_v38 = vld [vmem:[#allocation5 + $0x4d0] sm:$0xff] }
 0x226   : > { %v4108_v54 = vmax.f32 %v4077_v62, %v1031_v47  ;;  %v4111_v50 = vmax.f32 %v4030_v55, %v1034_v43  ;;  %v4114_v51 = vmax.f32 %v4062_v12, %v1032_v46  ;;  %v1210_v55 = vld [vmem:[#allocation5 + $0x370] sm:$0xff]  ;;  %v1144_v12 = vld [vmem:[#allocation5 + $0x160] sm:$0xff] }
 0x227   : > { %v1176_v62 = vld [vmem:[#allocation5 + $0x260] sm:$0xff]  ;;  %1417 = vmatpush.msra.mxu3 %v1210_v55  ;;  %1378 = vmatpush.msra.mxu1 %v1144_v12  ;;  %v1250_v47 = vld [vmem:[#allocation5 + $0x4b0] sm:$0xff] }
 0x228   : > { %1063 = vrot.lane.b32.xlu1 %v4108_v54, %s3496_s15  ;;  %v3331_v29 = vpack.i.bf16 %v4111_v50, %v4097_v36  ;;  %v3336_v59 = vpack.i.bf16 %v4100_v23, %v4114_v51  ;;  %1398 = vmatpush.msra.mxu2 %v1176_v62  ;;  %v1200_v4 = vld [vmem:[#allocation5 + $0x320] sm:$0xff]  ;;  %v1246_v55 = vld [vmem:[#allocation5 + $0x490] sm:$0xff] }
 0x229   : > { %1418 = vmatpush.msra.mxu3 %v1208_v0  ;;  %1379 = vmatpush.msra.mxu1 %v1142_v53  ;;  %v1316_v46 = vld [vmem:[#allocation5 + $0x6c0] sm:$0xff]  ;;  %v1310_v12 = vld [vmem:[#allocation5 + $0x690] sm:$0xff] }
 0x22a   : > { %3332 = vrot.lane.b32.xlu2 %v3331_v29, %s3496_s15  ;;  %3337 = vrot.lane.b32.xlu0 %v3336_v59, %s3496_s15  ;;  %v1324_v43 = vld [vmem:[#allocation5 + $0x700] sm:$0xff]  ;;  %v1242_v53 = vld [vmem:[#allocation5 + $0x470] sm:$0xff] }
 0x22b   : > { %1399 = vmatpush.msra.mxu2 %v1174_v16  ;;  %1419 = vmatpush.msra.mxu3 %v1206_v8  ;;  %v1280_v29 = vld [vmem:[#allocation5 + $0x5a0] sm:$0xff]  ;;  %v1274_v16 = vld [vmem:[#allocation5 + $0x570] sm:$0xff] }
 0x22c   : > { %1380 = vmatpush.msra.mxu1 %v1140_v13  ;;  %v1312_v59 = vld [vmem:[#allocation5 + $0x6a0] sm:$0xff]  ;;  %v1306_v8 = vld [vmem:[#allocation5 + $0x670] sm:$0xff] }
 0x22d   : > { %1400 = vmatpush.msra.mxu2 %v1172_v14  ;;  %1420 = vmatpush.msra.mxu3 %v1204_v18  ;;  %v1244_v62 = vld [vmem:[#allocation5 + $0x480] sm:$0xff]  ;;  %v1238_v18 = vld [vmem:[#allocation5 + $0x450] sm:$0xff] }
 0x22e   : > { %1381 = vmatpush.msra.mxu1 %v1138_v19  ;;  %v1276_v0 = vld [vmem:[#allocation5 + $0x580] sm:$0xff]  ;;  %v1302_v19 = vld [vmem:[#allocation5 + $0x650] sm:$0xff] }
 0x22f   : > { %1401 = vmatpush.msra.mxu2 %v1170_v30  ;;  %1421 = vmatpush.msra.mxu3 %v1202_v32  ;;  %v1272_v13 = vld [vmem:[#allocation5 + $0x560] sm:$0xff] }
 0x230   : > { %v1029_v26 = vpop.permute.xlu0 %1028  ;;  %1382 = vmatpush.msra.mxu1 %v1136_v25  ;;  %v1304_v14 = vld [vmem:[#allocation5 + $0x660] sm:$0xff]  ;;  %v1298_v25 = vld [vmem:[#allocation5 + $0x630] sm:$0xff] }
 0x231   : > { %v4125_v7 = vmax.f32 %v4082_v42, %v1029_v26  ;;  %v1027_v27 = vpop.permute.xlu1 %1026  ;;  %1402 = vmatpush.msra.mxu2 %v1168_v10  ;;  %1422 = vmatpush.msra.mxu3 %v1200_v4  ;;  %v1236_v30 = vld [vmem:[#allocation5 + $0x440] sm:$0xff]  ;;  %v1230_v4 = vld [vmem:[#allocation5 + $0x410] sm:$0xff] }
 0x232   : > { %v1035_v3 = vsel %vm545_vm0, %v3324_v22, %v1027_v27  ;;  %v1036_v44 = vsel %vm545_vm0, %v1027_v27, %v1029_v26  ;;  %1383 = vmatpush.msra.mxu1 %v1134_v31  ;;  %v1286_v22 = vld [vmem:[#allocation5 + $0x5d0] sm:$0xff]  ;;  %v1268_v26 = vld [vmem:[#allocation5 + $0x540] sm:$0xff] }
 0x233   : > { %v4132_v45 = vmax.f32 %v4064_v33, %v1035_v3  ;;  %v4135_v42 = vmax.f32 %v4086_v56, %v1036_v44  ;;  %1075 = vrot.lane.b32.xlu2 %v4125_v7, %s3496_s15  ;;  %v1100_v33 = vld [vmem:[#allocation5] sm:$0xff]  ;;  %1403 = vmatpush.msra.mxu2 %v1166_v5  ;;  %v1234_v27 = vld [vmem:[#allocation5 + $0x430] sm:$0xff] }
 0x234   : > { %v1132_v56 = vld [vmem:[#allocation5 + $0x100] sm:$0xff]  ;;  %1423 = vmatpush.msra.mxu3 %v1198_v34  ;;  %1364 = vmatpush.msra.mxu0 %v1100_v33  ;;  %v1294_v31 = vld [vmem:[#allocation5 + $0x610] sm:$0xff] }
 0x235   : > { %v3341_v49 = vpack.i.bf16 %v4135_v42, %v4132_v45  ;;  %1384 = vmatpush.msra.mxu1 %v1132_v56  ;;  %1404 = vmatpush.msra.mxu2 %v1164_v20  ;;  %v1300_v32 = vld [vmem:[#allocation5 + $0x640] sm:$0xff] }
 0x236   : > { %1424 = vmatpush.msra.mxu3 %v1196_v24  ;;  %1429 = vmatpush.msrb.mxu0 %v1258_v35  ;;  %v1232_v3 = vld [vmem:[#allocation5 + $0x420] sm:$0xff] }
 0x237   : > { %3342 = vrot.lane.b32.xlu0 %v3341_v49, %s3496_s15  ;;  %1449 = vmatpush.msrb.mxu1 %v1290_v11  ;;  %v1264_v44 = vld [vmem:[#allocation5 + $0x520] sm:$0xff]  ;;  %v1131_v11 = vld [vmem:[#allocation5 + $0xf8] sm:$0xff] }
 0x238   : > { %1469 = vmatpush.msrb.mxu2 %v1322_v37  ;;  %3116 = vmatpush.msk.msrb.mxu3 %vm1342_vm9, %v1330_v17  ;;  %v1296_v10 = vld [vmem:[#allocation5 + $0x620] sm:$0xff]  ;;  %v1129_v37 = vld [vmem:[#allocation5 + $0xe8] sm:$0xff]  ;;  %v1127_v17 = vld [vmem:[#allocation5 + $0xd8] sm:$0xff] }
 0x239   : > { %1430 = vmatpush.msrb.mxu0 %v1256_v58  ;;  %1450 = vmatpush.msrb.mxu1 %v1288_v6  ;;  %v1228_v5 = vld [vmem:[#allocation5 + $0x400] sm:$0xff]  ;;  %v1125_v6 = vld [vmem:[#allocation5 + $0xc8] sm:$0xff] }
 0x23a   : > { %1470 = vmatpush.msrb.mxu2 %v1320_v63  ;;  %1502 = vmatpush.msrb.mxu3 %v1328_v39  ;;  %v1260_v49 = vld [vmem:[#allocation5 + $0x500] sm:$0xff]  ;;  %v1332_v63 = vld [vmem:[%s4569_s2] sm:$0x3f]  ;;  %v1123_v39 = vld [vmem:[#allocation5 + $0xb8] sm:$0xff] }
 0x23b   : > { %1431 = vmatpush.msrb.mxu0 %v1254_v38  ;;  %1451 = vmatpush.msrb.mxu1 %v1286_v22  ;;  %v1292_v34 = vld [vmem:[#allocation5 + $0x600] sm:$0xff]  ;;  %v1121_v38 = vld [vmem:[#allocation5 + $0xa8] sm:$0xff]  ;;  %v1119_v22 = vld [vmem:[#allocation5 + $0x98] sm:$0xff] }
 0x23c   : > { %1471 = vmatpush.msrb.mxu2 %v1318_v41  ;;  %1503 = vmatpush.msrb.mxu3 %v1326_v1  ;;  %v1117_v41 = vld [vmem:[#allocation5 + $0x88] sm:$0xff]  ;;  %v1115_v1 = vld [vmem:[#allocation5 + $0x78] sm:$0xff] }
 0x23d   : > { %1432 = vmatpush.msrb.mxu0 %v1252_v21  ;;  %1452 = vmatpush.msrb.mxu1 %v1284_v57  ;;  %v1113_v21 = vld [vmem:[#allocation5 + $0x68] sm:$0xff] }
 0x23e   : > { %1472 = vmatpush.msrb.mxu2 %v1316_v46  ;;  %1504 = vmatpush.msrb.mxu3 %v1324_v43  ;;  %v1111_v46 = vld [vmem:[#allocation5 + $0x58] sm:$0xff] }
 0x23f   : > { %1433 = vmatpush.msrb.mxu0 %v1250_v47  ;;  %1453 = vmatpush.msrb.mxu1 %v1282_v48  ;;  %v1109_v48 = vld [vmem:[#allocation5 + $0x48] sm:$0xff] }
 0x240   : > { %1473 = vmatpush.msrb.mxu2 %v1314_v52  ;;  %1335 = vperm.xlu1 %3346, %v1332_v63   ;;  %v1251_v63 = vld [vmem:[#allocation5 + $0x4b8] sm:$0xff] }
 0x241   : > { %1434 = vmatpush.msrb.mxu0 %v1248_v40  ;;  %1454 = vmatpush.msrb.mxu1 %v1280_v29 }
 0x242   : > { %1474 = vmatpush.msrb.mxu2 %v1312_v59 }
 0x243   : > { %1435 = vmatpush.msrb.mxu0 %v1246_v55  ;;  %1455 = vmatpush.msrb.mxu1 %v1278_v60 }
 0x244   : > { %1475 = vmatpush.msrb.mxu2 %v1310_v12  ;;  %v1107_v12 = vld [vmem:[#allocation5 + $0x38] sm:$0xff] }
 0x245   : > { %1436 = vmatpush.msrb.mxu0 %v1244_v62  ;;  %1456 = vmatpush.msrb.mxu1 %v1276_v0  ;;  %v1163_v62 = vld [vmem:[#allocation5 + $0x1f8] sm:$0xff] }
 0x246   : > { %1476 = vmatpush.msrb.mxu2 %v1308_v61  ;;  %v1195_v0 = vld [vmem:[#allocation5 + $0x2f8] sm:$0xff] }
 0x247   : > { %1437 = vmatpush.msrb.mxu0 %v1242_v53  ;;  %1457 = vmatpush.msrb.mxu1 %v1274_v16  ;;  %v1227_v61 = vld [vmem:[#allocation5 + $0x3f8] sm:$0xff]  ;;  %v1105_v53 = vld [vmem:[#allocation5 + $0x28] sm:$0xff] }
 0x248   : > { %1477 = vmatpush.msrb.mxu2 %v1306_v8  ;;  %v1161_v16 = vld [vmem:[#allocation5 + $0x1e8] sm:$0xff]  ;;  %v1103_v8 = vld [vmem:[#allocation5 + $0x18] sm:$0xff] }
 0x249   : > { %1438 = vmatpush.msrb.mxu0 %v1240_v2  ;;  %1458 = vmatpush.msrb.mxu1 %v1272_v13  ;;  %v1191_v2 = vld [vmem:[#allocation5 + $0x2d8] sm:$0xff] }
 0x24a   : > { %1478 = vmatpush.msrb.mxu2 %v1304_v14  ;;  %v1223_v13 = vld [vmem:[#allocation5 + $0x3d8] sm:$0xff]  ;;  %v1101_v14 = vld [vmem:[#allocation5 + $0x8] sm:$0xff] }
 0x24b   : > { %1439 = vmatpush.msrb.mxu0 %v1238_v18  ;;  %1459 = vmatpush.msrb.mxu1 %v1270_v9  ;;  %v1157_v18 = vld [vmem:[#allocation5 + $0x1c8] sm:$0xff] }
 0x24c   : > { %1479 = vmatpush.msrb.mxu2 %v1302_v19  ;;  %v1189_v9 = vld [vmem:[#allocation5 + $0x2c8] sm:$0xff] }
 0x24d   : > { %1440 = vmatpush.msrb.mxu0 %v1236_v30  ;;  %1460 = vmatpush.msrb.mxu1 %v1268_v26  ;;  %v1221_v19 = vld [vmem:[#allocation5 + $0x3c8] sm:$0xff]  ;;  %v1259_v30 = vld [vmem:[#allocation5 + $0x4f8] sm:$0xff] }
 0x24e   : > { %1480 = vmatpush.msrb.mxu2 %v1300_v32  ;;  %v1155_v32 = vld [vmem:[#allocation5 + $0x1b8] sm:$0xff] }
 0x24f   : > { %1441 = vmatpush.msrb.mxu0 %v1234_v27  ;;  %1461 = vmatpush.msrb.mxu1 %v1266_v28 }
 0x250   : > { %1481 = vmatpush.msrb.mxu2 %v1298_v25  ;;  %v1187_v25 = vld [vmem:[#allocation5 + $0x2b8] sm:$0xff] }
 0x251   : > { %1442 = vmatpush.msrb.mxu0 %v1232_v3  ;;  %1462 = vmatpush.msrb.mxu1 %v1264_v44  ;;  %v1219_v3 = vld [vmem:[#allocation5 + $0x3b8] sm:$0xff]  ;;  %v1257_v44 = vld [vmem:[#allocation5 + $0x4e8] sm:$0xff] }
 0x252   : > { %1482 = vmatpush.msrb.mxu2 %v1296_v10  ;;  %v1153_v10 = vld [vmem:[#allocation5 + $0x1a8] sm:$0xff] }
 0x253   : > { %1443 = vmatpush.msrb.mxu0 %v1230_v4  ;;  %1463 = vmatpush.msrb.mxu1 %v1262_v15  ;;  %v1185_v4 = vld [vmem:[#allocation5 + $0x2a8] sm:$0xff] }
 0x254   : > { %1483 = vmatpush.msrb.mxu2 %v1294_v31  ;;  %v1217_v15 = vld [vmem:[#allocation5 + $0x3a8] sm:$0xff] }
 0x255   : > { %1444 = vmatpush.msrb.mxu0 %v1228_v5  ;;  %1464 = vmatpush.msrb.mxu1 %v1260_v49 }
 0x256   : > { %1484 = vmatpush.msrb.mxu2 %v1292_v34  ;;  %v1255_v34 = vld [vmem:[#allocation5 + $0x4d8] sm:$0xff] }
 0x284   : > { %v4143_v33 = vpop.permute.xlu2 %3332 }
 0x285   : > { %v3335_v56 = vunpack.i.h.bf16 %v4143_v33  ;;  %v3334_v20 = vunpack.i.l.bf16 %v4143_v33 }
 0x287   : > { %v1080_v24 = vsel %vm665_vm2, %v3334_v20, %v3335_v56 }
 0x288   : > { %v4151_v35 = vmax.f32 %v4097_v36, %v1080_v24  ;;  %v1183_v24 = vld [vmem:[#allocation5 + $0x298] sm:$0xff] }
 0x28a   : > { %1425 = vmatmul.f32.vlgmr.msra.gmra.mxu3 %v4151_v35 }
 0x28b   : > { %1509 = vmatpush.msra.mxu3 %v1131_v11  ;;  %v1215_v11 = vld [vmem:[#allocation5 + $0x398] sm:$0xff] }
 0x28d   : > { %1510 = vmatpush.msra.mxu3 %v1129_v37  ;;  %v4154_v58 = vpop.permute.xlu2 %1075 }
 0x28e   : > { %v4161_v36 = vmax.f32 %v4125_v7, %v4154_v58 }
 0x28f   : > { %1511 = vmatpush.msra.mxu3 %v1127_v17  ;;  %v1253_v17 = vld [vmem:[#allocation5 + $0x4c8] sm:$0xff] }
 0x291   : > { %1512 = vmatpush.msra.mxu3 %v1125_v6  ;;  %v1181_v6 = vld [vmem:[#allocation5 + $0x288] sm:$0xff] }
 0x292   : > { %3117 = vmatmul.msk.f32.vlgmr.msrb.gmra.mxu3 %vm1338_vm10, %v4161_v36 }
 0x293   : > { %1513 = vmatpush.msra.mxu3 %v1123_v39  ;;  %v1179_v39 = vld [vmem:[#allocation5 + $0x278] sm:$0xff] }
 0x295   : > { %1514 = vmatpush.msra.mxu3 %v1121_v38  ;;  %v1249_v38 = vld [vmem:[#allocation5 + $0x4a8] sm:$0xff] }
 0x297   : > { %1515 = vmatpush.msra.mxu3 %v1119_v22  ;;  %v1145_v22 = vld [vmem:[#allocation5 + $0x168] sm:$0xff] }
 0x299   : > { %1516 = vmatpush.msra.mxu3 %v1117_v41  ;;  %v1177_v41 = vld [vmem:[#allocation5 + $0x268] sm:$0xff] }
 0x29a   : > { %v1064_v47 = vpop.permute.xlu1 %1063 }
 0x29b   : > { %1517 = vmatpush.msra.mxu3 %v1115_v1  ;;  %v1209_v1 = vld [vmem:[#allocation5 + $0x368] sm:$0xff] }
 0x29c   : > { %v3338_v57 = vpop.permute.xlu0 %3337 }
 0x29d   : > { %1518 = vmatpush.msra.mxu3 %v1113_v21  ;;  %v3340_v7 = vunpack.i.h.bf16 %v3338_v57  ;;  %v3339_v43 = vunpack.i.l.bf16 %v3338_v57  ;;  %v1247_v21 = vld [vmem:[#allocation5 + $0x498] sm:$0xff] }
 0x29e   : > { %v1143_v57 = vld [vmem:[#allocation5 + $0x158] sm:$0xff] }
 0x29f   : > { %1519 = vmatpush.msra.mxu3 %v1111_v46  ;;  %v1077_v52 = vsel %vm665_vm2, %v3340_v7, %v1064_v47  ;;  %v1078_v40 = vsel %vm665_vm2, %v1064_v47, %v3339_v43  ;;  %v1079_v29 = vsel %vm665_vm2, %v3339_v43, %v3334_v20  ;;  %v1151_v20 = vld [vmem:[#allocation5 + $0x198] sm:$0xff]  ;;  %v1245_v43 = vld [vmem:[#allocation5 + $0x488] sm:$0xff] }
 0x2a0   : > { %v1092_v59 = vmax.f32 %v4100_v23, %v1077_v52  ;;  %v4170_v55 = vmax.f32 %v4108_v54, %v1078_v40  ;;  %v4173_v60 = vmax.f32 %v4114_v51, %v1079_v29  ;;  %v1193_v23 = vld [vmem:[#allocation5 + $0x2e8] sm:$0xff]  ;;  %v1159_v51 = vld [vmem:[#allocation5 + $0x1d8] sm:$0xff] }
 0x2a1   : > { %1520 = vmatpush.msra.mxu3 %v1109_v48  ;;  %v1225_v54 = vld [vmem:[#allocation5 + $0x3e8] sm:$0xff]  ;;  %v1175_v46 = vld [vmem:[#allocation5 + $0x258] sm:$0xff] }
 0x2a2   : > { %1365 = vmatmul.f32.vlgmr.msra.gmra.mxu0 %v1092_v59  ;;  %1385 = vmatmul.f32.vlgmr.msra.gmra.mxu1 %v4170_v55  ;;  %v1207_v7 = vld [vmem:[#allocation5 + $0x358] sm:$0xff]  ;;  %v1141_v47 = vld [vmem:[#allocation5 + $0x148] sm:$0xff] }
 0x2a3   : > { %1405 = vmatmul.f32.vlgmr.msra.gmra.mxu2 %v4173_v60  ;;  %1521 = vmatpush.msra.mxu3 %v1107_v12  ;;  %v1173_v48 = vld [vmem:[#allocation5 + $0x248] sm:$0xff]  ;;  %v1243_v40 = vld [vmem:[#allocation5 + $0x478] sm:$0xff] }
 0x2a4   : > { %1529 = vmatpush.msra.mxu0 %v1163_v62  ;;  %1549 = vmatpush.msra.mxu1 %v1195_v0  ;;  %v1205_v52 = vld [vmem:[#allocation5 + $0x348] sm:$0xff]  ;;  %v1139_v29 = vld [vmem:[#allocation5 + $0x138] sm:$0xff] }
 0x2a5   : > { %1569 = vmatpush.msra.mxu2 %v1227_v61  ;;  %1522 = vmatpush.msra.mxu3 %v1105_v53  ;;  %v1203_v12 = vld [vmem:[#allocation5 + $0x338] sm:$0xff]  ;;  %v1241_v62 = vld [vmem:[#allocation5 + $0x468] sm:$0xff] }
 0x2a6   : > { %1530 = vmatpush.msra.mxu0 %v1161_v16  ;;  %1550 = vmatpush.msra.mxu1 %v1193_v23  ;;  %v1137_v0 = vld [vmem:[#allocation5 + $0x128] sm:$0xff]  ;;  %v1239_v16 = vld [vmem:[#allocation5 + $0x458] sm:$0xff] }
 0x2a7   : > { %1570 = vmatpush.msra.mxu2 %v1225_v54  ;;  %1523 = vmatpush.msra.mxu3 %v1103_v8  ;;  %v1169_v61 = vld [vmem:[#allocation5 + $0x228] sm:$0xff]  ;;  %v1135_v23 = vld [vmem:[#allocation5 + $0x118] sm:$0xff] }
 0x2a8   : > { %1531 = vmatpush.msra.mxu0 %v1159_v51  ;;  %1551 = vmatpush.msra.mxu1 %v1191_v2  ;;  %v1201_v53 = vld [vmem:[#allocation5 + $0x328] sm:$0xff]  ;;  %v1167_v54 = vld [vmem:[#allocation5 + $0x218] sm:$0xff] }
 0x2a9   : > { %1571 = vmatpush.msra.mxu2 %v1223_v13  ;;  %1524 = vmatpush.msra.mxu3 %v1101_v14  ;;  %v3343_v26 = vpop.permute.xlu0 %3342  ;;  %v1199_v8 = vld [vmem:[#allocation5 + $0x318] sm:$0xff]  ;;  %v1237_v51 = vld [vmem:[#allocation5 + $0x448] sm:$0xff] }
 0x2aa   : > { %1532 = vmatpush.msra.mxu0 %v1157_v18  ;;  %1552 = vmatpush.msra.mxu1 %v1189_v9  ;;  %v3345_v27 = vunpack.i.h.bf16 %v3343_v26  ;;  %v3344_v28 = vunpack.i.l.bf16 %v3343_v26  ;;  %v1133_v2 = vld [vmem:[#allocation5 + $0x108] sm:$0xff]  ;;  %v1235_v18 = vld [vmem:[#allocation5 + $0x438] sm:$0xff] }
 0x2ab   : > { %1572 = vmatpush.msra.mxu2 %v1221_v19  ;;  %1589 = vmatpush.msrb.mxu3 %v1259_v30  ;;  %v1165_v13 = vld [vmem:[#allocation5 + $0x208] sm:$0xff]  ;;  %v1291_v9 = vld [vmem:[#allocation5 + $0x5f8] sm:$0xff] }
 0x2ac   : > { %1525 = vmatmul.f32.vlgmr.msra.gmra.mxu3 %v1092_v59  ;;  %1533 = vmatpush.msra.mxu0 %v1155_v32  ;;  %v1081_v31 = vsel %vm665_vm2, %v3335_v56, %v3344_v28  ;;  %v1082_v5 = vsel %vm665_vm2, %v3344_v28, %v3345_v27  ;;  %v1083_v49 = vsel %vm665_vm2, %v3345_v27, %v4154_v58  ;;  %v1149_v58 = vld [vmem:[#allocation5 + $0x188] sm:$0xff]  ;;  %v1171_v59 = vld [vmem:[#allocation5 + $0x238] sm:$0xff] }
 0x2ad   : > { %1553 = vmatpush.msra.mxu1 %v1187_v25  ;;  %1573 = vmatpush.msra.mxu2 %v1219_v3  ;;  %v4184_v37 = vmax.f32 %v4111_v50, %v1081_v31  ;;  %v4187_v33 = vmax.f32 %v4132_v45, %v1082_v5  ;;  %v4190_v56 = vmax.f32 %v4135_v42, %v1083_v49  ;;  %v1213_v50 = vld [vmem:[#allocation5 + $0x388] sm:$0xff]  ;;  %v1147_v45 = vld [vmem:[#allocation5 + $0x178] sm:$0xff] }
 0x2ae   : > { %1590 = vmatpush.msrb.mxu3 %v1257_v44  ;;  %1534 = vmatpush.msra.mxu0 %v1153_v10  ;;  %v1211_v42 = vld [vmem:[#allocation5 + $0x378] sm:$0xff]  ;;  %v1197_v14 = vld [vmem:[#allocation5 + $0x308] sm:$0xff] }
 0x2af   : > { %1554 = vmatpush.msra.mxu1 %v1185_v4  ;;  %1574 = vmatpush.msra.mxu2 %v1217_v15  ;;  %v1323_v19 = vld [vmem:[#allocation5 + $0x6f8] sm:$0xff]  ;;  %v1233_v26 = vld [vmem:[#allocation5 + $0x428] sm:$0xff] }
 0x2b0   : > { %1591 = vmatpush.msrb.mxu3 %v1255_v34  ;;  %1535 = vmatpush.msra.mxu0 %v1151_v20  ;;  %v1331_v30 = vld [vmem:[#allocation5 + $0x738] sm:$0x1f]  ;;  %v1289_v32 = vld [vmem:[#allocation5 + $0x5e8] sm:$0xff] }
 0x2b1   : > { %1555 = vmatpush.msra.mxu1 %v1183_v24  ;;  %1575 = vmatpush.msra.mxu2 %v1215_v11  ;;  %v1321_v27 = vld [vmem:[#allocation5 + $0x6e8] sm:$0xff]  ;;  %v1231_v25 = vld [vmem:[#allocation5 + $0x418] sm:$0xff] }
 0x2b2   : > { %1445 = vmatmul.f32.vlgmr.msrb.gmra.mxu0 %v4184_v37  ;;  %1465 = vmatmul.f32.vlgmr.msrb.gmra.mxu1 %v4187_v33  ;;  %v1329_v28 = vld [vmem:[#allocation5 + $0x728] sm:$0xff]  ;;  %v1287_v3 = vld [vmem:[#allocation5 + $0x5d8] sm:$0xff] }
 0x2b3   : > { %1485 = vmatmul.f32.vlgmr.msrb.gmra.mxu2 %v4190_v56  ;;  %1592 = vmatpush.msrb.mxu3 %v1253_v17  ;;  %v1327_v44 = vld [vmem:[#allocation5 + $0x718] sm:$0xff]  ;;  %v1285_v10 = vld [vmem:[#allocation5 + $0x5c8] sm:$0xff] }
 0x2b4   : > { %1536 = vmatpush.msra.mxu0 %v1149_v58  ;;  %1556 = vmatpush.msra.mxu1 %v1181_v6  ;;  %v1325_v4 = vld [vmem:[#allocation5 + $0x708] sm:$0xff]  ;;  %v1283_v15 = vld [vmem:[#allocation5 + $0x5b8] sm:$0xff] }
 0x2b5   : > { %1576 = vmatpush.msra.mxu2 %v1213_v50  ;;  %1593 = vmatpush.msrb.mxu3 %v1251_v63  ;;  %v1315_v31 = vld [vmem:[#allocation5 + $0x6b8] sm:$0xff]  ;;  %v1281_v5 = vld [vmem:[#allocation5 + $0x5a8] sm:$0xff] }
 0x2b6   : > { %1537 = vmatpush.msra.mxu0 %v1147_v45  ;;  %1557 = vmatpush.msra.mxu1 %v1179_v39  ;;  %v1313_v49 = vld [vmem:[#allocation5 + $0x6a8] sm:$0xff]  ;;  %v1279_v34 = vld [vmem:[#allocation5 + $0x598] sm:$0xff] }
 0x2b7   : > { %1577 = vmatpush.msra.mxu2 %v1211_v42  ;;  %1594 = vmatpush.msrb.mxu3 %v1249_v38  ;;  %v1311_v20 = vld [vmem:[#allocation5 + $0x698] sm:$0xff]  ;;  %v1277_v24 = vld [vmem:[#allocation5 + $0x588] sm:$0xff] }
 0x2b8   : > { %1538 = vmatpush.msra.mxu0 %v1145_v22  ;;  %1558 = vmatpush.msra.mxu1 %v1177_v41  ;;  %v1309_v11 = vld [vmem:[#allocation5 + $0x688] sm:$0xff]  ;;  %v1275_v17 = vld [vmem:[#allocation5 + $0x578] sm:$0xff] }
 0x2b9   : > { %1578 = vmatpush.msra.mxu2 %v1209_v1  ;;  %1595 = vmatpush.msrb.mxu3 %v1247_v21  ;;  %v1307_v58 = vld [vmem:[#allocation5 + $0x678] sm:$0xff]  ;;  %v1305_v6 = vld [vmem:[#allocation5 + $0x668] sm:$0xff] }
 0x2ba   : > { %1539 = vmatpush.msra.mxu0 %v1143_v57  ;;  %1559 = vmatpush.msra.mxu1 %v1175_v46  ;;  %v1271_v50 = vld [vmem:[#allocation5 + $0x558] sm:$0xff]  ;;  %v1301_v45 = vld [vmem:[#allocation5 + $0x648] sm:$0xff]  ;;  %v4207_v46 = vld [vmem:[%s4571_s4] sm:$0xff] }
 0x2bb   : > { %1579 = vmatpush.msra.mxu2 %v1207_v7  ;;  %1596 = vmatpush.msrb.mxu3 %v1245_v43  ;;  %v1303_v63 = vld [vmem:[#allocation5 + $0x658] sm:$0xff]  ;;  %v1265_v38 = vld [vmem:[#allocation5 + $0x528] sm:$0xff]  ;;  %v1336_v7 = vpop.permute.xlu1 %1335 }
 0x2bc   : > { %1540 = vmatpush.msra.mxu0 %v1141_v47  ;;  %1560 = vmatpush.msra.mxu1 %v1173_v48  ;;  %v1267_v39 = vld [vmem:[#allocation5 + $0x538] sm:$0xff]  ;;  %v1297_v22 = vld [vmem:[#allocation5 + $0x628] sm:$0xff] }
 0x2bd   : > { %1580 = vmatpush.msra.mxu2 %v1205_v52  ;;  %1597 = vmatpush.msrb.mxu3 %v1243_v40  ;;  %v1299_v42 = vld [vmem:[#allocation5 + $0x638] sm:$0xff]  ;;  %v1261_v21 = vld [vmem:[#allocation5 + $0x508] sm:$0xff] }
 0x2be   : > { %1541 = vmatpush.msra.mxu0 %v1139_v29  ;;  %1561 = vmatpush.msra.mxu1 %v1171_v59  ;;  %v1263_v41 = vld [vmem:[#allocation5 + $0x518] sm:$0xff]  ;;  %v1293_v57 = vld [vmem:[#allocation5 + $0x608] sm:$0xff] }
 0x2bf   : > { %1581 = vmatpush.msra.mxu2 %v1203_v12  ;;  %1598 = vmatpush.msrb.mxu3 %v1241_v62  ;;  %v1295_v1 = vld [vmem:[#allocation5 + $0x618] sm:$0xff] }
 0x2c0   : > { %1542 = vmatpush.msra.mxu0 %v1137_v0  ;;  %1562 = vmatpush.msra.mxu1 %v1169_v61 }
 0x2c1   : > { %1582 = vmatpush.msra.mxu2 %v1201_v53  ;;  %1599 = vmatpush.msrb.mxu3 %v1239_v16 }
 0x2c2   : > { %1543 = vmatpush.msra.mxu0 %v1135_v23  ;;  %1563 = vmatpush.msra.mxu1 %v1167_v54 }
 0x2c3   : > { %1583 = vmatpush.msra.mxu2 %v1199_v8  ;;  %1600 = vmatpush.msrb.mxu3 %v1237_v51  ;;  %v4219_v51 = vld [vmem:[%s4571_s4 + $0x8] sm:$0xff] }
 0x2c4   : > { %1544 = vmatpush.msra.mxu0 %v1133_v2  ;;  %1564 = vmatpush.msra.mxu1 %v1165_v13 }
 0x2c5   : > { %1584 = vmatpush.msra.mxu2 %v1197_v14  ;;  %1545 = vmatmul.f32.vlgmr.msra.gmra.mxu0 %v4170_v55  ;;  %v1319_v55 = vld [vmem:[#allocation5 + $0x6d8] sm:$0xff] }
 0x2c6   : > { %1565 = vmatmul.f32.vlgmr.msra.gmra.mxu1 %v4173_v60  ;;  %1585 = vmatmul.f32.vlgmr.msra.gmra.mxu2 %v4151_v35  ;;  %v1229_v60 = vld [vmem:[#allocation5 + $0x408] sm:$0xff] }
 0x2c7   : > { %1601 = vmatpush.msrb.mxu3 %v1235_v18  ;;  %1609 = vmatpush.msrb.mxu0 %v1291_v9  ;;  %v1317_v35 = vld [vmem:[#allocation5 + $0x6c8] sm:$0xff] }
 0x2c8   : > { %1629 = vmatpush.msrb.mxu1 %v1323_v19  ;;  %3118 = vmatpush.msk.msrb.mxu2 %vm1342_vm9, %v1331_v30  ;;  %vm2988_vm9 = vcmask 687104  }
 0x2c9   : > { %1602 = vmatpush.msrb.mxu3 %v1233_v26  ;;  %1610 = vmatpush.msrb.mxu0 %v1289_v32 }
 0x2ca   : > { %1630 = vmatpush.msrb.mxu1 %v1321_v27  ;;  %1662 = vmatpush.msrb.mxu2 %v1329_v28 }
 0x2cb   : > { %1603 = vmatpush.msrb.mxu3 %v1231_v25  ;;  %1611 = vmatpush.msrb.mxu0 %v1287_v3 }
 0x2cc   : > { %1631 = vmatpush.msrb.mxu1 %v1319_v55  ;;  %1663 = vmatpush.msrb.mxu2 %v1327_v44 }
 0x2cd   : > { %1604 = vmatpush.msrb.mxu3 %v1229_v60  ;;  %1612 = vmatpush.msrb.mxu0 %v1285_v10 }
 0x2ce   : > { %1632 = vmatpush.msrb.mxu1 %v1317_v35  ;;  %1605 = vmatmul.f32.vlgmr.msrb.gmra.mxu3 %v4184_v37  ;;  %v1273_v37 = vld [vmem:[#allocation5 + $0x568] sm:$0xff] }
 0x2cf   : > { %1664 = vmatpush.msrb.mxu2 %v1325_v4  ;;  %1613 = vmatpush.msrb.mxu0 %v1283_v15 }
 0x2d0   : > { %1633 = vmatpush.msrb.mxu1 %v1315_v31  ;;  %3119 = vmatmul.msk.f32.vlgmr.msrb.gmra.mxu2 %vm1338_vm10, %v4161_v36  ;;  %v1269_v36 = vld [vmem:[#allocation5 + $0x548] sm:$0xff]  ;;  %vm3015_vm10 = vcmask 73728  }
 0x2d1   : > { %1614 = vmatpush.msrb.mxu0 %v1281_v5  ;;  %1680 = vrot.lane.b32.xlu1 %v4207_v46, %s3502_s23 }
 0x2d2   : > { %1634 = vmatpush.msrb.mxu1 %v1313_v49 }
 0x2d3   : > { %1615 = vmatpush.msrb.mxu0 %v1279_v34 }
 0x2d4   : > { %1635 = vmatpush.msrb.mxu1 %v1311_v20 }
 0x2d5   : > { %1616 = vmatpush.msrb.mxu0 %v1277_v24 }
 0x2d6   : > { %1636 = vmatpush.msrb.mxu1 %v1309_v11 }
 0x2d7   : > { %1617 = vmatpush.msrb.mxu0 %v1275_v17 }
 0x2d8   : > { %1637 = vmatpush.msrb.mxu1 %v1307_v58 }
 0x2d9   : > { %1618 = vmatpush.msrb.mxu0 %v1273_v37 }
 0x2da   : > { %1638 = vmatpush.msrb.mxu1 %v1305_v6 }
 0x2db   : > { %1619 = vmatpush.msrb.mxu0 %v1271_v50 }
 0x2dc   : > { %1639 = vmatpush.msrb.mxu1 %v1303_v63 }
 0x2dd   : > { %1620 = vmatpush.msrb.mxu0 %v1269_v36 }
 0x2de   : > { %1640 = vmatpush.msrb.mxu1 %v1301_v45 }
 0x2df   : > { %1621 = vmatpush.msrb.mxu0 %v1267_v39 }
 0x2e0   : > { %1641 = vmatpush.msrb.mxu1 %v1299_v42 }
 0x2e1   : > { %1622 = vmatpush.msrb.mxu0 %v1265_v38 }
 0x2e2   : > { %1642 = vmatpush.msrb.mxu1 %v1297_v22 }
 0x2e3   : > { %1623 = vmatpush.msrb.mxu0 %v1263_v41 }
 0x2e4   : > { %1643 = vmatpush.msrb.mxu1 %v1295_v1 }
 0x2e5   : > { %1624 = vmatpush.msrb.mxu0 %v1261_v21 }
 0x2e6   : > { %1644 = vmatpush.msrb.mxu1 %v1293_v57  ;;  %1625 = vmatmul.f32.vlgmr.msrb.gmra.mxu0 %v4187_v33 }
 0x2e7   : > { %1645 = vmatmul.f32.vlgmr.msrb.gmra.mxu1 %v4190_v56 }
 0x30d   : > { %v1426_v59 = vpop.f32.mrf.mxu3 }
 0x315   : > { %v1506_v16 = vpop.f32.mrf.mxu3 }
 0x31f   : > { %v1366_v43 = vpop.f32.mrf.mxu0  ;;  %v1386_v48 = vpop.f32.mrf.mxu1 }
 0x320   : > { %v1367_v47 = vadd.f32 %v1366_v43, %v1336_v7 }
 0x322   : > { %v1387_v40 = vadd.f32 %v1386_v48, %v1367_v47 }
 0x326   : > { %v1406_v52 = vpop.f32.mrf.mxu2 }
 0x327   : > { %v1407_v29 = vadd.f32 %v1406_v52, %v1387_v40 }
 0x329   : > { %v1427_v12 = vadd.f32 %v1426_v59, %v1407_v29 }
 0x32f   : > { %v1446_v33 = vpop.f32.mrf.mxu0  ;;  %v1466_v56 = vpop.f32.mrf.mxu1 }
 0x330   : > { %v1447_v62 = vadd.f32 %v1446_v33, %v1427_v12  ;;  %v1526_v2 = vpop.f32.mrf.mxu3 }
 0x331   : > { %v1527_v14 = vadd.f32 %v1526_v2, %v1336_v7 }
 0x332   : > { %v1467_v0 = vadd.f32 %v1466_v56, %v1447_v62 }
 0x336   : > { %v1486_v61 = vpop.f32.mrf.mxu2 }
 0x337   : > { %v1487_v53 = vadd.f32 %v1486_v61, %v1467_v0 }
 0x339   : > { %v1507_v23 = vadd.f32 %v1506_v16, %v1487_v53 }
 0x33b   : > { %v1669_v54 = vmax.f32 %v1507_v23, 0.0 }
 0x33d   : > { %1671 = vst [vmem:[#allocation3] sm:$0x3f] %v1669_v54 }
 0x342   : > { %v1546_v13 = vpop.f32.mrf.mxu0 }
 0x343   : > { %v1547_v18 = vadd.f32 %v1546_v13, %v1527_v14  ;;  %v1566_v9 = vpop.f32.mrf.mxu1  ;;  %v1681_v5 = vpop.permute.xlu1 %1680 }
 0x344   : > { %v4210_v8 = vld [vmem:[#allocation3] sm:$0x3f] }
 0x345   : > { %1940 = vrot.lane.b32.xlu1 %v4210_v8, %s3503_s16  ;;  %1686 = vrot.lane.b32.xlu2 %v4210_v8, %s3494_s24  ;;  %v1567_v30 = vadd.f32 %v1566_v9, %v1547_v18 }
 0x349   : > { %v1586_v19 = vpop.f32.mrf.mxu2 }
 0x34a   : > { %v1587_v32 = vadd.f32 %v1586_v19, %v1567_v30 }
 0x34d   : > { %1682 = vrot.lane.b32.xlu2 %v4219_v51, %s3502_s23  ;;  %s3510_s23 = smov 97  }
 0x351   : > { %v1606_v26 = vpop.f32.mrf.mxu3 }
 0x352   : > { %v1607_v27 = vadd.f32 %v1606_v26, %v1587_v32 }
 0x353   : > { %v1666_v44 = vpop.f32.mrf.mxu2 }
 0x355   : > { %1801 = vrot.lane.b32.xlu2 %v4207_v46, %s3504_s3 }
 0x35d   : > { %1803 = vrot.lane.b32.xlu2 %v4219_v51, %s3504_s3  ;;  %s3427_s3 = scalar_lea.hbm %s4580_s13, 2 }
 0x363   : > { %v1626_v28 = vpop.f32.mrf.mxu0 }
 0x364   : > { %v1627_v25 = vadd.f32 %v1626_v28, %v1607_v27  ;;  %v1646_v3 = vpop.f32.mrf.mxu1 }
 0x365   : > { %2008 = vrot.lane.b32.xlu2 %v4210_v8, %s3505_s27 }
 0x366   : > { %v1647_v55 = vadd.f32 %v1646_v3, %v1627_v25 }
 0x368   : > { %v1667_v60 = vadd.f32 %v1666_v44, %v1647_v55 }
 0x36a   : > { %v1670_v10 = vmax.f32 %v1667_v60, 0.0 }
 0x36c   : > { %1673 = vst.msk [vmem:[#allocation3 + $0x8] sm:$0x3f] %vm1672_vm11, %v1670_v10 }
 0x373   : > { %v1677_v35 = vld [vmem:[#allocation3 + $0x8] sm:$0x3f] }
 0x374   : > { %1688 = vrot.lane.b32.xlu0 %v1677_v35, %s3494_s24  ;;  %1807 = vrot.lane.b32.xlu1 %v1677_v35, %s3495_s30 }
 0x375   : > { %1942 = vrot.lane.b32.xlu2 %v1677_v35, %s3503_s16  ;;  %s3512_s16 = smov 92  }
 0x37c   : > { %1874 = vrot.lane.b32.xlu1 %v1677_v35, %s3506_s14  ;;  %1805 = vrot.lane.b32.xlu0 %v4210_v8, %s3495_s30  ;;  %s3511_s30 = smov 86  }
 0x37d   : > { %2004 = vrot.lane.b32.xlu2 %v4207_v46, %s3507_s17 }
 0x384   : > { %1936 = vrot.lane.b32.xlu1 %v4207_v46, %s3508_s19  ;;  %1872 = vrot.lane.b32.xlu0 %v4210_v8, %s3506_s14 }
 0x385   : > { %2006 = vrot.lane.b32.xlu2 %v4219_v51, %s3507_s17 }
 0x38c   : > { %1938 = vrot.lane.b32.xlu1 %v4219_v51, %s3508_s19  ;;  %1868 = vrot.lane.b32.xlu0 %v4207_v46, %s3509_s20 }
 0x38d   : > { %2146 = vrot.lane.b32.xlu2 %v1677_v35, %s3510_s23 }
 0x394   : > { %2078 = vrot.lane.b32.xlu1 %v1677_v35, %s3507_s17  ;;  %1870 = vrot.lane.b32.xlu0 %v4219_v51, %s3509_s20  ;;  %s464_s20 = scalar_lea.vmem [#allocation10], %s463_s22 }
 0x395   : > { %2212 = vrot.lane.b32.xlu2 %v4210_v8, %s3496_s15 }
 0x39c   : > { %2144 = vrot.lane.b32.xlu1 %v4210_v8, %s3510_s23  ;;  %2076 = vrot.lane.b32.xlu0 %v4210_v8, %s3507_s17  ;;  %s3026_s17 = scalar_lea.hbm %s4580_s13, %s3605_s29 }
 0x39d   : > { %2142 = vrot.lane.b32.xlu2 %v4219_v51, %s3511_s30  ;;  %s3030_s23 = sshll.u32 %s3026_s17, 4  ;;  %s3031_s23 = int_to_ptr.hbm [resolvable:$true] %s3030_s23 }
 0x39f   : > { %v1687_v4 = vpop.permute.xlu2 %1686 }
 0x3a4   : > { %2010 = vrot.lane.b32.xlu0 %v1677_v35, %s3505_s27  ;;  %2140 = vrot.lane.b32.xlu1 %v4207_v46, %s3511_s30  ;;  %s3018_s30 = scalar_lea.sflag [#allocation7], %s463_s22 }
 0x3a7   : > { %v1683_v15 = vpop.permute.xlu2 %1682 }
 0x3ac   : > { %2072 = vrot.lane.b32.xlu0 %v4207_v46, %s3512_s16  ;;  %2208 = vrot.lane.b32.xlu1 %v4207_v46, %s3513_s21 }
 0x3af   : > { %v1802_v31 = vpop.permute.xlu2 %1801 }
 0x3b4   : > { %2074 = vrot.lane.b32.xlu0 %v4219_v51, %s3512_s16  ;;  %s3421_s16 = sshra.s32 %s3031_s23, 4  ;;  %s3422_s16 = int_to_ptr.hbm [resolvable:$true] %s3421_s16 }
 0x3b5   : > { %p3428_p3 = scmp.lt.s32.totalorder %s3422_s16, %s4580_s13 }
 0x3b7   : > { %v1804_v49 = vpop.permute.xlu2 %1803  ;;  %v1941_v34 = vpop.permute.xlu1 %1940 }
 0x3bc   : > { %2214 = vrot.lane.b32.xlu0 %v1677_v35, %s3496_s15 }
 0x3bf   : > { %v4252_v20 = vpop.permute.xlu2 %2008 }
 0x3c4   : > { %2210 = vrot.lane.b32.xlu0 %v4219_v51, %s3513_s21  ;;  %s3423_s21 = scalar_lea.hbm %s3422_s16, 1 }
 0x3c5   : > { %p3424_p0 = scmp.ne.s32.totalorder %s3422_s16, %s3423_s21  ;;  %p3429_p4 = scmp.lt.s32.totalorder %s3427_s3, %s3423_s21 }
 0x3c7   : > { %p3425_p1 = pnand %p3424_p0, %p3622_p5  ;;  %p3430_p7 = por %p3429_p4, %p3428_p3 }
 0x3c9   : > { %p3426_p2 = pneg %p3425_p1 }
 0x3cb   : > { %p3431_p8 = pnand %p3430_p7, %p3426_p2 }
 0x3cf   : > { %v1943_v58 = vpop.permute.xlu2 %1942 }
 0x3d0   : > { %v1945_v63 = vsel %vm1944_vm14, %v1941_v34, %v1943_v58 }
 0x3d7   : > { %v2005_v22 = vpop.permute.xlu2 %2004 }
 0x3df   : > { %v2007_v21 = vpop.permute.xlu2 %2006 }
 0x3e6   : > { %v1689_v24 = vpop.permute.xlu0 %1688  ;;  %v1808_v11 = vpop.permute.xlu1 %1807 }
 0x3e7   : > { %v1690_v17 = vsel %vm545_vm0, %v1687_v4, %v1689_v24  ;;  %3123 = vmatpush.msk.msra.mxu3 %vm1696_vm12, %v1689_v24  ;;  %3135 = vmatpush.msk.msra.mxu1 %vm1696_vm12, %v1808_v11  ;;  %v2147_v47 = vpop.permute.xlu2 %2146 }
 0x3e8   : > { %3120 = vmatpush.msk.msra.mxu2 %vm1696_vm12, %v1690_v17  ;;  %3124 = vmatmul.msk.f32.vlgmr.msra.gmra.mxu3 %vm1691_vm13, %v1681_v5 }
 0x3e9   : > { %3129 = vmatpush.msk.msrb.mxu3 %vm1696_vm12, %v1677_v35  ;;  %3147 = vmatpush.msk.msrb.mxu1 %vm1696_vm12, %v1943_v58 }
 0x3ea   : > { %3121 = vmatmul.msk.f32.vlgmr.msra.gmra.mxu2 %vm1691_vm13, %v1681_v5  ;;  %3136 = vmatmul.msk.f32.vlgmr.msra.gmra.mxu1 %vm1691_vm13, %v1802_v31 }
 0x3eb   : > { %3126 = vmatpush.msk.msrb.mxu2 %vm1696_vm12, %v4210_v8 }
 0x3ee   : > { %v1875_v37 = vpop.permute.xlu1 %1874  ;;  %v1806_v6 = vpop.permute.xlu0 %1805 }
 0x3ef   : > { %v1809_v50 = vsel %vm605_vm1, %v1806_v6, %v1808_v11  ;;  %3141 = vmatpush.msk.msra.mxu3 %vm1696_vm12, %v1875_v37  ;;  %vm2080_vm1 = vcmask 801792   ;;  %v2213_v59 = vpop.permute.xlu2 %2212 }
 0x3f0   : > { %3125 = vmatmul.msk.f32.gmra.mxu3 %vm1691_vm13, %v1683_v15  ;;  %3132 = vmatpush.msk.msra.mxu0 %vm1696_vm12, %v1809_v50 }
 0x3f1   : > { %3133 = vmatmul.msk.f32.vlgmr.msra.gmra.mxu0 %vm1691_vm13, %v1802_v31 }
 0x3f2   : > { %3144 = vmatpush.msk.msrb.mxu0 %vm1696_vm12, %v1945_v63  ;;  %3122 = vmatmul.msk.f32.gmra.mxu2 %vm1691_vm13, %v1683_v15 }
 0x3f3   : > { %3137 = vmatmul.msk.f32.gmra.mxu1 %vm1691_vm13, %v1804_v49 }
 0x3f6   : > { %v1937_v36 = vpop.permute.xlu1 %1936  ;;  %v1873_v45 = vpop.permute.xlu0 %1872 }
 0x3f7   : > { %v1877_v39 = vsel %vm1876_vm15, %v1873_v45, %v1875_v37  ;;  %v2143_v33 = vpop.permute.xlu2 %2142 }
 0x3f8   : > { %3130 = vmatmul.msk.f32.vlgmr.msrb.gmra.mxu3 %vm1691_vm13, %v4207_v46  ;;  %3138 = vmatpush.msk.msra.mxu2 %vm1696_vm12, %v1877_v39 }
 0x3f9   : > { %3134 = vmatmul.msk.f32.gmra.mxu0 %vm1691_vm13, %v1804_v49 }
 0x3fa   : > { %3127 = vmatmul.msk.f32.vlgmr.msrb.gmra.mxu2 %vm1691_vm13, %v4207_v46 }
 0x3fb   : > { %3148 = vmatmul.msk.f32.vlgmr.msrb.gmra.mxu1 %vm1691_vm13, %v1937_v36 }
 0x3fe   : > { %v1939_v42 = vpop.permute.xlu1 %1938  ;;  %v1869_v38 = vpop.permute.xlu0 %1868 }
 0x400   : > { %3131 = vmatmul.msk.f32.gmra.mxu3 %vm1691_vm13, %v4219_v51 }
 0x401   : > { %3145 = vmatmul.msk.f32.vlgmr.msrb.gmra.mxu0 %vm1691_vm13, %v1937_v36 }
 0x402   : > { %3128 = vmatmul.msk.f32.gmra.mxu2 %vm1691_vm13, %v4219_v51 }
 0x403   : > { %3149 = vmatmul.msk.f32.gmra.mxu1 %vm1691_vm13, %v1939_v42 }
 0x406   : > { %v2079_v41 = vpop.permute.xlu1 %2078  ;;  %v1871_v1 = vpop.permute.xlu0 %1870 }
 0x407   : > { %3159 = vmatpush.msk.msra.mxu1 %vm1696_vm12, %v2079_v41 }
 0x408   : > { %3142 = vmatmul.msk.f32.vlgmr.msra.gmra.mxu3 %vm1691_vm13, %v1869_v38 }
 0x409   : > { %3146 = vmatmul.msk.f32.gmra.mxu0 %vm1691_vm13, %v1939_v42 }
 0x40a   : > { %3139 = vmatmul.msk.f32.vlgmr.msra.gmra.mxu2 %vm1691_vm13, %v1869_v38 }
 0x40e   : > { %v2077_v57 = vpop.permute.xlu0 %2076  ;;  %v2145_v7 = vpop.permute.xlu1 %2144 }
 0x40f   : > { %v2081_v46 = vsel %vm2080_vm1, %v2077_v57, %v2079_v41  ;;  %v2149_v52 = vsel %vm2148_vm4, %v2145_v7, %v2147_v47 }
 0x410   : > { %3143 = vmatmul.msk.f32.gmra.mxu3 %vm1691_vm13, %v1871_v1  ;;  %3156 = vmatpush.msk.msra.mxu0 %vm1696_vm12, %v2081_v46 }
 0x412   : > { %3140 = vmatmul.msk.f32.gmra.mxu2 %vm1691_vm13, %v1871_v1 }
 0x416   : > { %v2011_v43 = vpop.permute.xlu0 %2010  ;;  %v2141_v29 = vpop.permute.xlu1 %2140 }
 0x417   : > { %v2013_v48 = vsel %vm2012_vm3, %v4252_v20, %v2011_v43  ;;  %3153 = vmatpush.msk.msrb.mxu3 %vm1696_vm12, %v2011_v43 }
 0x418   : > { %3150 = vmatpush.msk.msrb.mxu2 %vm1696_vm12, %v2013_v48  ;;  %3154 = vmatmul.msk.f32.vlgmr.msrb.gmra.mxu3 %vm1691_vm13, %v2005_v22 }
 0x419   : > { %3165 = vmatpush.msk.msra.mxu3 %vm1696_vm12, %v2147_v47 }
 0x41a   : > { %3162 = vmatpush.msk.msra.mxu2 %vm1696_vm12, %v2149_v52 }
 0x41b   : > { %3151 = vmatmul.msk.f32.vlgmr.msrb.gmra.mxu2 %vm1691_vm13, %v2005_v22 }
 0x41e   : > { %v2073_v40 = vpop.permute.xlu0 %2072  ;;  %v2209_v56 = vpop.permute.xlu1 %2208 }
 0x41f   : > { %3157 = vmatmul.msk.f32.vlgmr.msra.gmra.mxu0 %vm1691_vm13, %v2073_v40  ;;  %3160 = vmatmul.msk.f32.vlgmr.msra.gmra.mxu1 %vm1691_vm13, %v2073_v40 }
 0x420   : > { %3155 = vmatmul.msk.f32.gmra.mxu3 %vm1691_vm13, %v2007_v21 }
 0x423   : > { %3152 = vmatmul.msk.f32.gmra.mxu2 %vm1691_vm13, %v2007_v21 }
 0x426   : > { %v2075_v12 = vpop.permute.xlu0 %2074 }
 0x427   : > { %3158 = vmatmul.msk.f32.gmra.mxu0 %vm1691_vm13, %v2075_v12  ;;  %3161 = vmatmul.msk.f32.gmra.mxu1 %vm1691_vm13, %v2075_v12 }
 0x428   : > { %3166 = vmatmul.msk.f32.vlgmr.msra.gmra.mxu3 %vm1691_vm13, %v2141_v29 }
 0x42b   : > { %3163 = vmatmul.msk.f32.vlgmr.msra.gmra.mxu2 %vm1691_vm13, %v2141_v29 }
 0x42e   : > { %v2215_v62 = vpop.permute.xlu0 %2214 }
 0x42f   : > { %v2216_v0 = vsel %vm665_vm2, %v2213_v59, %v2215_v62  ;;  %3171 = vmatpush.msk.msrb.mxu1 %vm1696_vm12, %v2215_v62  ;;  %vm2276_vm2 = vcmask 531456  }
 0x430   : > { %3167 = vmatmul.msk.f32.gmra.mxu3 %vm1691_vm13, %v2143_v33  ;;  %3168 = vmatpush.msk.msrb.mxu0 %vm1696_vm12, %v2216_v0 }
 0x431   : > { %3172 = vmatmul.msk.f32.vlgmr.msrb.gmra.mxu1 %vm1691_vm13, %v2209_v56  ;;  %3169 = vmatmul.msk.f32.vlgmr.msrb.gmra.mxu0 %vm1691_vm13, %v2209_v56 }
 0x433   : > { %3164 = vmatmul.msk.f32.gmra.mxu2 %vm1691_vm13, %v2143_v33 }
 0x436   : > { %v2211_v61 = vpop.permute.xlu0 %2210 }
 0x439   : > { %3173 = vmatmul.msk.f32.gmra.mxu1 %vm1691_vm13, %v2211_v61  ;;  %3170 = vmatmul.msk.f32.gmra.mxu0 %vm1691_vm13, %v2211_v61 }
 0x467   : > { %v1858_v51 = vpop.f32.mrf.mxu1 }
 0x46b   : > { %v1741_v53 = vpop.f32.mrf.mxu3 }
 0x46d   : > { %v1718_v16 = vpop.f32.mrf.mxu2 }
 0x46e   : > { %v1835_v8 = vpop.f32.mrf.mxu0 }
 0x470   : > { %v1861_v18 = vpop.f32.mrf.mxu1 }
 0x473   : > { %v1744_v23 = vpop.f32.mrf.mxu3 }
 0x475   : > { %v1721_v54 = vpop.f32.mrf.mxu2 }
 0x476   : > { %v1838_v14 = vpop.f32.mrf.mxu0 }
 0x478   : > { %v1994_v26 = vpop.f32.mrf.mxu1 }
 0x47b   : > { %v1795_v2 = vpop.f32.mrf.mxu3 }
 0x47c   : > { %v1796_v44 = vadd.f32 %v1795_v2, %v1741_v53 }
 0x47d   : > { %v1772_v13 = vpop.f32.mrf.mxu2 }
 0x47e   : > { %v1971_v30 = vpop.f32.mrf.mxu0  ;;  %v1773_v10 = vadd.f32 %v1772_v13, %v1718_v16  ;;  %v1865_v31 = vadd.f32 %v1858_v51, %v1796_v44  ;;  %v2345_v44 = vld [vmem:[%s4573_s6 + $0x88] sm:$0xff] }
 0x480   : > { %v1997_v3 = vpop.f32.mrf.mxu1  ;;  %v1864_v49 = vadd.f32 %v1835_v8, %v1773_v10  ;;  %v2337_v10 = vld [vmem:[%s4573_s6 + $0x48] sm:$0xff] }
 0x483   : > { %v1798_v9 = vpop.f32.mrf.mxu3 }
 0x484   : > { %v1799_v34 = vadd.f32 %v1798_v9, %v1744_v23  ;;  %v2342_v9 = vld [vmem:[%s4573_s6 + $0x70] sm:$0xff] }
 0x485   : > { %v1775_v19 = vpop.f32.mrf.mxu2 }
 0x486   : > { %v1974_v25 = vpop.f32.mrf.mxu0  ;;  %v1776_v11 = vadd.f32 %v1775_v19, %v1721_v54  ;;  %v1867_v50 = vadd.f32 %v1861_v18, %v1799_v34  ;;  %v2343_v18 = vld [vmem:[%s4573_s6 + $0x78] sm:$0xff]  ;;  %v2341_v19 = vld [vmem:[%s4573_s6 + $0x68] sm:$0xff]  ;;  %v2332_v34 = vld [vmem:[%s4573_s6 + $0x20] sm:$0xff] }
 0x487   : > { %2372 = vmatpush.msrb.mxu2 %v2343_v18  ;;  %v2516_v18 = vld [vmem:[#allocation8 + $0x6c] sm:$0xff] }
 0x488   : > { %v1866_v39 = vadd.f32 %v1838_v14, %v1776_v11  ;;  %v2349_v14 = vld [vmem:[%s4572_s5] sm:$0xff] }
 0x489   : > { %2373 = vmatpush.msrb.mxu2 %v2342_v9  ;;  %v2712_v9 = vld [vmem:[#allocation8 + $0x164] sm:$0xf] }
 0x48b   : > { %v1926_v32 = vpop.f32.mrf.mxu3  ;;  %2374 = vmatpush.msrb.mxu2 %v2341_v19 }
 0x48c   : > { %v1933_v5 = vadd.f32 %v1926_v32, %v1865_v31  ;;  %v2347_v32 = vld [vmem:[%s4573_s6 + $0x98] sm:$0xff]  ;;  %v2333_v31 = vld [vmem:[%s4573_s6 + $0x28] sm:$0xff] }
 0x48d   : > { %v1903_v27 = vpop.f32.mrf.mxu2 }
 0x48e   : > { %v1932_v20 = vadd.f32 %v1903_v27, %v1864_v49  ;;  %v2001_v17 = vadd.f32 %v1994_v26, %v1933_v5  ;;  %v2340_v26 = vld [vmem:[%s4573_s6 + $0x60] sm:$0xff] }
 0x48f   : > { %2375 = vmatpush.msrb.mxu2 %v2340_v26 }
 0x490   : > { %v2000_v6 = vadd.f32 %v1971_v30, %v1932_v20  ;;  %v2348_v30 = vld [vmem:[%s4573_s6 + $0xa0] sm:$0x1] }
 0x491   : > { %3174 = vmatpush.msk.msrb.mxu3 %vm2368_vm5, %v2348_v30 }
 0x493   : > { %v1929_v28 = vpop.f32.mrf.mxu3  ;;  %2407 = vmatpush.msrb.mxu3 %v2347_v32  ;;  %v2808_v32 = vld [vmem:[#allocation8 + $0x1d0] sm:$0xf] }
 0x494   : > { %v1935_v45 = vadd.f32 %v1929_v28, %v1867_v50  ;;  %v2346_v28 = vld [vmem:[%s4573_s6 + $0x90] sm:$0xff]  ;;  %v2329_v50 = vld [vmem:[%s4573_s6 + $0x8] sm:$0xff] }
 0x495   : > { %v1906_v55 = vpop.f32.mrf.mxu2  ;;  %2408 = vmatpush.msrb.mxu3 %v2346_v28  ;;  %v2711_v28 = vld [vmem:[#allocation8 + $0x15c] sm:$0xff] }
 0x496   : > { %v1934_v38 = vadd.f32 %v1906_v55, %v1866_v39  ;;  %v2003_v1 = vadd.f32 %v1997_v3, %v1935_v45  ;;  %v2339_v3 = vld [vmem:[%s4573_s6 + $0x58] sm:$0xff] }
 0x497   : > { %2376 = vmatpush.msrb.mxu2 %v2339_v3  ;;  %2409 = vmatpush.msrb.mxu3 %v2345_v44  ;;  %v2807_v3 = vld [vmem:[#allocation8 + $0x1c8] sm:$0xff] }
 0x498   : > { %v2002_v7 = vadd.f32 %v1974_v25, %v1934_v38 }
 0x49b   : > { %v2062_v60 = vpop.f32.mrf.mxu3 }
 0x49c   : > { %v2107_v35 = vpop.f32.mrf.mxu0  ;;  %v2130_v4 = vpop.f32.mrf.mxu1  ;;  %v2069_v63 = vadd.f32 %v2062_v60, %v2001_v17  ;;  %v2338_v60 = vld [vmem:[%s4573_s6 + $0x50] sm:$0xff]  ;;  %v2331_v17 = vld [vmem:[%s4573_s6 + $0x18] sm:$0xff] }
 0x49d   : > { %2377 = vmatpush.msrb.mxu2 %v2338_v60  ;;  %v2552_v60 = vld [vmem:[#allocation8 + $0xb0] sm:$0xf] }
 0x49e   : > { %v2039_v15 = vpop.f32.mrf.mxu2  ;;  %v2137_v22 = vadd.f32 %v2130_v4, %v2069_v63  ;;  %v2335_v4 = vld [vmem:[%s4573_s6 + $0x38] sm:$0xff]  ;;  %v2328_v63 = vld [vmem:[%s4573_s6] sm:$0xff] }
 0x49f   : > { %v2068_v42 = vadd.f32 %v2039_v15, %v2000_v6  ;;  %2378 = vmatpush.msrb.mxu2 %v2337_v10  ;;  %v2334_v15 = vld [vmem:[%s4573_s6 + $0x30] sm:$0xff]  ;;  %v2344_v6 = vld [vmem:[%s4573_s6 + $0x80] sm:$0xff] }
 0x4a0   : > { %2410 = vmatpush.msrb.mxu3 %v2344_v6  ;;  %v2806_v10 = vld [vmem:[#allocation8 + $0x1c0] sm:$0xff]  ;;  %v2839_v6 = vld [vmem:[#allocation8 + $0x1ec] sm:$0xff] }
 0x4a1   : > { %v2136_v21 = vadd.f32 %v2107_v35, %v2068_v42  ;;  %v2336_v35 = vld [vmem:[%s4573_s6 + $0x40] sm:$0xff] }
 0x4a2   : > { %2379 = vmatpush.msrb.mxu2 %v2336_v35  ;;  %v2709_v35 = vld [vmem:[#allocation8 + $0x14c] sm:$0xff] }
 0x4a3   : > { %v2065_v24 = vpop.f32.mrf.mxu3 }
 0x4a4   : > { %v2133_v58 = vpop.f32.mrf.mxu1  ;;  %v2110_v36 = vpop.f32.mrf.mxu0  ;;  %v2071_v43 = vadd.f32 %v2065_v24, %v2003_v1  ;;  %2380 = vmatpush.msrb.mxu2 %v2335_v4  ;;  %v2424_v1 = vld [vmem:[#allocation8 + $0x20] sm:$0xf] }
 0x4a5   : > { %3179 = vmatpush.msk.msra.mxu1 %vm2435_vm6, %v2424_v1  ;;  %v2837_v1 = vld [vmem:[#allocation8 + $0x1dc] sm:$0xff] }
 0x4a6   : > { %v2042_v37 = vpop.f32.mrf.mxu2  ;;  %v2139_v12 = vadd.f32 %v2133_v58, %v2071_v43  ;;  %2381 = vmatpush.msrb.mxu2 %v2334_v15  ;;  %v2350_v58 = vld [vmem:[%s4572_s5 + $0x8] sm:$0xff]  ;;  %v2429_v43 = vld [vmem:[#allocation8 + $0x44] sm:$0xf] }
 0x4a7   : > { %v2070_v29 = vadd.f32 %v2042_v37, %v2002_v7  ;;  %v2330_v37 = vld [vmem:[%s4573_s6 + $0x10] sm:$0xff]  ;;  %v2423_v7 = vld [vmem:[#allocation8 + $0x18] sm:$0xff]  ;;  %3177 = vmatpush.msk.msra.mxu0 %vm2435_vm6, %v2429_v43 }
 0x4a8   : > { %2382 = vmatpush.msrb.mxu2 %v2333_v31  ;;  %2476 = vmatpush.msra.mxu1 %v2423_v7  ;;  %v2551_v31 = vld [vmem:[#allocation8 + $0xa8] sm:$0xff]  ;;  %v2678_v7 = vld [vmem:[#allocation8 + $0x130] sm:$0xff] }
 0x4a9   : > { %v2138_v62 = vadd.f32 %v2110_v36, %v2070_v29  ;;  %v2427_v29 = vld [vmem:[#allocation8 + $0x34] sm:$0xff] }
 0x4aa   : > { %2383 = vmatpush.msrb.mxu2 %v2332_v34  ;;  %v2708_v34 = vld [vmem:[#allocation8 + $0x144] sm:$0xff] }
 0x4ab   : > { %v2198_v41 = vpop.f32.mrf.mxu3 }
 0x4ac   : > { %v2205_v57 = vadd.f32 %v2198_v41, %v2137_v22  ;;  %2384 = vmatpush.msrb.mxu2 %v2331_v17  ;;  %v2840_v17 = vld [vmem:[#allocation8 + $0x1f4] sm:$0xf] }
 0x4ae   : > { %v2175_v46 = vpop.f32.mrf.mxu2  ;;  %v2265_v48 = vpop.f32.mrf.mxu1  ;;  %2385 = vmatpush.msrb.mxu2 %v2330_v37  ;;  %v2614_v37 = vld [vmem:[#allocation8 + $0xe8] sm:$0xff] }
 0x4af   : > { %v2204_v47 = vadd.f32 %v2175_v46, %v2136_v21  ;;  %v2242_v52 = vpop.f32.mrf.mxu0  ;;  %v2272_v40 = vadd.f32 %v2265_v48, %v2205_v57  ;;  %v2428_v48 = vld [vmem:[#allocation8 + $0x3c] sm:$0xff] }
 0x4b0   : > { %2386 = vmatpush.msrb.mxu2 %v2329_v50  ;;  %2451 = vmatpush.msra.mxu0 %v2428_v48 }
 0x4b1   : > { %v2271_v59 = vadd.f32 %v2242_v52, %v2204_v47  ;;  %2277 = vst.msk [vmem:[#allocation4 + $0x8] sm:$0xff] %vm2276_vm2, %v2272_v40  ;;  %v2422_v47 = vld [vmem:[#allocation8 + $0x10] sm:$0xff]  ;;  %v2421_v40 = vld [vmem:[#allocation8 + $0x8] sm:$0xff] }
 0x4b2   : > { %2387 = vmatpush.msrb.mxu2 %v2328_v63  ;;  %2477 = vmatpush.msra.mxu1 %v2422_v47  ;;  %v2584_v52 = vld [vmem:[#allocation8 + $0xd4] sm:$0xf]  ;;  %v2645_v47 = vld [vmem:[#allocation8 + $0x104] sm:$0xff] }
 0x4b3   : > { %2288 = vrot.lane.b32.xlu1 %v2271_v59, %s3494_s24  ;;  %v2201_v33 = vpop.f32.mrf.mxu3  ;;  %3187 = vmatpush.msk.msra.mxu3 %vm2435_vm6, %v2584_v52  ;;  %v2548_v63 = vld [vmem:[#allocation8 + $0x90] sm:$0xff]  ;;  %v2644_v52 = vld [vmem:[#allocation8 + $0xfc] sm:$0xff] }
 0x4b4   : > { %v2207_v56 = vadd.f32 %v2201_v33, %v2139_v12  ;;  %2478 = vmatpush.msra.mxu1 %v2421_v40  ;;  %2452 = vmatpush.msra.mxu0 %v2427_v29  ;;  %v2420_v12 = vld [vmem:[#allocation8] sm:$0xff]  ;;  %v2426_v33 = vld [vmem:[#allocation8 + $0x2c] sm:$0xff] }
 0x4b5   : > { %3201 = vmatpush.msk.msra.mxu2 %vm2435_vm6, %v2808_v32  ;;  %v2677_v40 = vld [vmem:[#allocation8 + $0x128] sm:$0xff] }
 0x4b6   : > { %v2178_v0 = vpop.f32.mrf.mxu2  ;;  %v2268_v53 = vpop.f32.mrf.mxu1  ;;  %2479 = vmatpush.msra.mxu1 %v2420_v12  ;;  %2453 = vmatpush.msra.mxu0 %v2426_v33  ;;  %v2776_v29 = vld [vmem:[#allocation8 + $0x1ac] sm:$0xf]  ;;  %v2775_v12 = vld [vmem:[#allocation8 + $0x1a4] sm:$0xff] }
 0x4b7   : > { %v2206_v61 = vadd.f32 %v2178_v0, %v2138_v62  ;;  %v2245_v16 = vpop.f32.mrf.mxu0  ;;  %v2274_v23 = vadd.f32 %v2268_v53, %v2207_v56  ;;  %v2488_v62 = vld [vmem:[#allocation8 + $0x68] sm:$0xf]  ;;  %v2581_v53 = vld [vmem:[#allocation8 + $0xbc] sm:$0xff]  ;;  %2827 = vmatpush.msra.mxu2 %v2807_v3  ;;  %v2871_v3 = vld [vmem:[#allocation8 + $0x210] sm:$0xff] }
 0x4b8   : > { %v2281_v8 = vld [vmem:[#allocation4 + $0x8] sm:$0xff]  ;;  %3181 = vmatpush.msk.msrb.mxu1 %vm2435_vm6, %v2488_v62  ;;  %v2743_v62 = vld [vmem:[#allocation8 + $0x180] sm:$0xff] }
 0x4b9   : > { %v2273_v54 = vadd.f32 %v2245_v16, %v2206_v61  ;;  %2279 = vst.msk [vmem:[#allocation4 + $0x18] sm:$0xff] %vm2276_vm2, %v2274_v23  ;;  %2290 = vrot.lane.b32.xlu2 %v2281_v8, %s3494_s24  ;;  %v2582_v56 = vld [vmem:[#allocation8 + $0xc4] sm:$0xff]  ;;  %v2520_v16 = vld [vmem:[#allocation8 + $0x8c] sm:$0xf]  ;;  %v2486_v23 = vld [vmem:[#allocation8 + $0x58] sm:$0xff]  ;;  %2828 = vmatpush.msra.mxu2 %v2806_v10 }
 0x4ba   : > { %v2425_v0 = vld [vmem:[#allocation8 + $0x24] sm:$0xff] }
 0x4bb   : > { %2292 = vrot.lane.b32.xlu0 %v2273_v54, %s3494_s24  ;;  %v2487_v61 = vld [vmem:[#allocation8 + $0x60] sm:$0xff]  ;;  %2454 = vmatpush.msra.mxu0 %v2425_v0  ;;  %v2744_v33 = vld [vmem:[#allocation8 + $0x188] sm:$0xf] }
 0x4bc   : > { %2507 = vmatpush.msrb.mxu1 %v2487_v61  ;;  %v2774_v0 = vld [vmem:[#allocation8 + $0x19c] sm:$0xff] }
 0x4bd   : > { %3183 = vmatpush.msk.msrb.mxu0 %vm2435_vm6, %v2520_v16  ;;  %v2742_v61 = vld [vmem:[#allocation8 + $0x178] sm:$0xff]  ;;  %v2741_v16 = vld [vmem:[#allocation8 + $0x170] sm:$0xff]  ;;  %v2869_v10 = vld [vmem:[#allocation8 + $0x200] sm:$0xff] }
 0x4be   : > { %2508 = vmatpush.msrb.mxu1 %v2486_v23 }
 0x4c0   : > { %v2283_v51 = vld [vmem:[#allocation4 + $0x18] sm:$0xff] }
 0x4c1   : > { %2294 = vrot.lane.b32.xlu1 %v2283_v51, %s3494_s24 }
 0x513   : > { %v2291_v2 = vpop.permute.xlu2 %2290 }
 0x514   : > { %v4324_v13 = vmax.f32 %v2281_v8, %v2291_v2  ;;  %v2519_v8 = vld [vmem:[#allocation8 + $0x84] sm:$0xff] }
 0x515   : > { %2539 = vmatpush.msrb.mxu0 %v2519_v8  ;;  %v2772_v8 = vld [vmem:[#allocation8 + $0x18c] sm:$0xff] }
 0x516   : > { %2312 = vrot.lane.b32.xlu0 %v4324_v13, %s3506_s14 }
 0x51e   : > { %2353 = vperm.xlu0 %3315, %v2349_v14   ;;  %v2517_v14 = vld [vmem:[#allocation8 + $0x74] sm:$0xff] }
 0x525   : > { %v2289_v27 = vpop.permute.xlu1 %2288 }
 0x526   : > { %v2296_v25 = vsel %vm545_vm0, %v2289_v27, %v2291_v2  ;;  %v2518_v2 = vld [vmem:[#allocation8 + $0x7c] sm:$0xff] }
 0x527   : > { %v2302_v55 = vmax.f32 %v2271_v59, %v2296_v25  ;;  %v2583_v59 = vld [vmem:[#allocation8 + $0xcc] sm:$0xff]  ;;  %2540 = vmatpush.msrb.mxu0 %v2518_v2  ;;  %v2904_v2 = vld [vmem:[#allocation8 + $0x23c] sm:$0xf] }
 0x528   : > { %2603 = vmatpush.msra.mxu3 %v2583_v59  ;;  %v2676_v59 = vld [vmem:[#allocation8 + $0x120] sm:$0xff] }
 0x529   : > { %2310 = vrot.lane.b32.xlu2 %v2302_v55, %s3506_s14  ;;  %2541 = vmatpush.msrb.mxu0 %v2517_v14 }
 0x52a   : > { %2604 = vmatpush.msra.mxu3 %v2582_v56 }
 0x52b   : > { %2542 = vmatpush.msrb.mxu0 %v2516_v18 }
 0x52c   : > { %2605 = vmatpush.msra.mxu3 %v2581_v53  ;;  %v2773_v53 = vld [vmem:[#allocation8 + $0x194] sm:$0xff] }
 0x52d   : > { %v2293_v49 = vpop.permute.xlu0 %2292 }
 0x533   : > { %v2295_v5 = vpop.permute.xlu1 %2294 }
 0x534   : > { %v2305_v20 = vmax.f32 %v2283_v51, %v2295_v5  ;;  %v2297_v24 = vsel %vm545_vm0, %v2293_v49, %v2295_v5  ;;  %vm2361_vm0 = vcmask 269312   ;;  %v2485_v51 = vld [vmem:[#allocation8 + $0x50] sm:$0xff]  ;;  %v2616_v5 = vld [vmem:[#allocation8 + $0xf8] sm:$0xf] }
 0x535   : > { %v2304_v11 = vmax.f32 %v2273_v54, %v2297_v24  ;;  %v2580_v54 = vld [vmem:[#allocation8 + $0xb4] sm:$0xff]  ;;  %2509 = vmatpush.msrb.mxu1 %v2485_v51 }
 0x536   : > { %2316 = vrot.lane.b32.xlu2 %v2305_v20, %s3506_s14  ;;  %2606 = vmatpush.msra.mxu3 %v2580_v54  ;;  %v2805_v49 = vld [vmem:[#allocation8 + $0x1b8] sm:$0xff]  ;;  %v2615_v24 = vld [vmem:[#allocation8 + $0xf0] sm:$0xff] }
 0x537   : > { %2314 = vrot.lane.b32.xlu1 %v2304_v11, %s3506_s14  ;;  %2829 = vmatpush.msra.mxu2 %v2805_v49  ;;  %v2948_v49 = vld [vmem:[%s4576_s9 + $0x68] sm:$0xff]  ;;  %s3028_s14 = sshll.u32 %s464_s20, 4  ;;  %s3029_s14 = int_to_ptr.vmem [resolvable:$true] %s3028_s14 }
 0x53f   : > { %2358 = vperm.xlu1 %3346, %v2350_v58   ;;  %v2549_v58 = vld [vmem:[#allocation8 + $0x98] sm:$0xff] }
 0x583   : > { %v2311_v45 = vpop.permute.xlu2 %2310 }
 0x588   : > { %v2313_v36 = vpop.permute.xlu0 %2312 }
 0x589   : > { %v2325_v39 = vmax.f32 %v4324_v13, %v2313_v36  ;;  %v2318_v42 = vsel %vm1876_vm15, %v2311_v45, %v2313_v36  ;;  %v2484_v13 = vld [vmem:[#allocation8 + $0x48] sm:$0xff]  ;;  %v2613_v36 = vld [vmem:[#allocation8 + $0xe0] sm:$0xff]  ;;  %v2648_v45 = vld [vmem:[#allocation8 + $0x11c] sm:$0xf] }
 0x58a   : > { %v2324_v38 = vmax.f32 %v2302_v55, %v2318_v42  ;;  %2510 = vmatpush.msrb.mxu1 %v2484_v13  ;;  %v2710_v55 = vld [vmem:[#allocation8 + $0x154] sm:$0xff]  ;;  %v2740_v13 = vld [vmem:[#allocation8 + $0x168] sm:$0xff] }
 0x58b   : > { %3175 = vmatmul.msk.f32.vlgmr.msrb.gmra.mxu3 %vm2361_vm0, %v2325_v39  ;;  %v2612_v42 = vld [vmem:[#allocation8 + $0xd8] sm:$0xff] }
 0x58c   : > { %2388 = vmatmul.f32.vlgmr.msrb.gmra.mxu2 %v2324_v38  ;;  %3195 = vmatpush.msk.msrb.mxu3 %vm2435_vm6, %v2712_v9  ;;  %v2838_v38 = vld [vmem:[#allocation8 + $0x1e4] sm:$0xff]  ;;  %v2903_v9 = vld [vmem:[#allocation8 + $0x234] sm:$0xff] }
 0x58e   : > { %2731 = vmatpush.msrb.mxu3 %v2711_v28 }
 0x590   : > { %v2317_v22 = vpop.permute.xlu2 %2316  ;;  %v2354_v19 = vpop.permute.xlu0 %2353  ;;  %2732 = vmatpush.msrb.mxu3 %v2710_v55  ;;  %v2900_v55 = vld [vmem:[#allocation8 + $0x21c] sm:$0xff] }
 0x591   : > { %v2327_v41 = vmax.f32 %v2305_v20, %v2317_v22  ;;  %v2550_v20 = vld [vmem:[#allocation8 + $0xa0] sm:$0xff] }
 0x592   : > { %2733 = vmatpush.msrb.mxu3 %v2709_v35 }
 0x593   : > { %3176 = vmatmul.msk.f32.gmra.mxu3 %vm2361_vm0, %v2327_v41  ;;  %v2680_v41 = vld [vmem:[#allocation8 + $0x140] sm:$0xf] }
 0x594   : > { %2734 = vmatpush.msrb.mxu3 %v2708_v34  ;;  %v2947_v34 = vld [vmem:[%s4576_s9 + $0x60] sm:$0xff] }
 0x5a9   : > { %v2315_v21 = vpop.permute.xlu1 %2314 }
 0x5aa   : > { %v2319_v57 = vsel %vm1876_vm15, %v2315_v21, %v2317_v22  ;;  %v2647_v22 = vld [vmem:[#allocation8 + $0x114] sm:$0xff]  ;;  %v2646_v21 = vld [vmem:[#allocation8 + $0x10c] sm:$0xff] }
 0x5ab   : > { %v2326_v46 = vmax.f32 %v2304_v11, %v2319_v57  ;;  %v2804_v11 = vld [vmem:[#allocation8 + $0x1b0] sm:$0xff]  ;;  %v2679_v57 = vld [vmem:[#allocation8 + $0x138] sm:$0xff] }
 0x5ac   : > { %2830 = vmatpush.msra.mxu2 %v2804_v11 }
 0x5ad   : > { %2391 = vmatmul.f32.gmra.mxu2 %v2326_v46  ;;  %v2836_v46 = vld [vmem:[#allocation8 + $0x1d4] sm:$0xff] }
 0x5b1   : > { %v2359_v23 = vpop.permute.xlu1 %2358 }
 0x60e   : > { %v2412_v27 = vpop.f32.mrf.mxu3 }
 0x60f   : > { %v2389_v30 = vpop.f32.mrf.mxu2 }
 0x610   : > { %v2390_v26 = vadd.f32 %v2389_v30, %v2354_v19  ;;  %v2902_v30 = vld [vmem:[#allocation8 + $0x22c] sm:$0xff] }
 0x612   : > { %v2413_v25 = vadd.f32 %v2412_v27, %v2390_v26  ;;  %v2872_v26 = vld [vmem:[#allocation8 + $0x218] sm:$0xf] }
 0x614   : > { %v4412_v44 = vmax.f32 %v2413_v25, 0.0  ;;  %v2901_v25 = vld [vmem:[#allocation8 + $0x224] sm:$0xff] }
 0x616   : > { %3180 = vmatmul.msk.f32.vlgmr.msra.gmra.mxu1 %vm2432_vm7, %v4412_v44  ;;  %v2431_v4 = vrot.slane %v4412_v44, 1  ;;  %v2585_v15 = vrot.slane %v4412_v44, 5  ;;  %v2489_v50 = vrot.slane %v4412_v44, 2  ;;  %v2521_v39 = vrot.slane %v4412_v44, 3  ;;  %v2415_v14 = vpop.f32.mrf.mxu3 }
 0x617   : > { %3185 = vmatpush.msk.msra.mxu1 %vm2435_vm6, %v2552_v60  ;;  %v2553_v43 = vrot.slane %v4412_v44, 4  ;;  %v2617_v48 = vrot.slane %v4412_v44, 6  ;;  %v2649_v56 = vrot.slane %v4412_v44, 7  ;;  %v2870_v44 = vld [vmem:[#allocation8 + $0x208] sm:$0xff] }
 0x618   : > { %3178 = vmatmul.msk.f32.vlgmr.msra.gmra.mxu0 %vm2432_vm7, %v2431_v4  ;;  %3188 = vmatmul.msk.f32.vlgmr.msra.gmra.mxu3 %vm2432_vm7, %v2585_v15  ;;  %v2868_v15 = vld [vmem:[#allocation8 + $0x1f8] sm:$0xff] }
 0x619   : > { %2571 = vmatpush.msra.mxu1 %v2551_v31  ;;  %3189 = vmatpush.msk.msra.mxu0 %vm2435_vm6, %v2616_v5  ;;  %v2949_v5 = vld [vmem:[%s4576_s9 + $0x70] sm:$0xff] }
 0x61a   : > { %3203 = vmatpush.msk.msra.mxu3 %vm2435_vm6, %v2840_v17  ;;  %2956 = vmatpush.msrb.mxu2 %v2949_v5  ;;  %v2945_v17 = vld [vmem:[%s4576_s9 + $0x50] sm:$0xff]  ;;  %v2987_v5 = vld [vmem:[%s4579_s12] sm:$0x1] }
 0x61b   : > { %2572 = vmatpush.msra.mxu1 %v2550_v20  ;;  %2635 = vmatpush.msra.mxu0 %v2615_v24  ;;  %v2946_v20 = vld [vmem:[%s4576_s9 + $0x58] sm:$0xff] }
 0x61c   : > { %2859 = vmatpush.msra.mxu3 %v2839_v6  ;;  %2957 = vmatpush.msrb.mxu2 %v2948_v49  ;;  %v2942_v6 = vld [vmem:[%s4576_s9 + $0x38] sm:$0xff] }
 0x61d   : > { %2573 = vmatpush.msra.mxu1 %v2549_v58  ;;  %2636 = vmatpush.msra.mxu0 %v2614_v37  ;;  %v2944_v58 = vld [vmem:[%s4576_s9 + $0x48] sm:$0xff]  ;;  %v2943_v37 = vld [vmem:[%s4576_s9 + $0x40] sm:$0xff] }
 0x61e   : > { %3182 = vmatmul.msk.f32.vlgmr.msrb.gmra.mxu1 %vm2432_vm7, %v2489_v50  ;;  %2860 = vmatpush.msra.mxu3 %v2838_v38  ;;  %v2938_v38 = vld [vmem:[%s4576_s9 + $0x18] sm:$0xff] }
 0x61f   : > { %2574 = vmatpush.msra.mxu1 %v2548_v63  ;;  %2637 = vmatpush.msra.mxu0 %v2613_v36  ;;  %v2941_v36 = vld [vmem:[%s4576_s9 + $0x30] sm:$0xff] }
 0x620   : > { %3184 = vmatmul.msk.f32.vlgmr.msrb.gmra.mxu0 %vm2432_vm7, %v2521_v39  ;;  %2861 = vmatpush.msra.mxu3 %v2837_v1  ;;  %v2939_v39 = vld [vmem:[%s4576_s9 + $0x20] sm:$0xff] }
 0x621   : > { %3191 = vmatpush.msk.msrb.mxu1 %vm2435_vm6, %v2648_v45  ;;  %2638 = vmatpush.msra.mxu0 %v2612_v42  ;;  %v2940_v45 = vld [vmem:[%s4576_s9 + $0x28] sm:$0xff] }
 0x622   : > { %2862 = vmatpush.msra.mxu3 %v2836_v46  ;;  %2958 = vmatpush.msrb.mxu2 %v2947_v34 }
 0x623   : > { %2667 = vmatpush.msrb.mxu1 %v2647_v22  ;;  %3193 = vmatpush.msk.msrb.mxu0 %vm2435_vm6, %v2680_v41  ;;  %v2937_v41 = vld [vmem:[%s4576_s9 + $0x10] sm:$0xff] }
 0x624   : > { %2959 = vmatpush.msrb.mxu2 %v2946_v20 }
 0x625   : > { %2668 = vmatpush.msrb.mxu1 %v2646_v21  ;;  %2699 = vmatpush.msrb.mxu0 %v2679_v57  ;;  %v2936_v57 = vld [vmem:[%s4576_s9 + $0x8] sm:$0xff] }
 0x626   : > { %3186 = vmatmul.msk.f32.vlgmr.msra.gmra.mxu1 %vm2432_vm7, %v2553_v43  ;;  %2960 = vmatpush.msrb.mxu2 %v2945_v17 }
 0x627   : > { %2700 = vmatpush.msrb.mxu0 %v2678_v7  ;;  %2669 = vmatpush.msrb.mxu1 %v2645_v47  ;;  %v2935_v7 = vld [vmem:[%s4576_s9] sm:$0xff]  ;;  %v2986_v47 = vld [vmem:[%s4578_s11 + $0x50] sm:$0xf] }
 0x628   : > { %3190 = vmatmul.msk.f32.vlgmr.msra.gmra.mxu0 %vm2432_vm7, %v2617_v48  ;;  %2961 = vmatpush.msrb.mxu2 %v2944_v58  ;;  %v2985_v48 = vld [vmem:[%s4578_s11 + $0x48] sm:$0xff] }
 0x629   : > { %2670 = vmatpush.msrb.mxu1 %v2644_v52  ;;  %2701 = vmatpush.msrb.mxu0 %v2677_v40  ;;  %v2984_v52 = vld [vmem:[%s4578_s11 + $0x40] sm:$0xff] }
 0x62a   : > { %2962 = vmatpush.msrb.mxu2 %v2943_v37 }
 0x62b   : > { %3199 = vmatpush.msk.msra.mxu1 %vm2435_vm6, %v2776_v29  ;;  %2702 = vmatpush.msrb.mxu0 %v2676_v59  ;;  %v2983_v59 = vld [vmem:[%s4578_s11 + $0x38] sm:$0xff] }
 0x62c   : > { %2963 = vmatpush.msrb.mxu2 %v2942_v6 }
 0x62d   : > { %2795 = vmatpush.msra.mxu1 %v2775_v12  ;;  %3197 = vmatpush.msk.msra.mxu0 %vm2435_vm6, %v2744_v33  ;;  %v2982_v33 = vld [vmem:[%s4578_s11 + $0x30] sm:$0xff] }
 0x62e   : > { %3192 = vmatmul.msk.f32.vlgmr.msrb.gmra.mxu1 %vm2432_vm7, %v2649_v56  ;;  %2964 = vmatpush.msrb.mxu2 %v2941_v36 }
 0x62f   : > { %2763 = vmatpush.msra.mxu0 %v2743_v62  ;;  %2796 = vmatpush.msra.mxu1 %v2774_v0  ;;  %v2981_v0 = vld [vmem:[%s4578_s11 + $0x28] sm:$0xff] }
 0x630   : > { %v2392_v54 = vpop.f32.mrf.mxu2  ;;  %2965 = vmatpush.msrb.mxu2 %v2940_v45 }
 0x631   : > { %2764 = vmatpush.msra.mxu0 %v2742_v61  ;;  %v2393_v51 = vadd.f32 %v2392_v54, %v2359_v23  ;;  %2797 = vmatpush.msra.mxu1 %v2773_v53  ;;  %v2980_v53 = vld [vmem:[%s4578_s11 + $0x20] sm:$0xff]  ;;  %v2979_v23 = vld [vmem:[%s4578_s11 + $0x18] sm:$0xff] }
 0x632   : > { %2966 = vmatpush.msrb.mxu2 %v2939_v39 }
 0x633   : > { %2765 = vmatpush.msra.mxu0 %v2741_v16  ;;  %v2416_v18 = vadd.f32 %v2415_v14, %v2393_v51  ;;  %2798 = vmatpush.msra.mxu1 %v2772_v8 }
 0x634   : > { %2967 = vmatpush.msrb.mxu2 %v2938_v38 }
 0x635   : > { %3207 = vmatpush.msk.msrb.mxu1 %vm2435_vm6, %v2904_v2  ;;  %2766 = vmatpush.msra.mxu0 %v2740_v13  ;;  %v2419_v19 = vmax.f32 %v2416_v18, 0.0 }
 0x636   : > { %2968 = vmatpush.msrb.mxu2 %v2937_v41 }
 0x637   : > { %2923 = vmatpush.msrb.mxu1 %v2903_v9  ;;  %3194 = vmatmul.msk.f32.vlgmr.msrb.gmra.mxu0 %vm2432_vm7, %v2419_v19  ;;  %v2713_v32 = vrot.slane %v2419_v19, 1  ;;  %v2777_v27 = vrot.slane %v2419_v19, 3  ;;  %v2809_v28 = vrot.slane %v2419_v19, 4  ;;  %v2745_v60 = vrot.slane %v2419_v19, 2 }
 0x638   : > { %3205 = vmatpush.msk.msrb.mxu0 %vm2435_vm6, %v2872_v26  ;;  %v2841_v35 = vrot.slane %v2419_v19, 5  ;;  %v2905_v4 = vrot.slane %v2419_v19, 7  ;;  %v2873_v31 = vrot.slane %v2419_v19, 6  ;;  %2969 = vmatpush.msrb.mxu2 %v2936_v57 }
 0x639   : > { %2924 = vmatpush.msrb.mxu1 %v2902_v30  ;;  %3196 = vmatmul.msk.f32.vlgmr.msrb.gmra.mxu3 %vm2432_vm7, %v2713_v32 }
 0x63a   : > { %3200 = vmatmul.msk.f32.vlgmr.msra.gmra.mxu1 %vm2432_vm7, %v2777_v27  ;;  %3202 = vmatmul.msk.f32.vlgmr.msra.gmra.mxu2 %vm2432_vm7, %v2809_v28  ;;  %v2932_v28 = vld [vmem:[%s4575_s8] sm:$0x1] }
 0x63b   : > { %2925 = vmatpush.msrb.mxu1 %v2901_v25  ;;  %2891 = vmatpush.msrb.mxu0 %v2871_v3 }
 0x63c   : > { %2970 = vmatpush.msrb.mxu2 %v2935_v7  ;;  %3210 = vmatpush.msk.msrb.mxu3 %vm2435_vm6, %v2986_v47 }
 0x63d   : > { %2926 = vmatpush.msrb.mxu1 %v2900_v55  ;;  %2892 = vmatpush.msrb.mxu0 %v2870_v44  ;;  %v2978_v44 = vld [vmem:[%s4578_s11 + $0x10] sm:$0xff] }
 0x63e   : > { %3001 = vmatpush.msrb.mxu3 %v2985_v48 }
 0x63f   : > { %3198 = vmatmul.msk.f32.vlgmr.msra.gmra.mxu0 %vm2432_vm7, %v2745_v60  ;;  %v2977_v60 = vld [vmem:[%s4578_s11 + $0x8] sm:$0xff] }
 0x640   : > { %2893 = vmatpush.msrb.mxu0 %v2869_v10  ;;  %3002 = vmatpush.msrb.mxu3 %v2984_v52  ;;  %v2976_v10 = vld [vmem:[%s4578_s11] sm:$0xff] }
 0x641   : > { %3204 = vmatmul.msk.f32.vlgmr.msra.gmra.mxu3 %vm2432_vm7, %v2841_v35  ;;  %v2950_v35 = vld [vmem:[%s4577_s10] sm:$0x1] }
 0x642   : > { %3208 = vmatmul.msk.f32.vlgmr.msrb.gmra.mxu1 %vm2432_vm7, %v2905_v4  ;;  %2894 = vmatpush.msrb.mxu0 %v2868_v15 }
 0x643   : > { %3003 = vmatpush.msrb.mxu3 %v2983_v59 }
 0x645   : > { %3004 = vmatpush.msrb.mxu3 %v2982_v33 }
 0x647   : > { %3206 = vmatmul.msk.f32.vlgmr.msrb.gmra.mxu0 %vm2432_vm7, %v2873_v31  ;;  %3005 = vmatpush.msrb.mxu3 %v2981_v0 }
 0x649   : > { %3006 = vmatpush.msrb.mxu3 %v2980_v53 }
 0x64b   : > { %3007 = vmatpush.msrb.mxu3 %v2979_v23 }
 0x64d   : > { %3008 = vmatpush.msrb.mxu3 %v2978_v44 }
 0x64f   : > { %3009 = vmatpush.msrb.mxu3 %v2977_v60 }
 0x651   : > { %3010 = vmatpush.msrb.mxu3 %v2976_v10 }
 0x693   : > { %v2481_v24 = vpop.f32.mrf.mxu1 }
 0x695   : > { %v2456_v11 = vpop.f32.mrf.mxu0 }
 0x696   : > { %v2482_v42 = vadd.f32 %v2481_v24, %v2456_v11 }
 0x69b   : > { %v2512_v50 = vpop.f32.mrf.mxu1  ;;  %v2608_v40 = vpop.f32.mrf.mxu3 }
 0x69c   : > { %v2515_v22 = vadd.f32 %v2512_v50, %v2482_v42 }
 0x69d   : > { %v2544_v63 = vpop.f32.mrf.mxu0 }
 0x69e   : > { %v2547_v46 = vadd.f32 %v2544_v63, %v2515_v22 }
 0x6a3   : > { %v2576_v1 = vpop.f32.mrf.mxu1 }
 0x6a4   : > { %v2579_v43 = vadd.f32 %v2576_v1, %v2547_v46 }
 0x6a5   : > { %v2640_v21 = vpop.f32.mrf.mxu0 }
 0x6a6   : > { %v2611_v29 = vadd.f32 %v2608_v40, %v2579_v43 }
 0x6a8   : > { %v2643_v56 = vadd.f32 %v2640_v21, %v2611_v29 }
 0x6ab   : > { %v2672_v62 = vpop.f32.mrf.mxu1 }
 0x6ac   : > { %v2675_v61 = vadd.f32 %v2672_v62, %v2643_v56 }
 0x6b4   : > { %v2704_v12 = vpop.f32.mrf.mxu0 }
 0x6b5   : > { %v2707_v16 = vadd.f32 %v2704_v12, %v2675_v61 }
 0x6b7   : > { %v2800_v2 = vpop.f32.mrf.mxu1 }
 0x6bc   : > { %v2736_v54 = vpop.f32.mrf.mxu3  ;;  %v2768_v8 = vpop.f32.mrf.mxu0 }
 0x6bd   : > { %v2739_v51 = vadd.f32 %v2736_v54, %v2707_v16  ;;  %v2832_v18 = vpop.f32.mrf.mxu2 }
 0x6bf   : > { %v2771_v13 = vadd.f32 %v2768_v8, %v2739_v51  ;;  %v2928_v27 = vpop.f32.mrf.mxu1 }
 0x6c1   : > { %v2803_v14 = vadd.f32 %v2800_v2, %v2771_v13 }
 0x6c3   : > { %v2835_v9 = vadd.f32 %v2832_v18, %v2803_v14 }
 0x6c4   : > { %v2864_v19 = vpop.f32.mrf.mxu3  ;;  %v2896_v26 = vpop.f32.mrf.mxu0 }
 0x6c5   : > { %v2867_v30 = vadd.f32 %v2864_v19, %v2835_v9 }
 0x6c7   : > { %v2899_v32 = vadd.f32 %v2896_v26, %v2867_v30 }
 0x6c9   : > { %v2931_v25 = vadd.f32 %v2928_v27, %v2899_v32 }
 0x6cb   : > { %v2933_v3 = vadd.f32 %v2932_v28, %v2931_v25 }
 0x6cd   : > { %v2934_v55 = vmax.f32 %v2933_v3, 0.0 }
 0x6cf   : > { %3209 = vmatmul.msk.f32.vlgmr.msrb.gmra.mxu2 %vm2951_vm8, %v2934_v55 }
 0x752   : > { %v2972_v4 = vpop.f32.mrf.mxu2 }
 0x753   : > { %v2973_v15 = vadd.f32 %v2972_v4, %v2950_v35 }
 0x755   : > { %v2975_v31 = vmax.f32 %v2973_v15, 0.0 }
 0x757   : > { %3211 = vmatmul.msk.f32.vlgmr.msrb.gmra.mxu3 %vm2988_vm9, %v2975_v31 }
 0x7da   : > { %v3012_v49 = vpop.f32.mrf.mxu3 }
 0x7db   : > { %v3013_v34 = vadd.f32 %v3012_v49, %v2987_v5 }
 0x7dd   : > { %3016 = vst.msk [vmem:[%s464_s20] sm:$0x1] %vm3015_vm10, %v3013_v34 }
 0x7de   : > { %3434 = shalt.err (!%p3431_p8)
}
 0x7df   : > { %3222 = dma.vmem_to_hbm [thread:$0]  (%p3622_p5), %s3029_s14, 16, %s3031_s23, %s3018_s30  }
 0x7e0 PF: > { %p3239_p9 = scmp.ge.s32.totalorder %s3477_s28, 2  ;;  %s3042_s19 = sand.u32 1, %s3465_s25  }
 0x7e1   : > { %s3043_s24 = scalar_lea.sflag [#allocation7], %s3042_s19 }
 0x7e2   : > { %p3232_p10 = pnand %p3239_p9, %p3626_p6 }
 0x7e4   : > { %p3233_p11 = pneg %p3232_p10 }
 0x7e6   : > { %3460 = dma.done.wait (%p3233_p11), %s3043_s24, 16  }
 0x7e7   : > { %3462 = vsyncadd (%p3233_p11), %s3043_s24, 4294967280  ;;  %s4595_s28 = sld [smem:[#allocation15_spill]]  ;;  %s4598_s25 = smov %s3469_s26 }
 0x7e8   : > { %s4596_s20 = sld [smem:[#allocation14_spill]] }
 0x7e9   : > { %s4597_s27 = sld [smem:[#allocation16_spill]] }
 0x7ed   : > { %p25_p12 = scmp.ge.s32.totalorder %s4595_s28, 4  }
 0x7ee   : > { %s4599_s26 = smov %s4596_s20 }
 0x7ef   :  { %27 = sbr.rel (!%p25_p12) target bundleno = 7 (0x7), region = 116 }
 0x7f4   :  { %3048 = vsyncpa [#allocation6], 1 }
 0x7f5   :  { %3050 = vsyncpa [#allocation6 + $0x1], 1 }
 0x7f6   :  { %3051 = vsyncpa [#allocation9], 1 }
 0x7f7   :  { %3052 = vsyncpa [#allocation7], 1 }
 0x7f8   :  { %3054 = vsyncpa [#allocation7 + $0x1], 1 }

</bundles_post_ra>
